<compile_context>
chip_gen: v5e
topology: v5e:2x2
jax: 0.10.0
libtpu: 0.0.40
codegen_flags: <defaults>
</compile_context>

<pallas_src>
import functools

import jax
import jax.numpy as jnp
import numpy as np
from jax.experimental import pallas as pl
from jax.experimental.pallas import tpu as pltpu

# ---------------- ANI-style constants (synthetic, ANI-1x-like) ----------------
NUM_SPECIES = 4                      # e.g. H, C, N, O
RCR = 5.2                            # radial cutoff (Angstrom)
RCA = 3.5                            # angular cutoff (Angstrom)
ETA_R = 16.0
SHF_R = jnp.linspace(0.9, 4.93, 16, dtype=jnp.float32)              # 16 radial shifts
ETA_A = 8.0
ZETA = 32.0
SHF_A = jnp.linspace(0.9, 2.85, 4, dtype=jnp.float32)               # 4 distance shifts (angular)
SHF_Z = jnp.linspace(0.19634954, 2.9452431, 8, dtype=jnp.float32)   # 8 angle shifts

NR = SHF_R.shape[0]
NA = SHF_A.shape[0]
NZ = SHF_Z.shape[0]
NP_PAIRS = NUM_SPECIES * (NUM_SPECIES + 1) // 2
AEV_DIM = NUM_SPECIES * NR + NP_PAIRS * NA * NZ   # 4*16 + 10*4*8 = 384

H1, H2 = 128, 64                     # per-species MLP hidden sizes (synthetic)
CELU_ALPHA = 0.1                     # torchani uses CELU(0.1)
INV_CELU_ALPHA = 1.0 / CELU_ALPHA

MXU_ROWS_TARGET = 2048               # atom rows per grid step (amortize ~0.35us/step)
MXU_ROWS_SPLIT = 1024                # min rows/step kept when splitting for megacore

# Per-species atomic self energies (Hartree, ANI-1x-like), used by the EnergyShifter
SELF_ENERGIES = jnp.array([-0.600953, -38.08316, -54.7077, -75.194466], dtype=jnp.float32)


def _round_up(x, m):
    return ((x + m - 1) // m) * m


def _celu(x, alpha=CELU_ALPHA, inv_alpha=INV_CELU_ALPHA):
    # CELU(alpha): max(0,x) + min(0, alpha*(exp(x/alpha)-1)); exp-guarded and using a
    # reciprocal multiply (vector divide would cost an extra EUP/VPU pass).
    return jnp.where(x > 0, x, alpha * (jnp.exp(jnp.minimum(x, 0.0) * inv_alpha) - 1.0))


# ------------------------------------------------------------------------------
# AEVComputer (dense, fully-vectorized re-implementation of the radial + angular
# symmetry functions).  Kept in plain JAX glue.
# TODO(synk): the AEV neighbor-list construction / species-pair triu scatter and
# the O(A^3) angular accumulation have no clean Pallas equivalent at these shapes;
# they stay dense JAX here (and dominate wall-clock for large A) while the NN
# matmul / reduction / shift hot path is in Pallas.
# ------------------------------------------------------------------------------
def compute_aev(species, coords):
    """species: (C, A) int32 with -1 padding; coords: (C, A, 3) f32 -> (onehot, aev)."""
    C, A = species.shape
    valid = species >= 0                                              # (C, A)
    oh = jax.nn.one_hot(jnp.where(valid, species, 0), NUM_SPECIES, dtype=jnp.float32)
    oh = oh * valid[..., None].astype(jnp.float32)                    # (C, A, NS)

    rvec = coords[:, None, :, :] - coords[:, :, None, :]              # (C, i, j, 3) = r_j - r_i
    dist2 = jnp.sum(rvec * rvec, axis=-1)                             # (C, A, A)
    eye = jnp.eye(A, dtype=bool)[None]
    dist = jnp.sqrt(jnp.where(eye, 1.0, dist2) + 1e-12)
    dist = jnp.where(eye, 1e6, dist)                                  # kill self-pairs

    pair_valid = (valid[:, :, None] & valid[:, None, :] & (~eye))     # (C, A, A)
    pv = pair_valid.astype(jnp.float32)

    # ---- radial sub-AEV: (NS, NR) per atom ----
    fc_r = jnp.where(dist <= RCR, 0.5 * jnp.cos(jnp.pi * dist / RCR) + 0.5, 0.0) * pv
    rad_t = 0.25 * jnp.exp(-ETA_R * (dist[..., None] - SHF_R) ** 2) * fc_r[..., None]  # (C,A,A,NR)
    radial_aev = jnp.einsum("cijr,cjs->cisr", rad_t, oh)              # (C, A, NS, NR)
    radial_aev = radial_aev.reshape(C, A, NUM_SPECIES * NR)

    # ---- angular sub-AEV: (NP, NA, NZ) per atom ----
    fc_a = jnp.where(dist <= RCA, 0.5 * jnp.cos(jnp.pi * dist / RCA) + 0.5, 0.0) * pv
    inner = jnp.einsum("cijx,cikx->cijk", rvec, rvec)                 # vec_ij . vec_ik
    cos_t = 0.95 * inner / (dist[:, :, :, None] * dist[:, :, None, :])
    theta = jnp.arccos(jnp.clip(cos_t, -1.0, 1.0))                    # (C, A, A, A)
    base = jnp.clip((1.0 + jnp.cos(theta[..., None] - SHF_Z)) / 2.0, 0.0, 1.0)
    f1 = base ** ZETA                                                 # (C, A, A, A, NZ)
    davg = (dist[:, :, :, None] + dist[:, :, None, :]) / 2.0
    f2 = jnp.exp(-ETA_A * (davg[..., None] - SHF_A) ** 2)             # (C, A, A, A, NA)
    fcp = fc_a[:, :, :, None] * fc_a[:, :, None, :]                   # (C, A, A, A)
    ang_t = 2.0 * f2[..., :, None] * f1[..., None, :] * fcp[..., None, None]  # (C,A,A,A,NA,NZ)

    jk_tri = jnp.triu(jnp.ones((A, A), jnp.float32), k=1).astype(bool)[None, None]
    tmask = (pair_valid[:, :, :, None] & pair_valid[:, :, None, :]) & jk_tri  # (C, i, j, k)

    # species-pair one-hot over (j, k) using the triu (s1 <= s2) pair ordering
    poh = []
    for s1 in range(NUM_SPECIES):
        for s2 in range(s1, NUM_SPECIES):
            if s1 == s2:
                poh.append(oh[:, :, None, s1] * oh[:, None, :, s1])
            else:
                poh.append(oh[:, :, None, s1] * oh[:, None, :, s2]
                           + oh[:, :, None, s2] * oh[:, None, :, s1])
    poh = jnp.stack(poh, axis=-1)                                     # (C, A, A, NP)

    ang_aev = jnp.einsum("cijkaz,cjkp,cijk->cipaz",
                         ang_t, poh, tmask.astype(jnp.float32))       # (C, A, NP, NA, NZ)
    ang_aev = ang_aev.reshape(C, A, NP_PAIRS * NA * NZ)

    aev = jnp.concatenate([radial_aev, ang_aev], axis=-1)             # (C, A, AEV_DIM)
    return oh, aev.astype(jnp.float32)


# ------------------------------------------------------------------------------
# Pallas kernel: fused per-species MLP ensemble + one-hot species selection +
# per-molecule atom-sum reduction + self-energy shift (SAE folded into b3).
#
# Per grid step (CB molecules, R = CB * A_pad atom rows):
#   aev : (R, AEV_DIM)       bf16     lane-dense matmul M
#   oh  : (R, NUM_SPECIES)   f32      one-hot species (zero rows for padding)
#   w1  : (AEV_DIM, 4*H1)    bf16     fused layer-1 (N = 512)
#   w2  : (4*H1, 4*H2)       bf16     block-diagonal layer-2 (N = 256)
#   w3  : (1, 4*H2)          f32      final layer stays on VPU/XLU
#   b3  : (1, NUM_SPECIES)   f32      final bias + SELF_ENERGIES (energy shifter)
#   out : (CB, 128)          f32      per-molecule energy broadcast across lanes
# ------------------------------------------------------------------------------
def _ani_nn_kernel(aev_ref, oh_ref, w1_ref, b1_ref, w2_ref, b2_ref,
                   w3_ref, b3_ref, out_ref, *, cb, a_pad):
    aev = aev_ref[...]                                       # (R, AEV_DIM) bf16
    oh = oh_ref[...]                                         # (R, NS)      f32

    # layer 1: single lane-dense MXU push, N = NUM_SPECIES*H1, f32 accumulation.
    # bias-add + CELU in bf16 (native VPU/EUP on v6e/v7x; halves activation traffic).
    h1 = (jnp.dot(aev, w1_ref[...], preferred_element_type=jnp.float32)
          + b1_ref[...]).astype(jnp.bfloat16)
    h1 = _celu(h1)                                           # (R, 512) bf16

    # layer 2: block-diagonal fused weights -> one push, N = NUM_SPECIES*H2
    # TODO(synk): on v5e (128x128 MXU) replace this with 4 unfused (R,128)x(128,64)
    # dots to avoid pushing the 75%-zero off-diagonal K/N tiles.
    h2 = (jnp.dot(h1, w2_ref[...], preferred_element_type=jnp.float32)
          + b2_ref[...]).astype(jnp.bfloat16)
    h2 = _celu(h2)                                           # (R, 256) bf16

    # final linear layer + species selection + SAE: keep on VPU (mul) + XLU (reduce);
    # MXU is the binding unit, so these fill otherwise-idle slots.
    prod = h2.astype(jnp.float32) * w3_ref[...]              # (R, 256) f32
    atomic = jnp.sum(oh * b3_ref[...], axis=-1, keepdims=True)   # (R, 1): bias + SAE, 0 for pads
    for s in range(NUM_SPECIES):                             # static unroll over species chunks
        e_s = jnp.sum(prod[:, s * H2:(s + 1) * H2], axis=-1, keepdims=True)    # (R, 1)
        atomic = atomic + oh[:, s:s + 1] * e_s

    # per-molecule reduction over the A_pad contiguous atom rows of each molecule.
    # (R,1)->(cb,8,1) groups whole 8-sublane vregs, so this is a plain sublane reduce.
    mol = jnp.sum(atomic.reshape(cb, a_pad, 1), axis=1)      # (CB, 1)
    out_ref[...] = jnp.broadcast_to(mol, out_ref.shape)      # lane-dense (CB, 128) store


def _pack_params(params):
    """Fuse the per-species networks into lane-dense weight tensors; fold SAE into b3."""
    w1p = jnp.concatenate([params["w1"][s] for s in range(NUM_SPECIES)],
                          axis=1).astype(jnp.bfloat16)                      # (AEV_DIM, 4*H1)
    b1p = jnp.concatenate([params["b1"][s] for s in range(NUM_SPECIES)], axis=1)  # (1, 4*H1)
    w2bd = jnp.zeros((NUM_SPECIES * H1, NUM_SPECIES * H2), jnp.float32)
    for s in range(NUM_SPECIES):
        w2bd = w2bd.at[s * H1:(s + 1) * H1, s * H2:(s + 1) * H2].set(params["w2"][s])
    w2bd = w2bd.astype(jnp.bfloat16)                                         # (4*H1, 4*H2)
    b2p = jnp.concatenate([params["b2"][s] for s in range(NUM_SPECIES)], axis=1)  # (1, 4*H2)
    w3p = jnp.concatenate([params["w3"][s] for s in range(NUM_SPECIES)], axis=1)  # (1, 4*H2)
    # EnergyShifter folded into the per-species output bias; padded atoms (oh == 0)
    # still contribute exactly 0.
    b3p = params["b3"].reshape(1, NUM_SPECIES) + SELF_ENERGIES.reshape(1, NUM_SPECIES)
    return w1p, b1p, w2bd, b2p, w3p, b3p


def ani_nn_pallas(aev, oh, params):
    C, A_pad, D = aev.shape

    # Molecules per grid step: target MXU_ROWS_TARGET atom rows, capped by the batch
    # so tiny batches don't pad to zero work, then (optionally) split so the
    # "parallel" grid axis has >=2 steps for the v7x dual TensorCores.
    cb = max(8, _round_up(-(-MXU_ROWS_TARGET // A_pad), 8))
    cb = min(cb, _round_up(C, 8))
    if _round_up(C, cb) == cb and cb >= 16 and (cb // 2) * A_pad >= MXU_ROWS_SPLIT:
        cb = _round_up(-(-cb // 2), 8)
    c_pad = _round_up(C, cb)

    if c_pad != C:
        pad = ((0, c_pad - C), (0, 0), (0, 0))
        aev = jnp.pad(aev, pad)            # padded molecules: zero AEV / zero one-hot
        oh = jnp.pad(oh, pad)
    rows = cb * A_pad

    # Flatten atoms in the wrapper so the kernel sees plain 2-D matmul operands.
    # TODO(synk): on v5e verify in HLO that this bf16 convert fuses into the AEV
    # fusion; if it materializes standalone, pass f32 and cast before the layer-1 dot.
    aev_flat = aev.reshape(c_pad * A_pad, D).astype(jnp.bfloat16)
    oh_flat = oh.reshape(c_pad * A_pad, NUM_SPECIES)

    w1p, b1p, w2bd, b2p, w3p, b3p = _pack_params(params)

    kernel = functools.partial(_ani_nn_kernel, cb=cb, a_pad=A_pad)
    out = pl.pallas_call(
        kernel,
        out_shape=jax.ShapeDtypeStruct((c_pad, 128), jnp.float32),
        grid_spec=pltpu.PrefetchScalarGridSpec(
            num_scalar_prefetch=0,
            grid=(c_pad // cb,),
            in_specs=[
                pl.BlockSpec((rows, D), lambda c: (c, 0)),
                pl.BlockSpec((rows, NUM_SPECIES), lambda c: (c, 0)),
                pl.BlockSpec((D, NUM_SPECIES * H1), lambda c: (0, 0)),
                pl.BlockSpec((1, NUM_SPECIES * H1), lambda c: (0, 0)),
                pl.BlockSpec((NUM_SPECIES * H1, NUM_SPECIES * H2), lambda c: (0, 0)),
                pl.BlockSpec((1, NUM_SPECIES * H2), lambda c: (0, 0)),
                pl.BlockSpec((1, NUM_SPECIES * H2), lambda c: (0, 0)),
                pl.BlockSpec((1, NUM_SPECIES), lambda c: (0, 0)),
            ],
            out_specs=pl.BlockSpec((cb, 128), lambda c: (c, 0)),
        ),
        compiler_params=pltpu.CompilerParams(dimension_semantics=("parallel",)),
    )(aev_flat, oh_flat, w1p, b1p, w2bd, b2p, w3p, b3p)
    return out[:C, 0]                               # (C,) molecular energies


# ------------------------------------------------------------------------------
# Parameters (deterministic synthetic init: the real module loads per-species
# networks + SAEs from neurochem files; shapes here follow the same structure).
# ------------------------------------------------------------------------------
def init_params(key):
    ks = jax.random.split(key, 3)

    def nrm(k, shape, fan_in):
        return (jax.random.normal(k, shape, dtype=jnp.float32) / np.sqrt(fan_in)).astype(jnp.float32)

    return {
        "w1": nrm(ks[0], (NUM_SPECIES, AEV_DIM, H1), AEV_DIM),
        "b1": jnp.full((NUM_SPECIES, 1, H1), 0.01, jnp.float32),
        "w2": nrm(ks[1], (NUM_SPECIES, H1, H2), H1),
        "b2": jnp.full((NUM_SPECIES, 1, H2), 0.01, jnp.float32),
        "w3": nrm(ks[2], (NUM_SPECIES, 1, H2), H2),   # final layer as a row-vector (output dim 1)
        "b3": jnp.zeros((NUM_SPECIES, 1, 1), jnp.float32),
    }


def _pad_atoms(species, coords):
    C, A = species.shape
    a_pad = ((A + 7) // 8) * 8
    if a_pad != A:
        species = jnp.pad(species, ((0, 0), (0, a_pad - A)), constant_values=-1)
        coords = jnp.pad(coords, ((0, 0), (0, a_pad - A), (0, 0)))
    return species, coords


@jax.jit
def builtin_model_forward(species, coords, params):
    """Mirrors BuiltinModel.forward with periodic_table_index=False, cell=None, pbc=None.
    Returns SpeciesEnergies-like tuple (species, energies)."""
    # TODO(synk): the torch module raises ValueError on unknown species via a host sync;
    # that device->host readback is omitted here to keep the jitted path async.
    species_p, coords_p = _pad_atoms(species, coords)
    oh, aev = compute_aev(species_p, coords_p)                         # AEVComputer
    # neural_networks + energy_shifter fused into the Pallas kernel (SAE folded in b3)
    energies = ani_nn_pallas(aev, oh, params)                          # (C,) f32 (torchani: f64)
    return species, energies


# ------------------------------------------------------------------------------
# Pure-JAX reference (same math, f32 HIGHEST precision, no Pallas) for correctness.
# ------------------------------------------------------------------------------
def reference_forward(species, coords, params):
    species_p, coords_p = _pad_atoms(species, coords)
    oh, aev = compute_aev(species_p, coords_p)
    valid = species_p >= 0
    sae_atom = jnp.where(valid, SELF_ENERGIES[jnp.clip(species_p, 0, NUM_SPECIES - 1)], 0.0)
    hp = jax.lax.Precision.HIGHEST
    es = []
    for s in range(NUM_SPECIES):
        h = _celu(jnp.einsum("cad,dh->cah", aev, params["w1"][s], precision=hp) + params["b1"][s])
        h = _celu(jnp.einsum("cah,hk->cak", h, params["w2"][s], precision=hp) + params["b2"][s])
        e = jnp.sum(h * params["w3"][s], axis=-1) + params["b3"][s][0, 0]
        es.append(e)
    es = jnp.stack(es, axis=-1)                      # (C, A_pad, NS)
    atomic = jnp.sum(es * oh, axis=-1)               # (C, A_pad)
    return jnp.sum(atomic + sae_atom, axis=-1)       # (C,)


if __name__ == "__main__":
    key = jax.random.PRNGKey(0)
    k_par, k_coord = jax.random.split(key)
    params = init_params(k_par)

    # Small example: C=2 molecules, A=8 atoms, species index in [0, 4) with -1 padding.
    C, A = 2, 8
    species = jnp.array([[0, 1, 2, 3, 0, 1, 1, 0],
                         [3, 0, 0, 1, 2, 0, -1, -1]], dtype=jnp.int32)
    coords = (jax.random.normal(k_coord, (C, A, 3), dtype=jnp.float32) * 1.5).astype(jnp.float32)

    out_species, energies = builtin_model_forward(species, coords, params)
    energies = jax.block_until_ready(energies)

    ref = reference_forward(species, coords, params)
    # Note: total energies include per-atom SAE offsets (O(10^2) Ha), so the check uses
    # absolute + relative slack; bf16 AEV/activation quantization is the error source.
    if not np.allclose(np.asarray(energies), np.asarray(ref), rtol=2e-3, atol=5e-2):
        raise AssertionError(f"Pallas/JAX mismatch: {np.asarray(energies)} vs {np.asarray(ref)}")

    print("KERNEL_OK")
</pallas_src>

<mosaic_0001>
module attributes {stable_mosaic.version = 11 : i64} {
  func.func @_ani_nn_kernel(%arg0: i32, %arg1: memref<64x384xbf16, #tpu.memory_space<vmem>>, %arg2: memref<64x4xf32, #tpu.memory_space<vmem>>, %arg3: memref<384x512xbf16, #tpu.memory_space<vmem>>, %arg4: memref<1x512xf32, #tpu.memory_space<vmem>>, %arg5: memref<512x256xbf16, #tpu.memory_space<vmem>>, %arg6: memref<1x256xf32, #tpu.memory_space<vmem>>, %arg7: memref<1x256xf32, #tpu.memory_space<vmem>>, %arg8: memref<1x4xf32, #tpu.memory_space<vmem>>, %arg9: memref<8x128xf32, #tpu.memory_space<vmem>>) attributes {dimension_semantics = [#tpu.dimension_semantics<parallel>], iteration_bounds = array<i64: 1>, scalar_prefetch = 0 : i64, scratch_operands = 0 : i64, tpu.core_type = #tpu.core_type<tc>, window_params = [{transform_indices = @transform_0, window_bounds = array<i64: 64, 384>}, {transform_indices = @transform_1, window_bounds = array<i64: 64, 4>}, {pipeline_mode = #tpu.pipeline_mode<synchronous>, transform_indices = @transform_2, window_bounds = array<i64: 384, 512>}, {pipeline_mode = #tpu.pipeline_mode<synchronous>, transform_indices = @transform_3, window_bounds = array<i64: 1, 512>}, {pipeline_mode = #tpu.pipeline_mode<synchronous>, transform_indices = @transform_4, window_bounds = array<i64: 512, 256>}, {pipeline_mode = #tpu.pipeline_mode<synchronous>, transform_indices = @transform_5, window_bounds = array<i64: 1, 256>}, {pipeline_mode = #tpu.pipeline_mode<synchronous>, transform_indices = @transform_6, window_bounds = array<i64: 1, 256>}, {pipeline_mode = #tpu.pipeline_mode<synchronous>, transform_indices = @transform_7, window_bounds = array<i64: 1, 4>}, {transform_indices = @transform_8, window_bounds = array<i64: 8, 128>}]} {
    %c0 = arith.constant 0 : index
    %c0_0 = arith.constant 0 : index
    %0 = vector.load %arg1[%c0, %c0_0] : memref<64x384xbf16, #tpu.memory_space<vmem>>, vector<64x384xbf16>
    %c0_1 = arith.constant 0 : index
    %c0_2 = arith.constant 0 : index
    %1 = vector.load %arg2[%c0_1, %c0_2] : memref<64x4xf32, #tpu.memory_space<vmem>>, vector<64x4xf32>
    %c0_3 = arith.constant 0 : index
    %c0_4 = arith.constant 0 : index
    %2 = vector.load %arg3[%c0_3, %c0_4] : memref<384x512xbf16, #tpu.memory_space<vmem>>, vector<384x512xbf16>
    %cst = arith.constant dense<0.000000e+00> : vector<64x512xf32>
    %3 = tpu.matmul %0, %2, %cst {dimension_numbers = #tpu.dot_dimension_numbers<[1], [0], [0], [1], [0, 0, 1, 1], [], []>} : vector<64x384xbf16>, vector<384x512xbf16>, vector<64x512xf32> -> vector<64x512xf32>
    %c0_5 = arith.constant 0 : index
    %c0_6 = arith.constant 0 : index
    %4 = vector.load %arg4[%c0_5, %c0_6] : memref<1x512xf32, #tpu.memory_space<vmem>>, vector<1x512xf32>
    %5 = vector.broadcast %4 : vector<1x512xf32> to vector<64x512xf32>
    %6 = arith.addf %3, %5 : vector<64x512xf32>
    %7 = arith.truncf %6 : vector<64x512xf32> to vector<64x512xbf16>
    %cst_7 = arith.constant 0.000000e+00 : bf16
    %8 = vector.broadcast %cst_7 : bf16 to vector<64x512xbf16>
    %9 = arith.cmpf ogt, %7, %8 : vector<64x512xbf16>
    %cst_8 = arith.constant 0.000000e+00 : bf16
    %10 = vector.broadcast %cst_8 : bf16 to vector<64x512xbf16>
    %11 = arith.minimumf %7, %10 : vector<64x512xbf16>
    %cst_9 = arith.constant 1.000000e+01 : bf16
    %12 = vector.broadcast %cst_9 : bf16 to vector<64x512xbf16>
    %13 = arith.mulf %11, %12 : vector<64x512xbf16>
    %14 = math.exp %13 : vector<64x512xbf16>
    %cst_10 = arith.constant 1.000000e+00 : bf16
    %15 = vector.broadcast %cst_10 : bf16 to vector<64x512xbf16>
    %16 = arith.subf %14, %15 : vector<64x512xbf16>
    %cst_11 = arith.constant 1.000980e-01 : bf16
    %17 = vector.broadcast %cst_11 : bf16 to vector<64x512xbf16>
    %18 = arith.mulf %17, %16 : vector<64x512xbf16>
    %19 = arith.select %9, %7, %18 : vector<64x512xi1>, vector<64x512xbf16>
    %c0_12 = arith.constant 0 : index
    %c0_13 = arith.constant 0 : index
    %20 = vector.load %arg5[%c0_12, %c0_13] : memref<512x256xbf16, #tpu.memory_space<vmem>>, vector<512x256xbf16>
    %cst_14 = arith.constant dense<0.000000e+00> : vector<64x256xf32>
    %21 = tpu.matmul %19, %20, %cst_14 {dimension_numbers = #tpu.dot_dimension_numbers<[1], [0], [0], [1], [0, 0, 1, 1], [], []>} : vector<64x512xbf16>, vector<512x256xbf16>, vector<64x256xf32> -> vector<64x256xf32>
    %c0_15 = arith.constant 0 : index
    %c0_16 = arith.constant 0 : index
    %22 = vector.load %arg6[%c0_15, %c0_16] : memref<1x256xf32, #tpu.memory_space<vmem>>, vector<1x256xf32>
    %23 = vector.broadcast %22 : vector<1x256xf32> to vector<64x256xf32>
    %24 = arith.addf %21, %23 : vector<64x256xf32>
    %25 = arith.truncf %24 : vector<64x256xf32> to vector<64x256xbf16>
    %cst_17 = arith.constant 0.000000e+00 : bf16
    %26 = vector.broadcast %cst_17 : bf16 to vector<64x256xbf16>
    %27 = arith.cmpf ogt, %25, %26 : vector<64x256xbf16>
    %cst_18 = arith.constant 0.000000e+00 : bf16
    %28 = vector.broadcast %cst_18 : bf16 to vector<64x256xbf16>
    %29 = arith.minimumf %25, %28 : vector<64x256xbf16>
    %cst_19 = arith.constant 1.000000e+01 : bf16
    %30 = vector.broadcast %cst_19 : bf16 to vector<64x256xbf16>
    %31 = arith.mulf %29, %30 : vector<64x256xbf16>
    %32 = math.exp %31 : vector<64x256xbf16>
    %cst_20 = arith.constant 1.000000e+00 : bf16
    %33 = vector.broadcast %cst_20 : bf16 to vector<64x256xbf16>
    %34 = arith.subf %32, %33 : vector<64x256xbf16>
    %cst_21 = arith.constant 1.000980e-01 : bf16
    %35 = vector.broadcast %cst_21 : bf16 to vector<64x256xbf16>
    %36 = arith.mulf %35, %34 : vector<64x256xbf16>
    %37 = arith.select %27, %25, %36 : vector<64x256xi1>, vector<64x256xbf16>
    %38 = arith.extf %37 : vector<64x256xbf16> to vector<64x256xf32>
    %c0_22 = arith.constant 0 : index
    %c0_23 = arith.constant 0 : index
    %39 = vector.load %arg7[%c0_22, %c0_23] : memref<1x256xf32, #tpu.memory_space<vmem>>, vector<1x256xf32>
    %40 = vector.broadcast %39 : vector<1x256xf32> to vector<64x256xf32>
    %41 = arith.mulf %38, %40 : vector<64x256xf32>
    %c0_24 = arith.constant 0 : index
    %c0_25 = arith.constant 0 : index
    %42 = vector.load %arg8[%c0_24, %c0_25] : memref<1x4xf32, #tpu.memory_space<vmem>>, vector<1x4xf32>
    %43 = vector.broadcast %42 : vector<1x4xf32> to vector<64x4xf32>
    %44 = arith.mulf %1, %43 : vector<64x4xf32>
    %cst_26 = arith.constant dense<0.000000e+00> : vector<64xf32>
    %45 = vector.multi_reduction <add>, %44, %cst_26 [1] : vector<64x4xf32> to vector<64xf32>
    %46 = vector.shape_cast %45 : vector<64xf32> to vector<64x1xf32>
    %47 = vector.extract_strided_slice %41 {offsets = [0, 0], sizes = [64, 64], strides = [1, 1]} : vector<64x256xf32> to vector<64x64xf32>
    %cst_27 = arith.constant dense<0.000000e+00> : vector<64xf32>
    %48 = vector.multi_reduction <add>, %47, %cst_27 [1] : vector<64x64xf32> to vector<64xf32>
    %49 = vector.shape_cast %48 : vector<64xf32> to vector<64x1xf32>
    %50 = vector.extract_strided_slice %1 {offsets = [0, 0], sizes = [64, 1], strides = [1, 1]} : vector<64x4xf32> to vector<64x1xf32>
    %51 = arith.mulf %50, %49 : vector<64x1xf32>
    %52 = arith.addf %46, %51 : vector<64x1xf32>
    %53 = vector.extract_strided_slice %41 {offsets = [0, 64], sizes = [64, 64], strides = [1, 1]} : vector<64x256xf32> to vector<64x64xf32>
    %cst_28 = arith.constant dense<0.000000e+00> : vector<64xf32>
    %54 = vector.multi_reduction <add>, %53, %cst_28 [1] : vector<64x64xf32> to vector<64xf32>
    %55 = vector.shape_cast %54 : vector<64xf32> to vector<64x1xf32>
    %56 = vector.extract_strided_slice %1 {offsets = [0, 1], sizes = [64, 1], strides = [1, 1]} : vector<64x4xf32> to vector<64x1xf32>
    %57 = arith.mulf %56, %55 : vector<64x1xf32>
    %58 = arith.addf %52, %57 : vector<64x1xf32>
    %59 = vector.extract_strided_slice %41 {offsets = [0, 128], sizes = [64, 64], strides = [1, 1]} : vector<64x256xf32> to vector<64x64xf32>
    %cst_29 = arith.constant dense<0.000000e+00> : vector<64xf32>
    %60 = vector.multi_reduction <add>, %59, %cst_29 [1] : vector<64x64xf32> to vector<64xf32>
    %61 = vector.shape_cast %60 : vector<64xf32> to vector<64x1xf32>
    %62 = vector.extract_strided_slice %1 {offsets = [0, 2], sizes = [64, 1], strides = [1, 1]} : vector<64x4xf32> to vector<64x1xf32>
    %63 = arith.mulf %62, %61 : vector<64x1xf32>
    %64 = arith.addf %58, %63 : vector<64x1xf32>
    %65 = vector.extract_strided_slice %41 {offsets = [0, 192], sizes = [64, 64], strides = [1, 1]} : vector<64x256xf32> to vector<64x64xf32>
    %cst_30 = arith.constant dense<0.000000e+00> : vector<64xf32>
    %66 = vector.multi_reduction <add>, %65, %cst_30 [1] : vector<64x64xf32> to vector<64xf32>
    %67 = vector.shape_cast %66 : vector<64xf32> to vector<64x1xf32>
    %68 = vector.extract_strided_slice %1 {offsets = [0, 3], sizes = [64, 1], strides = [1, 1]} : vector<64x4xf32> to vector<64x1xf32>
    %69 = arith.mulf %68, %67 : vector<64x1xf32>
    %70 = arith.addf %64, %69 : vector<64x1xf32>
    %71 = vector.shape_cast %70 : vector<64x1xf32> to vector<8x8x1xf32>
    %cst_31 = arith.constant dense<0.000000e+00> : vector<8x1xf32>
    %72 = vector.multi_reduction <add>, %71, %cst_31 [1] : vector<8x8x1xf32> to vector<8x1xf32>
    %73 = vector.shape_cast %72 : vector<8x1xf32> to vector<8x1xf32>
    %74 = vector.broadcast %73 : vector<8x1xf32> to vector<8x128xf32>
    %c0_32 = arith.constant 0 : index
    %c0_33 = arith.constant 0 : index
    %75 = vector.load %arg9[%c0_32, %c0_33] : memref<8x128xf32, #tpu.memory_space<vmem>>, vector<8x128xf32>
    tpu.vector_store %arg9[%c0_32, %c0_33], %74 {strides = array<i32>} : memref<8x128xf32, #tpu.memory_space<vmem>>, vector<8x128xf32>,
    return
  }
  func.func @transform_0(%arg0: i32) -> (i32, i32) {
    %c0_i32 = arith.constant 0 : i32
    %c0_i32_0 = arith.constant 0 : i32
    return %arg0, %c0_i32 : i32, i32
  }
  func.func @transform_1(%arg0: i32) -> (i32, i32) {
    %c0_i32 = arith.constant 0 : i32
    %c0_i32_0 = arith.constant 0 : i32
    return %arg0, %c0_i32 : i32, i32
  }
  func.func @transform_2(%arg0: i32) -> (i32, i32) {
    %c0_i32 = arith.constant 0 : i32
    %c0_i32_0 = arith.constant 0 : i32
    %c0_i32_1 = arith.constant 0 : i32
    return %c0_i32, %c0_i32_0 : i32, i32
  }
  func.func @transform_3(%arg0: i32) -> (i32, i32) {
    %c0_i32 = arith.constant 0 : i32
    %c0_i32_0 = arith.constant 0 : i32
    %c0_i32_1 = arith.constant 0 : i32
    return %c0_i32, %c0_i32_0 : i32, i32
  }
  func.func @transform_4(%arg0: i32) -> (i32, i32) {
    %c0_i32 = arith.constant 0 : i32
    %c0_i32_0 = arith.constant 0 : i32
    %c0_i32_1 = arith.constant 0 : i32
    return %c0_i32, %c0_i32_0 : i32, i32
  }
  func.func @transform_5(%arg0: i32) -> (i32, i32) {
    %c0_i32 = arith.constant 0 : i32
    %c0_i32_0 = arith.constant 0 : i32
    %c0_i32_1 = arith.constant 0 : i32
    return %c0_i32, %c0_i32_0 : i32, i32
  }
  func.func @transform_6(%arg0: i32) -> (i32, i32) {
    %c0_i32 = arith.constant 0 : i32
    %c0_i32_0 = arith.constant 0 : i32
    %c0_i32_1 = arith.constant 0 : i32
    return %c0_i32, %c0_i32_0 : i32, i32
  }
  func.func @transform_7(%arg0: i32) -> (i32, i32) {
    %c0_i32 = arith.constant 0 : i32
    %c0_i32_0 = arith.constant 0 : i32
    %c0_i32_1 = arith.constant 0 : i32
    return %c0_i32, %c0_i32_0 : i32, i32
  }
  func.func @transform_8(%arg0: i32) -> (i32, i32) {
    %c0_i32 = arith.constant 0 : i32
    %c0_i32_0 = arith.constant 0 : i32
    return %arg0, %c0_i32 : i32, i32
  }
}

</mosaic_0001>

<bundles_post_ra>
// kernel: builtin_model_forward.1
= control target key start
LH: loop header
LB: loop body
LE: loop exit
PB: predicated region body
PF: predicated region fallthrough
CT: control target
= control target key end

     0   :  { %s4047_s15 = smov 127   ;;  %s4048_s16 = smov 125   ;;  %s6407_s2 = inlined_call_operand.vmem [shape: bf16[384,512], index: 2, kind: input, shape index: {}]   ;;  %s6408_s0 = inlined_call_operand.vmem [shape: bf16[64,384], index: 0, kind: input, shape index: {}]   ;;  %s6409_s3 = inlined_call_operand.vmem [shape: f32[1,512], index: 3, kind: input, shape index: {}]   ;;  %s6410_s4 = inlined_call_operand.vmem [shape: bf16[512,256], index: 4, kind: input, shape index: {}]   ;;  %s6411_s5 = inlined_call_operand.vmem [shape: f32[1,256], index: 5, kind: input, shape index: {}]   ;;  %s6412_s7 = inlined_call_operand.vmem [shape: f32[1,4], index: 7, kind: input, shape index: {}]   ;;  %s6413_s1 = inlined_call_operand.vmem [shape: f32[64,4], index: 1, kind: input, shape index: {}]   ;;  %s6414_s6 = inlined_call_operand.vmem [shape: f32[1,256], index: 6, kind: input, shape index: {}]   ;;  %s6415_s8 = inlined_call_operand.vmem [shape: f32[8,128], index: 8, kind: output, shape index: {}]  }
   0x1   :  { %v3188_v0 = vld [vmem:[%s6407_s2 + $0xe0] sm:$0xf]  ;;  %v3804_v1 = vld [vmem:[%s6407_s2 + $0xec] sm:$0xf0]  ;;  %v3802_v9 = vld [vmem:[%s6407_s2 + $0xe4] sm:$0xf] }
   0x2   :  { %v3316_v2 = vld [vmem:[%s6407_s2 + $0x1e0] sm:$0xf]  ;;  %v3189_v3 = vor.u32 %v3804_v1, %v3188_v0  ;;  %v3836_v4 = vld [vmem:[%s6407_s2 + $0x1ec] sm:$0xf0]  ;;  %v3190_v10 = vld [vmem:[%s6407_s2 + $0xf0] sm:$0xf0] }
   0x3   :  { %v3444_v5 = vld [vmem:[%s6407_s2 + $0x2e0] sm:$0xf]  ;;  %v3868_v6 = vld [vmem:[%s6407_s2 + $0x2ec] sm:$0xf0]  ;;  %v3317_v7 = vor.u32 %v3836_v4, %v3316_v2  ;;  %v3193_v12 = vor.u32 %v3802_v9, %v3190_v10  ;;  %v3798_v20 = vld [vmem:[%s6407_s2 + $0xc4] sm:$0xf] }
   0x4   :  { %v3445_v8 = vor.u32 %v3868_v6, %v3444_v5  ;;  %v3172_v11 = vld [vmem:[%s6407_s2 + $0xc0] sm:$0xf]  ;;  %703 = vmatpush.bf16.msra.mxu0 %v3189_v3  ;;  %v3800_v13 = vld [vmem:[%s6407_s2 + $0xcc] sm:$0xf0]  ;;  %v3174_v22 = vld [vmem:[%s6407_s2 + $0xd0] sm:$0xf0] }
   0x5   :  { %v3300_v14 = vld [vmem:[%s6407_s2 + $0x1c0] sm:$0xf]  ;;  %v3832_v15 = vld [vmem:[%s6407_s2 + $0x1cc] sm:$0xf0]  ;;  %732 = vmatpush.bf16.msra.mxu1 %v3317_v7  ;;  %v3173_v16 = vor.u32 %v3800_v13, %v3172_v11  ;;  %790 = vmatpush.bf16.msra.mxu3 %v3193_v12  ;;  %v3177_v25 = vor.u32 %v3798_v20, %v3174_v22  ;;  %v3794_v31 = vld [vmem:[%s6407_s2 + $0xa4] sm:$0xf] }
   0x6   :  { %761 = vmatpush.bf16.msra.mxu2 %v3445_v8  ;;  %v3301_v17 = vor.u32 %v3832_v15, %v3300_v14  ;;  %v3428_v18 = vld [vmem:[%s6407_s2 + $0x2c0] sm:$0xf]  ;;  %v3864_v19 = vld [vmem:[%s6407_s2 + $0x2cc] sm:$0xf0]  ;;  %v3158_v32 = vld [vmem:[%s6407_s2 + $0xb0] sm:$0xf0] }
   0x7   :  { %v3429_v21 = vor.u32 %v3864_v19, %v3428_v18  ;;  %v3156_v23 = vld [vmem:[%s6407_s2 + $0xa0] sm:$0xf]  ;;  %v3796_v24 = vld [vmem:[%s6407_s2 + $0xac] sm:$0xf0]  ;;  %v3161_v38 = vor.u32 %v3794_v31, %v3158_v32  ;;  %v3790_v42 = vld [vmem:[%s6407_s2 + $0x84] sm:$0xf] }
   0x8   :  { %v3284_v26 = vld [vmem:[%s6407_s2 + $0x1a0] sm:$0xf]  ;;  %v3828_v27 = vld [vmem:[%s6407_s2 + $0x1ac] sm:$0xf0]  ;;  %704 = vmatpush.bf16.msra.mxu0 %v3173_v16  ;;  %v3157_v29 = vor.u32 %v3796_v24, %v3156_v23  ;;  %v3142_v43 = vld [vmem:[%s6407_s2 + $0x90] sm:$0xf0] }
   0x9   :  { %v3412_v28 = vld [vmem:[%s6407_s2 + $0x2a0] sm:$0xf]  ;;  %v3860_v30 = vld [vmem:[%s6407_s2 + $0x2ac] sm:$0xf0]  ;;  %733 = vmatpush.bf16.msra.mxu1 %v3301_v17  ;;  %v3285_v33 = vor.u32 %v3828_v27, %v3284_v26  ;;  %791 = vmatpush.bf16.msra.mxu3 %v3177_v25  ;;  %v3145_v50 = vor.u32 %v3790_v42, %v3142_v43  ;;  %v3786_v54 = vld [vmem:[%s6407_s2 + $0x64] sm:$0xf] }
   0xa   :  { %762 = vmatpush.bf16.msra.mxu2 %v3429_v21  ;;  %v3413_v34 = vor.u32 %v3860_v30, %v3412_v28  ;;  %v3140_v35 = vld [vmem:[%s6407_s2 + $0x80] sm:$0xf]  ;;  %v3792_v36 = vld [vmem:[%s6407_s2 + $0x8c] sm:$0xf0]  ;;  %v3126_v55 = vld [vmem:[%s6407_s2 + $0x70] sm:$0xf0] }
   0xb   :  { %v3268_v37 = vld [vmem:[%s6407_s2 + $0x180] sm:$0xf]  ;;  %v3824_v39 = vld [vmem:[%s6407_s2 + $0x18c] sm:$0xf0]  ;;  %v3141_v44 = vor.u32 %v3792_v36, %v3140_v35  ;;  %v3129_v62 = vor.u32 %v3786_v54, %v3126_v55  ;;  %v3782_v2 = vld [vmem:[%s6407_s2 + $0x44] sm:$0xf] }
   0xc   :  { %v3396_v40 = vld [vmem:[%s6407_s2 + $0x280] sm:$0xf]  ;;  %v3856_v41 = vld [vmem:[%s6407_s2 + $0x28c] sm:$0xf0]  ;;  %705 = vmatpush.bf16.msra.mxu0 %v3157_v29  ;;  %v3269_v45 = vor.u32 %v3824_v39, %v3268_v37  ;;  %v3110_v3 = vld [vmem:[%s6407_s2 + $0x50] sm:$0xf0] }
   0xd   :  { %734 = vmatpush.bf16.msra.mxu1 %v3285_v33  ;;  %v3397_v46 = vor.u32 %v3856_v41, %v3396_v40  ;;  %v3124_v47 = vld [vmem:[%s6407_s2 + $0x60] sm:$0xf]  ;;  %v3788_v48 = vld [vmem:[%s6407_s2 + $0x6c] sm:$0xf0]  ;;  %792 = vmatpush.bf16.msra.mxu3 %v3161_v38  ;;  %v3113_v10 = vor.u32 %v3782_v2, %v3110_v3  ;;  %v3778_v14 = vld [vmem:[%s6407_s2 + $0x24] sm:$0xf] }
   0xe   :  { %763 = vmatpush.bf16.msra.mxu2 %v3413_v34  ;;  %v3252_v49 = vld [vmem:[%s6407_s2 + $0x160] sm:$0xf]  ;;  %v3820_v51 = vld [vmem:[%s6407_s2 + $0x16c] sm:$0xf0]  ;;  %v3125_v56 = vor.u32 %v3788_v48, %v3124_v47  ;;  %v3094_v15 = vld [vmem:[%s6407_s2 + $0x30] sm:$0xf0] }
   0xf   :  { %v3380_v52 = vld [vmem:[%s6407_s2 + $0x260] sm:$0xf]  ;;  %v3852_v53 = vld [vmem:[%s6407_s2 + $0x26c] sm:$0xf0]  ;;  %v3253_v57 = vor.u32 %v3820_v51, %v3252_v49  ;;  %v3097_v25 = vor.u32 %v3778_v14, %v3094_v15  ;;  %v3774_v26 = vld [vmem:[%s6407_s2 + $0x4] sm:$0xf] }
  0x10   :  { %706 = vmatpush.bf16.msra.mxu0 %v3141_v44  ;;  %v3381_v58 = vor.u32 %v3852_v53, %v3380_v52  ;;  %v3108_v59 = vld [vmem:[%s6407_s2 + $0x40] sm:$0xf]  ;;  %v3784_v60 = vld [vmem:[%s6407_s2 + $0x4c] sm:$0xf0]  ;;  %v3078_v27 = vld [vmem:[%s6407_s2 + $0x10] sm:$0xf0] }
  0x11   :  { %735 = vmatpush.bf16.msra.mxu1 %v3269_v45  ;;  %v3236_v61 = vld [vmem:[%s6407_s2 + $0x140] sm:$0xf]  ;;  %793 = vmatpush.bf16.msra.mxu3 %v3145_v50  ;;  %v3816_v63 = vld [vmem:[%s6407_s2 + $0x14c] sm:$0xf0]  ;;  %v3109_v4 = vor.u32 %v3784_v60, %v3108_v59  ;;  %v3763_v29 = vld [vmem:[%s6408_s0 + $0x8] sm:$0xf0]  ;;  %v3081_v41 = vor.u32 %v3774_v26, %v3078_v27 }
  0x12   :  { %764 = vmatpush.bf16.msra.mxu2 %v3397_v46  ;;  %v3364_v0 = vld [vmem:[%s6407_s2 + $0x240] sm:$0xf]  ;;  %v3848_v1 = vld [vmem:[%s6407_s2 + $0x24c] sm:$0xf0]  ;;  %v3237_v5 = vor.u32 %v3816_v63, %v3236_v61  ;;  %v3196_v30 = vld [vmem:[%s6407_s2 + $0xe8] sm:$0xf] }
  0x13   :  { %v3365_v6 = vor.u32 %v3848_v1, %v3364_v0  ;;  %v3092_v7 = vld [vmem:[%s6407_s2 + $0x20] sm:$0xf]  ;;  %v3780_v8 = vld [vmem:[%s6407_s2 + $0x2c] sm:$0xf0]  ;;  %v3805_v31 = vld [vmem:[%s6407_s2 + $0xf4] sm:$0xf0] }
  0x14   :  { %707 = vmatpush.bf16.msra.mxu0 %v3125_v56  ;;  %v3220_v9 = vld [vmem:[%s6407_s2 + $0x120] sm:$0xf]  ;;  %v3812_v11 = vld [vmem:[%s6407_s2 + $0x12c] sm:$0xf0]  ;;  %v3093_v16 = vor.u32 %v3780_v8, %v3092_v7  ;;  %v3762_v33 = vld [vmem:[%s6408_s0 + $0x4] sm:$0xf]  ;;  %v3197_v42 = vor.u32 %v3805_v31, %v3196_v30 }
  0x15   :  { %736 = vmatpush.bf16.msra.mxu1 %v3253_v57  ;;  %794 = vmatpush.bf16.msra.mxu3 %v3129_v62  ;;  %v3348_v12 = vld [vmem:[%s6407_s2 + $0x220] sm:$0xf]  ;;  %v3844_v13 = vld [vmem:[%s6407_s2 + $0x22c] sm:$0xf0]  ;;  %v3221_v20 = vor.u32 %v3812_v11, %v3220_v9  ;;  %v3324_v34 = vld [vmem:[%s6407_s2 + $0x1e8] sm:$0xf] }
  0x16   :  { %765 = vmatpush.bf16.msra.mxu2 %v3381_v58  ;;  %v3076_v17 = vld [vmem:[%s6407_s2] sm:$0xf]  ;;  %v3776_v18 = vld [vmem:[%s6407_s2 + $0xc] sm:$0xf0]  ;;  %v3349_v21 = vor.u32 %v3844_v13, %v3348_v12  ;;  %v3837_v35 = vld [vmem:[%s6407_s2 + $0x1f4] sm:$0xf0] }
  0x17   :  { %v3204_v19 = vld [vmem:[%s6407_s2 + $0x100] sm:$0xf]  ;;  %v3808_v22 = vld [vmem:[%s6407_s2 + $0x10c] sm:$0xf0]  ;;  %v3077_v32 = vor.u32 %v3776_v18, %v3076_v17  ;;  %v3036_v39 = vld [vmem:[%s6408_s0 + $0x8] sm:$0xf]  ;;  %v3325_v47 = vor.u32 %v3837_v35, %v3324_v34 }
  0x18   :  { %708 = vmatpush.bf16.msra.mxu0 %v3109_v4  ;;  %v3332_v23 = vld [vmem:[%s6407_s2 + $0x200] sm:$0xf]  ;;  %v3840_v24 = vld [vmem:[%s6407_s2 + $0x20c] sm:$0xf0]  ;;  %v3205_v36 = vor.u32 %v3808_v22, %v3204_v19  ;;  %v3764_v40 = vld [vmem:[%s6408_s0 + $0x10] sm:$0xf0] }
  0x19   :  { %737 = vmatpush.bf16.msra.mxu1 %v3237_v5  ;;  %795 = vmatpush.bf16.msra.mxu3 %v3113_v10  ;;  %v3028_v28 = vld [vmem:[%s6408_s0] sm:$0xf]  ;;  %v3333_v37 = vor.u32 %v3840_v24, %v3332_v23  ;;  %v3030_v38 = vld [vmem:[%s6408_s0 + $0xc] sm:$0xf0]  ;;  %v3866_v43 = vld [vmem:[%s6407_s2 + $0x2e4] sm:$0xf]  ;;  %v4339_v52 = vor.u32 %v3764_v40, %v3036_v39 }
  0x1a   :  { %766 = vmatpush.bf16.msra.mxu2 %v3365_v6  ;;  %v3446_v44 = vld [vmem:[%s6407_s2 + $0x2f0] sm:$0xf0]  ;;  %v3834_v45 = vld [vmem:[%s6407_s2 + $0x1e4] sm:$0xf]  ;;  %v4326_v46 = vor.u32 %v3763_v29, %v3028_v28  ;;  %v3180_v49 = vld [vmem:[%s6407_s2 + $0xc8] sm:$0xf]  ;;  %v4337_v51 = vor.u32 %v3762_v33, %v3030_v38 }
  0x1b   :  { %v3318_v48 = vld [vmem:[%s6407_s2 + $0x1f0] sm:$0xf0]  ;;  %v3801_v50 = vld [vmem:[%s6407_s2 + $0xd4] sm:$0xf0]  ;;  %v3308_v53 = vld [vmem:[%s6407_s2 + $0x1c8] sm:$0xf]  ;;  %v3449_v55 = vor.u32 %v3866_v43, %v3446_v44 }
  0x1c   :  { %709 = vmatpush.bf16.msra.mxu0 %v3093_v16  ;;  %v3833_v54 = vld [vmem:[%s6407_s2 + $0x1d4] sm:$0xf0]  ;;  %v3321_v56 = vor.u32 %v3834_v45, %v3318_v48  ;;  %v3181_v57 = vor.u32 %v3801_v50, %v3180_v49  ;;  %v3862_v58 = vld [vmem:[%s6407_s2 + $0x2c4] sm:$0xf]  ;;  %v3430_v59 = vld [vmem:[%s6407_s2 + $0x2d0] sm:$0xf0] }
  0x1d   :  { %738 = vmatpush.bf16.msra.mxu1 %v3221_v20  ;;  %796 = vmatpush.bf16.msra.mxu3 %v3097_v25  ;;  %v3830_v60 = vld [vmem:[%s6407_s2 + $0x1c4] sm:$0xf]  ;;  %v3309_v61 = vor.u32 %v3833_v54, %v3308_v53  ;;  %v3302_v62 = vld [vmem:[%s6407_s2 + $0x1d0] sm:$0xf0]  ;;  %v3164_v63 = vld [vmem:[%s6407_s2 + $0xa8] sm:$0xf]  ;;  %v3433_v3 = vor.u32 %v3862_v58, %v3430_v59 }
  0x1e   :  { %767 = vmatpush.bf16.msra.mxu2 %v3349_v21  ;;  %v3797_v0 = vld [vmem:[%s6407_s2 + $0xb4] sm:$0xf0]  ;;  %v3292_v1 = vld [vmem:[%s6407_s2 + $0x1a8] sm:$0xf]  ;;  %v3305_v4 = vor.u32 %v3830_v60, %v3302_v62  ;;  %v3858_v6 = vld [vmem:[%s6407_s2 + $0x2a4] sm:$0xf] }
  0x1f   :  { %v3829_v2 = vld [vmem:[%s6407_s2 + $0x1b4] sm:$0xf0]  ;;  %v3165_v5 = vor.u32 %v3797_v0, %v3164_v63  ;;  %v3414_v7 = vld [vmem:[%s6407_s2 + $0x2b0] sm:$0xf0]  ;;  %v3826_v8 = vld [vmem:[%s6407_s2 + $0x1a4] sm:$0xf] }
  0x20   :  { %710 = vmatpush.bf16.msra.mxu0 %v3077_v32  ;;  %v3293_v9 = vor.u32 %v3829_v2, %v3292_v1  ;;  %v3286_v10 = vld [vmem:[%s6407_s2 + $0x1b0] sm:$0xf0]  ;;  %v3148_v11 = vld [vmem:[%s6407_s2 + $0x88] sm:$0xf]  ;;  %v3793_v12 = vld [vmem:[%s6407_s2 + $0x94] sm:$0xf0]  ;;  %v3417_v15 = vor.u32 %v3858_v6, %v3414_v7 }
  0x21   :  { %739 = vmatpush.bf16.msra.mxu1 %v3205_v36  ;;  %797 = vmatpush.bf16.msra.mxu3 %v3081_v41  ;;  %v3276_v13 = vld [vmem:[%s6407_s2 + $0x188] sm:$0xf]  ;;  %v3825_v14 = vld [vmem:[%s6407_s2 + $0x194] sm:$0xf0]  ;;  %v3766_v17 = vld [vmem:[%s6408_s0 + $0x20] sm:$0xf0]  ;;  %v3289_v18 = vor.u32 %v3826_v8, %v3286_v10  ;;  %v3149_v19 = vor.u32 %v3793_v12, %v3148_v11 }
  0x22   :  { %768 = vmatpush.bf16.msra.mxu2 %v3333_v37  ;;  %v3040_v16 = vld [vmem:[%s6408_s0 + $0x18] sm:$0xf]  ;;  %v3854_v20 = vld [vmem:[%s6407_s2 + $0x284] sm:$0xf]  ;;  %v3398_v21 = vld [vmem:[%s6407_s2 + $0x290] sm:$0xf0]  ;;  %v3277_v23 = vor.u32 %v3825_v14, %v3276_v13 }
  0x23   :  { %711 = vmatmul.bf16.vlgmr.msra.gmra.mxu0 %v4326_v46  ;;  %v3822_v22 = vld [vmem:[%s6407_s2 + $0x184] sm:$0xf]  ;;  %v3270_v24 = vld [vmem:[%s6407_s2 + $0x190] sm:$0xf0]  ;;  %v3132_v25 = vld [vmem:[%s6407_s2 + $0x68] sm:$0xf]  ;;  %v3401_v33 = vor.u32 %v3854_v20, %v3398_v21  ;;  %v4450_v39 = vor.u32 %v3766_v17, %v3040_v16 }
  0x24   :  { %740 = vmatmul.bf16.vlgmr.msra.gmra.mxu1 %v4337_v51  ;;  %798 = vmatmul.bf16.vlgmr.msra.gmra.mxu3 %v4326_v46  ;;  %v3789_v26 = vld [vmem:[%s6407_s2 + $0x74] sm:$0xf0]  ;;  %v3765_v27 = vld [vmem:[%s6408_s0 + $0x1c] sm:$0xf]  ;;  %v3260_v28 = vld [vmem:[%s6407_s2 + $0x168] sm:$0xf]  ;;  %v3273_v34 = vor.u32 %v3822_v22, %v3270_v24 }
  0x25   :  { %906 = vmatpush.bf16.msrb.mxu3 %v3325_v47  ;;  %769 = vmatmul.bf16.vlgmr.msra.gmra.mxu2 %v4339_v52  ;;  %v3821_v29 = vld [vmem:[%s6407_s2 + $0x174] sm:$0xf0]  ;;  %v3042_v30 = vld [vmem:[%s6408_s0 + $0x24] sm:$0xf0]  ;;  %v3048_v31 = vld [vmem:[%s6408_s0 + $0x20] sm:$0xf]  ;;  %v3133_v35 = vor.u32 %v3789_v26, %v3132_v25 }
  0x26   :  { %877 = vmatpush.bf16.msrb.mxu2 %v3197_v42  ;;  %848 = vmatpush.bf16.msrb.mxu1 %v3449_v55  ;;  %v3767_v32 = vld [vmem:[%s6408_s0 + $0x28] sm:$0xf0]  ;;  %v3850_v36 = vld [vmem:[%s6407_s2 + $0x264] sm:$0xf]  ;;  %v3382_v37 = vld [vmem:[%s6407_s2 + $0x270] sm:$0xf0]  ;;  %v3261_v40 = vor.u32 %v3821_v29, %v3260_v28  ;;  %v4461_v44 = vor.u32 %v3765_v27, %v3042_v30 }
  0x27   :  { %819 = vmatpush.bf16.msrb.mxu0 %v3321_v56  ;;  %v3818_v38 = vld [vmem:[%s6407_s2 + $0x164] sm:$0xf]  ;;  %v3254_v41 = vld [vmem:[%s6407_s2 + $0x170] sm:$0xf0]  ;;  %v3116_v42 = vld [vmem:[%s6407_s2 + $0x48] sm:$0xf]  ;;  %v4463_v45 = vor.u32 %v3767_v32, %v3048_v31  ;;  %v3385_v49 = vor.u32 %v3850_v36, %v3382_v37 }
  0x28   :  { %v3785_v43 = vld [vmem:[%s6407_s2 + $0x54] sm:$0xf0]  ;;  %v3244_v47 = vld [vmem:[%s6407_s2 + $0x148] sm:$0xf]  ;;  %v3257_v50 = vor.u32 %v3818_v38, %v3254_v41  ;;  %v3846_v54 = vld [vmem:[%s6407_s2 + $0x244] sm:$0xf] }
  0x29   :  { %907 = vmatpush.bf16.msrb.mxu3 %v3309_v61  ;;  %v3817_v48 = vld [vmem:[%s6407_s2 + $0x154] sm:$0xf0]  ;;  %v3117_v53 = vor.u32 %v3785_v43, %v3116_v42  ;;  %v3366_v55 = vld [vmem:[%s6407_s2 + $0x250] sm:$0xf0]  ;;  %v3814_v58 = vld [vmem:[%s6407_s2 + $0x144] sm:$0xf] }
  0x2a   :  { %878 = vmatpush.bf16.msrb.mxu2 %v3181_v57  ;;  %849 = vmatpush.bf16.msrb.mxu1 %v3433_v3  ;;  %v3245_v56 = vor.u32 %v3817_v48, %v3244_v47  ;;  %v3369_v57 = vor.u32 %v3846_v54, %v3366_v55  ;;  %v3238_v59 = vld [vmem:[%s6407_s2 + $0x150] sm:$0xf0]  ;;  %v3100_v60 = vld [vmem:[%s6407_s2 + $0x28] sm:$0xf]  ;;  %v3781_v62 = vld [vmem:[%s6407_s2 + $0x34] sm:$0xf0] }
  0x2b   :  { %820 = vmatpush.bf16.msrb.mxu0 %v3305_v4  ;;  %v3241_v61 = vor.u32 %v3814_v58, %v3238_v59  ;;  %v3228_v63 = vld [vmem:[%s6407_s2 + $0x128] sm:$0xf]  ;;  %v3813_v0 = vld [vmem:[%s6407_s2 + $0x134] sm:$0xf0]  ;;  %v3101_v1 = vor.u32 %v3781_v62, %v3100_v60  ;;  %v3842_v3 = vld [vmem:[%s6407_s2 + $0x224] sm:$0xf] }
  0x2c   :  { %v3229_v2 = vor.u32 %v3813_v0, %v3228_v63  ;;  %v3350_v4 = vld [vmem:[%s6407_s2 + $0x230] sm:$0xf0]  ;;  %v3084_v7 = vld [vmem:[%s6407_s2 + $0x8] sm:$0xf]  ;;  %v3777_v8 = vld [vmem:[%s6407_s2 + $0x14] sm:$0xf0] }
  0x2d   :  { %908 = vmatpush.bf16.msrb.mxu3 %v3293_v9  ;;  %v3222_v6 = vld [vmem:[%s6407_s2 + $0x130] sm:$0xf0]  ;;  %v3353_v9 = vor.u32 %v3842_v3, %v3350_v4  ;;  %v3212_v10 = vld [vmem:[%s6407_s2 + $0x108] sm:$0xf]  ;;  %v3809_v11 = vld [vmem:[%s6407_s2 + $0x114] sm:$0xf0]  ;;  %v3085_v13 = vor.u32 %v3777_v8, %v3084_v7 }
  0x2e   :  { %879 = vmatpush.bf16.msrb.mxu2 %v3165_v5  ;;  %850 = vmatpush.bf16.msrb.mxu1 %v3417_v15  ;;  %v3810_v5 = vld [vmem:[%s6407_s2 + $0x124] sm:$0xf]  ;;  %v3334_v15 = vld [vmem:[%s6407_s2 + $0x210] sm:$0xf0]  ;;  %v3213_v16 = vor.u32 %v3809_v11, %v3212_v10  ;;  %v3769_v20 = vld [vmem:[%s6408_s0 + $0x38] sm:$0xf0] }
  0x2f   :  { %821 = vmatpush.bf16.msrb.mxu0 %v3289_v18  ;;  %v3225_v12 = vor.u32 %v3810_v5, %v3222_v6  ;;  %v3838_v14 = vld [vmem:[%s6407_s2 + $0x204] sm:$0xf]  ;;  %v3206_v18 = vld [vmem:[%s6407_s2 + $0x110] sm:$0xf0]  ;;  %v3054_v22 = vld [vmem:[%s6408_s0 + $0x3c] sm:$0xf0] }
  0x30   :  { %v3806_v17 = vld [vmem:[%s6407_s2 + $0x104] sm:$0xf]  ;;  %v3768_v21 = vld [vmem:[%s6408_s0 + $0x34] sm:$0xf]  ;;  %v3337_v25 = vor.u32 %v3838_v14, %v3334_v15  ;;  %v3835_v30 = vld [vmem:[%s6407_s2 + $0x1ec] sm:$0xf] }
  0x31   :  { %909 = vmatpush.bf16.msrb.mxu3 %v3277_v23  ;;  %v3060_v23 = vld [vmem:[%s6408_s0 + $0x38] sm:$0xf]  ;;  %v3770_v24 = vld [vmem:[%s6408_s0 + $0x40] sm:$0xf0]  ;;  %v3209_v26 = vor.u32 %v3806_v17, %v3206_v18  ;;  %v4555_v28 = vor.u32 %v3768_v21, %v3054_v22  ;;  %v3326_v31 = vld [vmem:[%s6407_s2 + $0x1f8] sm:$0xf0] }
  0x32   :  { %880 = vmatpush.bf16.msrb.mxu2 %v3149_v19  ;;  %851 = vmatpush.bf16.msrb.mxu1 %v3401_v33  ;;  %v3052_v19 = vld [vmem:[%s6408_s0 + $0x30] sm:$0xf]  ;;  %v4557_v29 = vor.u32 %v3770_v24, %v3060_v23  ;;  %v3867_v32 = vld [vmem:[%s6407_s2 + $0x2ec] sm:$0xf]  ;;  %v3329_v33 = vor.u32 %v3835_v30, %v3326_v31  ;;  %v3198_v36 = vld [vmem:[%s6407_s2 + $0xf8] sm:$0xf0] }
  0x33   :  { %822 = vmatpush.bf16.msrb.mxu0 %v3273_v34  ;;  %v4553_v27 = vor.u32 %v3769_v20, %v3052_v19  ;;  %v3454_v34 = vld [vmem:[%s6407_s2 + $0x2f8] sm:$0xf0]  ;;  %v3869_v41 = vld [vmem:[%s6407_s2 + $0x2f4] sm:$0xf0]  ;;  %v3831_v42 = vld [vmem:[%s6407_s2 + $0x1cc] sm:$0xf] }
  0x34   :  { %716 = vmatmul.bf16.gmra.mxu0 %v4450_v39  ;;  %745 = vmatmul.bf16.gmra.mxu1 %v4461_v44  ;;  %v3457_v37 = vor.u32 %v3867_v32, %v3454_v34  ;;  %v3310_v47 = vld [vmem:[%s6407_s2 + $0x1d8] sm:$0xf0]  ;;  %v3863_v48 = vld [vmem:[%s6407_s2 + $0x2cc] sm:$0xf]  ;;  %v3772_v58 = vld [vmem:[%s6408_s0 + $0x50] sm:$0xf0] }
  0x35   :  { %910 = vmatpush.bf16.msrb.mxu3 %v3261_v40  ;;  %774 = vmatmul.bf16.gmra.mxu2 %v4463_v45  ;;  %v3452_v40 = vld [vmem:[%s6407_s2 + $0x2e8] sm:$0xf]  ;;  %v3799_v54 = vld [vmem:[%s6407_s2 + $0xcc] sm:$0xf]  ;;  %v3182_v55 = vld [vmem:[%s6407_s2 + $0xd8] sm:$0xf0] }
  0x36   :  { %881 = vmatpush.bf16.msrb.mxu2 %v3133_v35  ;;  %803 = vmatmul.bf16.gmra.mxu3 %v4450_v39  ;;  %v3803_v35 = vld [vmem:[%s6407_s2 + $0xec] sm:$0xf]  ;;  %v3453_v43 = vor.u32 %v3869_v41, %v3452_v40  ;;  %v3066_v60 = vld [vmem:[%s6408_s0 + $0x54] sm:$0xf0]  ;;  %v3773_v62 = vld [vmem:[%s6408_s0 + $0x58] sm:$0xf0] }
  0x37   :  { %852 = vmatpush.bf16.msrb.mxu1 %v3385_v49  ;;  %823 = vmatpush.bf16.msrb.mxu0 %v3257_v50  ;;  %v3201_v38 = vor.u32 %v3803_v35, %v3198_v36  ;;  %v3438_v49 = vld [vmem:[%s6407_s2 + $0x2d8] sm:$0xf0]  ;;  %v3313_v50 = vor.u32 %v3831_v42, %v3310_v47  ;;  %v3771_v59 = vld [vmem:[%s6408_s0 + $0x4c] sm:$0xf]  ;;  %v3865_v3 = vld [vmem:[%s6407_s2 + $0x2d4] sm:$0xf0] }
  0x38   :  { %v4625_v0 = vor.u32 %v3771_v59, %v3066_v60  ;;  %v3827_v4 = vld [vmem:[%s6407_s2 + $0x1ac] sm:$0xf]  ;;  %v3294_v6 = vld [vmem:[%s6407_s2 + $0x1b8] sm:$0xf0]  ;;  %v3861_v15 = vld [vmem:[%s6407_s2 + $0x2b4] sm:$0xf0] }
  0x39   :  { %911 = vmatpush.bf16.msrb.mxu3 %v3245_v56  ;;  %v3185_v56 = vor.u32 %v3799_v54, %v3182_v55  ;;  %v3859_v7 = vld [vmem:[%s6407_s2 + $0x2ac] sm:$0xf]  ;;  %v3422_v8 = vld [vmem:[%s6407_s2 + $0x2b8] sm:$0xf0]  ;;  %v3857_v30 = vld [vmem:[%s6407_s2 + $0x294] sm:$0xf0] }
  0x3a   :  { %882 = vmatpush.bf16.msrb.mxu2 %v3117_v53  ;;  %v3441_v53 = vor.u32 %v3863_v48, %v3438_v49  ;;  %v3425_v10 = vor.u32 %v3859_v7, %v3422_v8  ;;  %v3795_v11 = vld [vmem:[%s6407_s2 + $0xac] sm:$0xf]  ;;  %v3278_v17 = vld [vmem:[%s6407_s2 + $0x198] sm:$0xf0]  ;;  %v3388_v41 = vld [vmem:[%s6407_s2 + $0x268] sm:$0xf] }
  0x3b   :  { %853 = vmatpush.bf16.msrb.mxu1 %v3369_v57  ;;  %824 = vmatpush.bf16.msrb.mxu0 %v3241_v61  ;;  %v3064_v57 = vld [vmem:[%s6408_s0 + $0x48] sm:$0xf]  ;;  %v3072_v61 = vld [vmem:[%s6408_s0 + $0x50] sm:$0xf]  ;;  %v3855_v20 = vld [vmem:[%s6407_s2 + $0x28c] sm:$0xf] }
  0x3c   :  { %v4623_v63 = vor.u32 %v3772_v58, %v3064_v57  ;;  %v3406_v21 = vld [vmem:[%s6407_s2 + $0x298] sm:$0xf0]  ;;  %v3791_v22 = vld [vmem:[%s6407_s2 + $0x8c] sm:$0xf]  ;;  %v3372_v59 = vld [vmem:[%s6407_s2 + $0x248] sm:$0xf] }
  0x3d   :  { %912 = vmatpush.bf16.msrb.mxu3 %v3229_v2  ;;  %v3436_v2 = vld [vmem:[%s6407_s2 + $0x2c8] sm:$0xf]  ;;  %v3409_v23 = vor.u32 %v3855_v20, %v3406_v21  ;;  %v3150_v24 = vld [vmem:[%s6407_s2 + $0x98] sm:$0xf0]  ;;  %v3819_v31 = vld [vmem:[%s6407_s2 + $0x16c] sm:$0xf] }
  0x3e   :  { %883 = vmatpush.bf16.msrb.mxu2 %v3101_v1  ;;  %v4627_v1 = vor.u32 %v3773_v62, %v3072_v61  ;;  %v3437_v5 = vor.u32 %v3865_v3, %v3436_v2  ;;  %v3851_v34 = vld [vmem:[%s6407_s2 + $0x26c] sm:$0xf]  ;;  %v3390_v35 = vld [vmem:[%s6407_s2 + $0x278] sm:$0xf0]  ;;  %v3849_v60 = vld [vmem:[%s6407_s2 + $0x254] sm:$0xf0] }
  0x3f   :  { %854 = vmatpush.bf16.msrb.mxu1 %v3353_v9  ;;  %825 = vmatpush.bf16.msrb.mxu0 %v3225_v12  ;;  %v3297_v9 = vor.u32 %v3827_v4, %v3294_v6  ;;  %v3166_v12 = vld [vmem:[%s6407_s2 + $0xb8] sm:$0xf0]  ;;  %v3815_v47 = vld [vmem:[%s6407_s2 + $0x14c] sm:$0xf]  ;;  %v3373_v62 = vor.u32 %v3849_v60, %v3372_v59 }
  0x40   :  { %v3169_v14 = vor.u32 %v3795_v11, %v3166_v12  ;;  %v3134_v40 = vld [vmem:[%s6407_s2 + $0x78] sm:$0xf0]  ;;  %v3783_v55 = vld [vmem:[%s6407_s2 + $0x4c] sm:$0xf]  ;;  %v3845_v11 = vld [vmem:[%s6407_s2 + $0x234] sm:$0xf0] }
  0x41   :  { %913 = vmatpush.bf16.msrb.mxu3 %v3213_v16  ;;  %v3823_v16 = vld [vmem:[%s6407_s2 + $0x18c] sm:$0xf]  ;;  %v3246_v48 = vld [vmem:[%s6407_s2 + $0x158] sm:$0xf0] }
  0x42   :  { %884 = vmatpush.bf16.msrb.mxu2 %v3085_v13  ;;  %v3420_v13 = vld [vmem:[%s6407_s2 + $0x2a8] sm:$0xf]  ;;  %v3281_v19 = vor.u32 %v3823_v16, %v3278_v17  ;;  %v3374_v54 = vld [vmem:[%s6407_s2 + $0x258] sm:$0xf0]  ;;  %v3811_v61 = vld [vmem:[%s6407_s2 + $0x12c] sm:$0xf] }
  0x43   :  { %855 = vmatpush.bf16.msrb.mxu1 %v3337_v25  ;;  %826 = vmatpush.bf16.msrb.mxu0 %v3209_v26  ;;  %v3421_v18 = vor.u32 %v3861_v15, %v3420_v13  ;;  %v3153_v25 = vor.u32 %v3791_v22, %v3150_v24  ;;  %v3404_v26 = vld [vmem:[%s6407_s2 + $0x288] sm:$0xf]  ;;  %v3118_v57 = vld [vmem:[%s6407_s2 + $0x58] sm:$0xf0]  ;;  %v3843_v3 = vld [vmem:[%s6407_s2 + $0x22c] sm:$0xf] }
  0x44   :  { %721 = vmatmul.bf16.gmra.mxu0 %v4553_v27  ;;  %750 = vmatmul.bf16.gmra.mxu1 %v4555_v28  ;;  %v3405_v32 = vor.u32 %v3857_v30, %v3404_v26  ;;  %v3121_v58 = vor.u32 %v3783_v55, %v3118_v57  ;;  %v3230_v2 = vld [vmem:[%s6407_s2 + $0x138] sm:$0xf0]  ;;  %v3779_v7 = vld [vmem:[%s6407_s2 + $0x2c] sm:$0xf]  ;;  %v3340_v22 = vld [vmem:[%s6407_s2 + $0x208] sm:$0xf] }
  0x45   :  { %779 = vmatmul.bf16.gmra.mxu2 %v4557_v29  ;;  %1022 = vmatpush.bf16.msra.mxu3 %v3457_v37  ;;  %v3393_v37 = vor.u32 %v3851_v34, %v3390_v35  ;;  %v3358_v4 = vld [vmem:[%s6407_s2 + $0x238] sm:$0xf0]  ;;  %v3807_v12 = vld [vmem:[%s6407_s2 + $0x10c] sm:$0xf] }
  0x46   :  { %808 = vmatmul.bf16.gmra.mxu3 %v4553_v27  ;;  %993 = vmatpush.bf16.msra.mxu2 %v3329_v33  ;;  %v3262_v33 = vld [vmem:[%s6407_s2 + $0x178] sm:$0xf0]  ;;  %v3361_v6 = vor.u32 %v3843_v3, %v3358_v4  ;;  %v3839_v16 = vld [vmem:[%s6407_s2 + $0x20c] sm:$0xf] }
  0x47   :  { %964 = vmatpush.bf16.msra.mxu1 %v3201_v38  ;;  %935 = vmatpush.bf16.msra.mxu0 %v3453_v43  ;;  %v3265_v36 = vor.u32 %v3819_v31, %v3262_v33  ;;  %v3787_v38 = vld [vmem:[%s6407_s2 + $0x6c] sm:$0xf]  ;;  %v3853_v43 = vld [vmem:[%s6407_s2 + $0x274] sm:$0xf0]  ;;  %v3102_v8 = vld [vmem:[%s6407_s2 + $0x38] sm:$0xf0] }
  0x48   :  { %v3137_v42 = vor.u32 %v3787_v38, %v3134_v40  ;;  %v3389_v49 = vor.u32 %v3853_v43, %v3388_v41  ;;  %v3214_v13 = vld [vmem:[%s6407_s2 + $0x118] sm:$0xf0] }
  0x49   :  { %1023 = vmatpush.bf16.msra.mxu3 %v3441_v53  ;;  %v3847_v53 = vld [vmem:[%s6407_s2 + $0x24c] sm:$0xf]  ;;  %v3217_v15 = vor.u32 %v3807_v12, %v3214_v13  ;;  %v3342_v17 = vld [vmem:[%s6407_s2 + $0x218] sm:$0xf0]  ;;  %v3883_v12 = vld [vmem:[%s6410_s4 + $0x64] sm:$0xf0] }
  0x4a   :  { %994 = vmatpush.bf16.msra.mxu2 %v3313_v50  ;;  %v3249_v50 = vor.u32 %v3815_v47, %v3246_v48  ;;  %v3086_v20 = vld [vmem:[%s6407_s2 + $0x18] sm:$0xf0]  ;;  %v3604_v13 = vld [vmem:[%s6410_s4 + $0xe0] sm:$0xf] }
  0x4b   :  { %965 = vmatpush.bf16.msra.mxu1 %v3185_v56  ;;  %936 = vmatpush.bf16.msra.mxu0 %v3437_v5  ;;  %v3377_v56 = vor.u32 %v3847_v53, %v3374_v54  ;;  %v3233_v5 = vor.u32 %v3811_v61, %v3230_v2 }
  0x4d   :  { %1024 = vmatpush.bf16.msra.mxu3 %v3425_v10  ;;  %v3105_v10 = vor.u32 %v3779_v7, %v3102_v8 }
  0x4e   :  { %995 = vmatpush.bf16.msra.mxu2 %v3297_v9  ;;  %v3356_v9 = vld [vmem:[%s6407_s2 + $0x228] sm:$0xf] }
  0x4f   :  { %966 = vmatpush.bf16.msra.mxu1 %v3169_v14  ;;  %937 = vmatpush.bf16.msra.mxu0 %v3421_v18  ;;  %v3357_v14 = vor.u32 %v3845_v11, %v3356_v9  ;;  %v3775_v18 = vld [vmem:[%s6407_s2 + $0xc] sm:$0xf]  ;;  %v3901_v9 = vld [vmem:[%s6410_s4 + $0xf4] sm:$0xf0]  ;;  %v3540_v11 = vld [vmem:[%s6410_s4 + $0x60] sm:$0xf] }
  0x50   :  { %v3089_v21 = vor.u32 %v3775_v18, %v3086_v20 }
  0x51   :  { %1025 = vmatpush.bf16.msra.mxu3 %v3409_v23  ;;  %v3841_v23 = vld [vmem:[%s6407_s2 + $0x214] sm:$0xf0] }
  0x52   :  { %996 = vmatpush.bf16.msra.mxu2 %v3281_v19  ;;  %v3345_v19 = vor.u32 %v3839_v16, %v3342_v17  ;;  %v3341_v24 = vor.u32 %v3841_v23, %v3340_v22 }
  0x53   :  { %967 = vmatpush.bf16.msra.mxu1 %v3153_v25  ;;  %938 = vmatpush.bf16.msra.mxu0 %v3405_v32  ;;  %v4802_v25 = vld [vmem:[%s6409_s3] sm:$0xf]  ;;  %s4046_s3 = smov 126  }
  0x54   :  { %726 = vmatmul.bf16.gmra.mxu0 %v4623_v63  ;;  %755 = vmatmul.bf16.gmra.mxu1 %v4625_v0  ;;  %v4805_v26 = vperm.slane %v4802_v25, 0 }
  0x55   :  { %784 = vmatmul.bf16.gmra.mxu2 %v4627_v1  ;;  %1026 = vmatpush.bf16.msra.mxu3 %v3393_v37 }
  0x56   :  { %813 = vmatmul.bf16.gmra.mxu3 %v4623_v63  ;;  %997 = vmatpush.bf16.msra.mxu2 %v3265_v36 }
  0x57   :  { %968 = vmatpush.bf16.msra.mxu1 %v3137_v42  ;;  %939 = vmatpush.bf16.msra.mxu0 %v3389_v49 }
  0x59   :  { %1027 = vmatpush.bf16.msra.mxu3 %v3377_v56 }
  0x5a   :  { %998 = vmatpush.bf16.msra.mxu2 %v3249_v50 }
  0x5b   :  { %969 = vmatpush.bf16.msra.mxu1 %v3121_v58  ;;  %940 = vmatpush.bf16.msra.mxu0 %v3373_v62 }
  0x5d   :  { %1028 = vmatpush.bf16.msra.mxu3 %v3361_v6 }
  0x5e   :  { %999 = vmatpush.bf16.msra.mxu2 %v3233_v5 }
  0x5f   :  { %970 = vmatpush.bf16.msra.mxu1 %v3105_v10  ;;  %941 = vmatpush.bf16.msra.mxu0 %v3357_v14  ;;  %v3541_v14 = vor.u32 %v3883_v12, %v3540_v11 }
  0x61   :  { %1029 = vmatpush.bf16.msra.mxu3 %v3345_v19 }
  0x62   :  { %1000 = vmatpush.bf16.msra.mxu2 %v3217_v15  ;;  %v3899_v15 = vld [vmem:[%s6410_s4 + $0xe4] sm:$0xf0] }
  0x63   :  { %971 = vmatpush.bf16.msra.mxu1 %v3089_v21  ;;  %942 = vmatpush.bf16.msra.mxu0 %v3341_v24  ;;  %v3605_v18 = vor.u32 %v3899_v15, %v3604_v13  ;;  %v3516_v15 = vld [vmem:[%s6410_s4 + $0x30] sm:$0xf] }
  0x64   :  { %827 = vmatmul.bf16.vlgmr.msrb.gmra.mxu0 %v4337_v51  ;;  %856 = vmatmul.bf16.vlgmr.msrb.gmra.mxu1 %v4339_v52 }
  0x65   :  { %885 = vmatmul.bf16.vlgmr.msrb.gmra.mxu2 %v4326_v46 }
  0x66   :  { %914 = vmatmul.bf16.vlgmr.msrb.gmra.mxu3 %v4337_v51 }
  0x74   :  { %832 = vmatmul.bf16.gmra.mxu0 %v4461_v44  ;;  %861 = vmatmul.bf16.gmra.mxu1 %v4463_v45 }
  0x75   :  { %890 = vmatmul.bf16.gmra.mxu2 %v4450_v39 }
  0x76   :  { %919 = vmatmul.bf16.gmra.mxu3 %v4461_v44 }
  0x84   :  { %837 = vmatmul.bf16.gmra.mxu0 %v4555_v28  ;;  %866 = vmatmul.bf16.gmra.mxu1 %v4557_v29 }
  0x85   :  { %895 = vmatmul.bf16.gmra.mxu2 %v4553_v27 }
  0x86   :  { %924 = vmatmul.bf16.gmra.mxu3 %v4555_v28 }
  0x94   :  { %842 = vmatmul.bf16.gmra.mxu0 %v4625_v0  ;;  %871 = vmatmul.bf16.gmra.mxu1 %v4627_v1 }
  0x95   :  { %900 = vmatmul.bf16.gmra.mxu2 %v4623_v63 }
  0x96   :  { %929 = vmatmul.bf16.gmra.mxu3 %v4625_v0 }
  0xa0   :  { %v712_v30 = vpop.f32.mrf.mxu0 }
  0xa1   :  { %v713_v31 = vadd.f32 %v712_v30, %v4805_v26  ;;  %v741_v32 = vpop.f32.mrf.mxu1  ;;  %v4912_v30 = vperm.slane %v4802_v25, 2 }
  0xa3   :  { %v4808_v33 = vadd.f32 %v741_v32, %v713_v31  ;;  %v3532_v31 = vld [vmem:[%s6410_s4 + $0x50] sm:$0xf]  ;;  %v3881_v32 = vld [vmem:[%s6410_s4 + $0x54] sm:$0xf0] }
  0xa4   :  { %943 = vmatmul.bf16.vlgmr.msra.gmra.mxu0 %v4339_v52  ;;  %972 = vmatmul.bf16.vlgmr.msra.gmra.mxu1 %v4326_v46 }
  0xa5   :  { %1001 = vmatmul.bf16.vlgmr.msra.gmra.mxu2 %v4337_v51 }
  0xa6   :  { %1030 = vmatmul.bf16.vlgmr.msra.gmra.mxu3 %v4339_v52 }
  0xa7   :  { %v4816_v35 = vpop.f32.mrf.mxu3 }
  0xa8   :  { %v4814_v34 = vpop.f32.mrf.mxu2  ;;  %v4818_v36 = vpop.f32.mrf.mxu0 }
  0xa9   :  { %v4820_v37 = vpop.f32.mrf.mxu1  ;;  %v771_v23 = vadd.f32 %v4814_v34, %v4808_v33  ;;  %v3533_v34 = vor.u32 %v3881_v32, %v3532_v31 }
  0xaf   :  { %v4824_v40 = vpop.f32.mrf.mxu3 }
  0xb0   :  { %v4822_v38 = vpop.f32.mrf.mxu2 }
  0xb1   :  { %v717_v41 = vpop.f32.mrf.mxu0  ;;  %v746_v46 = vpop.f32.mrf.mxu1 }
  0xb2   :  { %v718_v42 = vadd.f32 %v717_v41, %v4805_v26  ;;  %v715_v41 = vadd.f32 %v4818_v36, %v4805_v26 }
  0xb4   :  { %v4827_v43 = vadd.f32 %v746_v46, %v718_v42  ;;  %948 = vmatmul.bf16.gmra.mxu0 %v4463_v45  ;;  %977 = vmatmul.bf16.gmra.mxu1 %v4450_v39  ;;  %v3897_v42 = vld [vmem:[%s6410_s4 + $0xd4] sm:$0xf0] }
  0xb5   :  { %1006 = vmatmul.bf16.gmra.mxu2 %v4461_v44 }
  0xb6   :  { %1035 = vmatmul.bf16.gmra.mxu3 %v4463_v45 }
  0xb8   :  { %v4833_v51 = vpop.f32.mrf.mxu2 }
  0xb9   :  { %v4835_v52 = vpop.f32.mrf.mxu3  ;;  %v4837_v47 = vpop.f32.mrf.mxu0 }
  0xba   :  { %v4839_v48 = vpop.f32.mrf.mxu1 }
  0xc0   :  { %v4841_v49 = vpop.f32.mrf.mxu2 }
  0xc1   :  { %v4843_v50 = vpop.f32.mrf.mxu3  ;;  %v722_v53 = vpop.f32.mrf.mxu0 }
  0xc2   :  { %v723_v54 = vadd.f32 %v722_v53, %v4805_v26  ;;  %v751_v39 = vpop.f32.mrf.mxu1 }
  0xc4   :  { %v752_v55 = vadd.f32 %v751_v39, %v723_v54  ;;  %953 = vmatmul.bf16.gmra.mxu0 %v4557_v29  ;;  %982 = vmatmul.bf16.gmra.mxu1 %v4553_v27 }
  0xc5   :  { %1011 = vmatmul.bf16.gmra.mxu2 %v4555_v28 }
  0xc6   :  { %1040 = vmatmul.bf16.gmra.mxu3 %v4557_v29  ;;  %v4868_v29 = vperm.slane %v4802_v25, 1 }
  0xc8   :  { %v780_v44 = vpop.f32.mrf.mxu2  ;;  %v800_v16 = vadd.f32 %v4816_v35, %v4868_v29  ;;  %v3596_v35 = vld [vmem:[%s6410_s4 + $0xd0] sm:$0xf] }
  0xc9   :  { %v4850_v45 = vadd.f32 %v780_v44, %v752_v55  ;;  %v4852_v56 = vpop.f32.mrf.mxu3  ;;  %v4854_v57 = vpop.f32.mrf.mxu0  ;;  %v3597_v46 = vor.u32 %v3897_v42, %v3596_v35  ;;  %v802_v55 = vadd.f32 %v4824_v40, %v4868_v29 }
  0xca   :  { %v4856_v58 = vpop.f32.mrf.mxu1 }
  0xd0   :  { %v4858_v59 = vpop.f32.mrf.mxu2 }
  0xd1   :  { %v4860_v60 = vpop.f32.mrf.mxu3  ;;  %v727_v61 = vpop.f32.mrf.mxu0 }
  0xd2   :  { %v728_v27 = vadd.f32 %v727_v61, %v4805_v26  ;;  %v756_v62 = vpop.f32.mrf.mxu1 }
  0xd4   :  { %v757_v28 = vadd.f32 %v756_v62, %v728_v27  ;;  %958 = vmatmul.bf16.gmra.mxu0 %v4627_v1  ;;  %987 = vmatmul.bf16.gmra.mxu1 %v4623_v63  ;;  %v3548_v63 = vld [vmem:[%s6410_s4 + $0x70] sm:$0xf]  ;;  %v3524_v27 = vld [vmem:[%s6410_s4 + $0x40] sm:$0xf]  ;;  %v3879_v62 = vld [vmem:[%s6410_s4 + $0x44] sm:$0xf0] }
  0xd5   :  { %1016 = vmatmul.bf16.gmra.mxu2 %v4625_v0  ;;  %v3885_v0 = vld [vmem:[%s6410_s4 + $0x74] sm:$0xf0] }
  0xd6   :  { %1045 = vmatmul.bf16.gmra.mxu3 %v4627_v1  ;;  %v3612_v1 = vld [vmem:[%s6410_s4 + $0xf0] sm:$0xf]  ;;  %v3549_v8 = vor.u32 %v3885_v0, %v3548_v63  ;;  %v3895_v0 = vld [vmem:[%s6410_s4 + $0xc4] sm:$0xf0] }
  0xd7   :  { %v3613_v10 = vor.u32 %v3901_v9, %v3612_v1  ;;  %v3525_v9 = vor.u32 %v3879_v62, %v3524_v27  ;;  %v3891_v62 = vld [vmem:[%s6410_s4 + $0xa4] sm:$0xf0] }
  0xd8   :  { %v785_v2 = vpop.f32.mrf.mxu2  ;;  %2033 = vmatpush.bf16.msrb.mxu0 %v3549_v8 }
  0xd9   :  { %v4870_v3 = vadd.f32 %v785_v2, %v757_v28  ;;  %v814_v4 = vpop.f32.mrf.mxu3  ;;  %v4872_v5 = vpop.f32.mrf.mxu0  ;;  %2062 = vmatpush.bf16.msrb.mxu1 %v3613_v10  ;;  %v3588_v28 = vld [vmem:[%s6410_s4 + $0xc0] sm:$0xf]  ;;  %v744_v2 = vadd.f32 %v4820_v37, %v715_v41 }
  0xda   :  { %v4875_v6 = vadd.f32 %v814_v4, %v4868_v29  ;;  %v4877_v7 = vpop.f32.mrf.mxu1  ;;  %v3589_v10 = vor.u32 %v3895_v0, %v3588_v28  ;;  %v776_v28 = vadd.f32 %v4833_v51, %v4827_v43  ;;  %v807_v43 = vadd.f32 %v4843_v50, %v4868_v29  ;;  %v3889_v50 = vld [vmem:[%s6410_s4 + $0x94] sm:$0xf0] }
  0xdb   :  { %v773_v12 = vadd.f32 %v4822_v38, %v744_v2 }
  0xdc   :  { %2034 = vmatpush.bf16.msrb.mxu0 %v3541_v14 }
  0xdd   :  { %2063 = vmatpush.bf16.msrb.mxu1 %v3605_v18  ;;  %v3580_v18 = vld [vmem:[%s6410_s4 + $0xb0] sm:$0xf] }
  0xe0   :  { %v4905_v17 = vpop.f32.mrf.mxu2  ;;  %2035 = vmatpush.bf16.msrb.mxu0 %v3533_v34 }
  0xe1   :  { %v4907_v19 = vpop.f32.mrf.mxu3  ;;  %v828_v20 = vpop.f32.mrf.mxu0  ;;  %2064 = vmatpush.bf16.msrb.mxu1 %v3597_v46 }
  0xe2   :  { %v829_v21 = vadd.f32 %v828_v20, %v800_v16  ;;  %v857_v22 = vpop.f32.mrf.mxu1  ;;  %v3877_v16 = vld [vmem:[%s6410_s4 + $0x34] sm:$0xf0] }
  0xe3   :  { %v3517_v38 = vor.u32 %v3877_v16, %v3516_v15 }
  0xe4   :  { %v858_v24 = vadd.f32 %v857_v22, %v829_v21  ;;  %2036 = vmatpush.bf16.msrb.mxu0 %v3525_v9  ;;  %v3893_v21 = vld [vmem:[%s6410_s4 + $0xb4] sm:$0xf0]  ;;  %v805_v22 = vadd.f32 %v4835_v52, %v4868_v29  ;;  %v3508_v52 = vld [vmem:[%s6410_s4 + $0x20] sm:$0xf]  ;;  %v720_v9 = vadd.f32 %v4837_v47, %v4805_v26 }
  0xe5   :  { %2065 = vmatpush.bf16.msrb.mxu1 %v3589_v10  ;;  %v3581_v32 = vor.u32 %v3893_v21, %v3580_v18 }
  0xe6   :  { %v4925_v33 = vpack.c.bf16 %v858_v24, %v771_v23 }
  0xe8   :  { %v1067_v53 = vunpack.c.l.bf16 %v4925_v33  ;;  %v1068_v54 = vunpack.c.h.bf16 %v4925_v33  ;;  %v886_v39 = vpop.f32.mrf.mxu2  ;;  %2037 = vmatpush.bf16.msrb.mxu0 %v3517_v38  ;;  %v3564_v38 = vld [vmem:[%s6410_s4 + $0x90] sm:$0xf] }
  0xe9   :  { %v887_v44 = vadd.f32 %v886_v39, %v4912_v30  ;;  %v915_v36 = vpop.f32.mrf.mxu3  ;;  %v830_v61 = vpop.f32.mrf.mxu0  ;;  %2066 = vmatpush.bf16.msrb.mxu1 %v3581_v32 }
  0xea   :  { %v1131_v40 = vmin.f32 %v1067_v53, 0.0  ;;  %v1132_v4 = vmin.f32 %v1068_v54, 0.0  ;;  %v859_v63 = vpop.f32.mrf.mxu1  ;;  %v831_v8 = vadd.f32 %v830_v61, %v802_v55  ;;  %vm5065_vm0 = vcmp.gt.f32.partialorder %v1067_v53, 0.0 }
  0xeb   :  { %v4952_v1 = vadd.f32 %v915_v36, %v887_v44  ;;  %v3875_v44 = vld [vmem:[%s6410_s4 + $0x24] sm:$0xf0]  ;;  %v3572_v36 = vld [vmem:[%s6410_s4 + $0xa0] sm:$0xf]  ;;  %vm5071_vm1 = vcmp.gt.f32.partialorder %v1068_v54, 0.0 }
  0xec   :  { %v1163_v11 = vpack.c.bf16 %v1132_v4, %v1131_v40  ;;  %v860_v37 = vadd.f32 %v859_v63, %v831_v8  ;;  %v3509_v0 = vor.u32 %v3875_v44, %v3508_v52  ;;  %v3573_v8 = vor.u32 %v3891_v62, %v3572_v36  ;;  %v3492_v52 = vld [vmem:[%s6410_s4] sm:$0xf]  ;;  %vm1531_vm3 = vmpackc.low %vm5071_vm1, %vm5065_vm0 }
  0xed   :  { %v3556_v62 = vld [vmem:[%s6410_s4 + $0x80] sm:$0xf] }
  0xee   :  { %v1179_v13 = vunpack.c.l.bf16 %v1163_v11  ;;  %v1180_v14 = vunpack.c.h.bf16 %v1163_v11  ;;  %v4964_v20 = vpack.c.bf16 %v860_v37, %v773_v12  ;;  %v3500_v37 = vld [vmem:[%s6410_s4 + $0x10] sm:$0xf]  ;;  %2038 = vmatpush.bf16.msrb.mxu0 %v3509_v0  ;;  %2067 = vmatpush.bf16.msrb.mxu1 %v3573_v8 }
  0xf0   :  { %v1211_v23 = vmul.f32 10.0, %v1179_v13  ;;  %v1212_v24 = vmul.f32 10.0, %v1180_v14  ;;  %v4971_v31 = vpop.f32.mrf.mxu2  ;;  %v1071_v35 = vunpack.c.l.bf16 %v4964_v20  ;;  %v1072_v41 = vunpack.c.h.bf16 %v4964_v20  ;;  %v3873_v14 = vld [vmem:[%s6410_s4 + $0x14] sm:$0xf0] }
  0xf1   :  { %v4975_v34 = vpop.f32.mrf.mxu3  ;;  %v833_v42 = vpop.f32.mrf.mxu0  ;;  %v3501_v18 = vor.u32 %v3873_v14, %v3500_v37 }
  0xf2   :  { %v1243_v46 = vpack.c.bf16 %v1212_v24, %v1211_v23  ;;  %v834_v39 = vadd.f32 %v833_v42, %v805_v22  ;;  %v862_v55 = vpop.f32.mrf.mxu1  ;;  %v1135_v61 = vmin.f32 %v1071_v35, 0.0  ;;  %v1136_v27 = vmin.f32 %v1072_v41, 0.0 }
  0xf3   :  { %v749_v42 = vadd.f32 %v4839_v48, %v720_v9  ;;  %2039 = vmatpush.bf16.msrb.mxu0 %v3501_v18  ;;  %v3871_v48 = vld [vmem:[%s6410_s4 + $0x4] sm:$0xf0]  ;;  %vm5087_vm2 = vcmp.gt.f32.partialorder %v1071_v35, 0.0  ;;  %vm5099_vm4 = vcmp.gt.f32.partialorder %v1072_v41, 0.0 }
  0xf4   :  { %v1259_v2 = vunpack.c.l.bf16 %v1243_v46  ;;  %v1260_v40 = vunpack.c.h.bf16 %v1243_v46  ;;  %v863_v4 = vadd.f32 %v862_v55, %v834_v39  ;;  %v1165_v63 = vpack.c.bf16 %v1136_v27, %v1135_v61  ;;  %vm1533_vm5 = vmpackc.low %vm5099_vm4, %vm5087_vm2 }
  0xf5   :  { %v3565_v27 = vor.u32 %v3889_v50, %v3564_v38 }
  0xf6   :  { %v1291_v10 = vmul.f32 1.442695, %v1259_v2  ;;  %v1293_v11 = vmul.f32 1.442695, %v1260_v40  ;;  %v4997_v12 = vpack.c.bf16 %v863_v4, %v776_v28  ;;  %v1183_v51 = vunpack.c.l.bf16 %v1165_v63  ;;  %v3887_v28 = vld [vmem:[%s6410_s4 + $0x84] sm:$0xf0] }
  0xf7   :  { %v1184_v13 = vunpack.c.h.bf16 %v1165_v63  ;;  %v778_v2 = vadd.f32 %v4841_v49, %v749_v42  ;;  %v3493_v4 = vor.u32 %v3871_v48, %v3492_v52  ;;  %2068 = vmatpush.bf16.msrb.mxu1 %v3565_v27  ;;  %v3557_v9 = vor.u32 %v3887_v28, %v3556_v62 }
  0xf8   :  { %3943 = vpow2.f32 %v1291_v10  ;;  %v1075_v47 = vunpack.c.l.bf16 %v4997_v12  ;;  %v1076_v15 = vunpack.c.h.bf16 %v4997_v12  ;;  %v891_v16 = vpop.f32.mrf.mxu2  ;;  %v1215_v21 = vmul.f32 10.0, %v1183_v51 }
  0xf9   :  { %3945 = vpow2.f32 %v1293_v11  ;;  %v1216_v22 = vmul.f32 10.0, %v1184_v13  ;;  %v892_v23 = vadd.f32 %v891_v16, %v4912_v30  ;;  %v920_v24 = vpop.f32.mrf.mxu3  ;;  %v835_v32 = vpop.f32.mrf.mxu0  ;;  %2040 = vmatpush.bf16.msrb.mxu0 %v3493_v4  ;;  %v810_v16 = vadd.f32 %v4852_v56, %v4868_v29 }
  0xfa   :  { %v1139_v46 = vmin.f32 %v1075_v47, 0.0  ;;  %v1140_v39 = vmin.f32 %v1076_v15, 0.0  ;;  %v864_v55 = vpop.f32.mrf.mxu1  ;;  %v836_v61 = vadd.f32 %v835_v32, %v807_v43  ;;  %vm5169_vm6 = vcmp.gt.f32.partialorder %v1075_v47, 0.0 }
  0xfb   :  { %v1245_v44 = vpack.c.bf16 %v1216_v22, %v1215_v21  ;;  %v5024_v36 = vadd.f32 %v920_v24, %v892_v23  ;;  %v725_v21 = vadd.f32 %v4854_v57, %v4805_v26  ;;  %2069 = vmatpush.bf16.msrb.mxu1 %v3557_v9  ;;  %vm5180_vm7 = vcmp.gt.f32.partialorder %v1076_v15, 0.0 }
  0xfc   :  { %v1167_v40 = vpack.c.bf16 %v1140_v39, %v1139_v46  ;;  %v865_v8 = vadd.f32 %v864_v55, %v836_v61  ;;  %vm1535_vm10 = vmpackc.low %vm5180_vm7, %vm5169_vm6 }
  0xfd   :  { %v1263_v63 = vunpack.c.l.bf16 %v1245_v44  ;;  %v1264_v0 = vunpack.c.h.bf16 %v1245_v44 }
  0xfe   :  { %v3944_v10 = vpop.eup %3943  ;;  %v1187_v11 = vunpack.c.l.bf16 %v1167_v40  ;;  %v1188_v37 = vunpack.c.h.bf16 %v1167_v40  ;;  %v5036_v14 = vpack.c.bf16 %v865_v8, %v778_v2  ;;  %v754_v2 = vadd.f32 %v4856_v58, %v725_v21 }
  0xff   :  { %v3946_v43 = vpop.eup %3945  ;;  %v1299_v51 = vmul.f32 1.442695, %v1263_v63  ;;  %v1301_v13 = vmul.f32 1.442695, %v1264_v0  ;;  %v812_v0 = vadd.f32 %v4860_v60, %v4868_v29 }
 0x100   :  { %v1355_v49 = vpack.c.bf16 %v3946_v43, %v3944_v10  ;;  %v1219_v18 = vmul.f32 10.0, %v1187_v11  ;;  %v1220_v38 = vmul.f32 10.0, %v1188_v37  ;;  %v5040_v50 = vpop.f32.mrf.mxu2  ;;  %v1079_v22 = vunpack.c.l.bf16 %v5036_v14 }
 0x101   :  { %3947 = vpow2.f32 %v1299_v51  ;;  %v1080_v23 = vunpack.c.h.bf16 %v5036_v14  ;;  %v5046_v24 = vpop.f32.mrf.mxu3  ;;  %v838_v32 = vpop.f32.mrf.mxu0  ;;  %v730_v37 = vadd.f32 %v4872_v5, %v4805_v26  ;;  %v783_v54 = vadd.f32 %v4858_v59, %v754_v2 }
 0x102   :  { %v1371_v42 = vunpack.c.l.bf16 %v1355_v49  ;;  %v1372_v46 = vunpack.c.h.bf16 %v1355_v49  ;;  %3949 = vpow2.f32 %v1301_v13  ;;  %v1247_v56 = vpack.c.bf16 %v1220_v38, %v1219_v18  ;;  %v867_v39 = vpop.f32.mrf.mxu1 }
 0x103   :  { %v1143_v55 = vmin.f32 %v1079_v22, 0.0  ;;  %v1144_v57 = vmin.f32 %v1080_v23, 0.0  ;;  %v839_v52 = vadd.f32 %v838_v32, %v810_v16  ;;  %vm5191_vm8 = vcmp.gt.f32.partialorder %v1079_v22, 0.0 }
 0x104   :  { %v3458_v44 = vadd.f32 -1.0, %v1371_v42  ;;  %v3459_v61 = vadd.f32 -1.0, %v1372_v46  ;;  %v1267_v27 = vunpack.c.l.bf16 %v1247_v56  ;;  %v1268_v48 = vunpack.c.h.bf16 %v1247_v56 }
 0x105   :  { %v1169_v62 = vpack.c.bf16 %v1144_v57, %v1143_v55  ;;  %v868_v28 = vadd.f32 %v867_v39, %v839_v52  ;;  %vm5197_vm9 = vcmp.gt.f32.partialorder %v1080_v23, 0.0 }
 0x106   :  { %v1435_v40 = vpack.c.bf16 %v3459_v61, %v3458_v44  ;;  %v1307_v4 = vmul.f32 1.442695, %v1267_v27  ;;  %v1309_v13 = vmul.f32 1.442695, %v1268_v48  ;;  %vm1537_vm11 = vmpackc.low %vm5197_vm9, %vm5191_vm8 }
 0x107   :  { %v3948_v63 = vpop.eup %3947  ;;  %v1191_v8 = vunpack.c.l.bf16 %v1169_v62  ;;  %v1192_v9 = vunpack.c.h.bf16 %v1169_v62  ;;  %v5056_v10 = vpack.c.bf16 %v868_v28, %v4850_v45 }
 0x108   :  { %v3950_v11 = vpop.eup %3949  ;;  %v1451_v43 = vunpack.c.l.bf16 %v1435_v40  ;;  %v1452_v51 = vunpack.c.h.bf16 %v1435_v40  ;;  %v896_v16 = vpop.f32.mrf.mxu2  ;;  %3951 = vpow2.f32 %v1307_v4 }
 0x109   :  { %v1357_v58 = vpack.c.bf16 %v3950_v11, %v3948_v63  ;;  %v1223_v49 = vmul.f32 10.0, %v1191_v8  ;;  %v1224_v18 = vmul.f32 10.0, %v1192_v9  ;;  %v925_v38 = vpop.f32.mrf.mxu3  ;;  %v840_v21 = vpop.f32.mrf.mxu0  ;;  %v1083_v42 = vunpack.c.l.bf16 %v5056_v10 }
 0x10a   :  { %v1483_v60 = vmul.f32 0.100097656, %v1451_v43  ;;  %v1484_v32 = vmul.f32 0.100097656, %v1452_v51  ;;  %v1084_v45 = vunpack.c.h.bf16 %v5056_v10  ;;  %v869_v46 = vpop.f32.mrf.mxu1  ;;  %v897_v5 = vadd.f32 %v896_v16, %v4912_v30 }
 0x10b   :  { %v1375_v56 = vunpack.c.l.bf16 %v1357_v58  ;;  %v1376_v39 = vunpack.c.h.bf16 %v1357_v58  ;;  %v1249_v26 = vpack.c.bf16 %v1224_v18, %v1223_v49  ;;  %3953 = vpow2.f32 %v1309_v13 }
 0x10c   :  { %v1147_v52 = vmin.f32 %v1083_v42, 0.0  ;;  %v1515_v62 = vpack.c.bf16 %v1484_v32, %v1483_v60  ;;  %v1148_v53 = vmin.f32 %v1084_v45, 0.0  ;;  %v5079_v28 = vadd.f32 %v925_v38, %v897_v5  ;;  %v3917_v5 = vld [vmem:[%s6410_s4 + $0x174] sm:$0xf0] }
 0x10d   :  { %v3462_v44 = vadd.f32 -1.0, %v1375_v56  ;;  %v3463_v61 = vadd.f32 -1.0, %v1376_v39  ;;  %v1271_v27 = vunpack.c.l.bf16 %v1249_v26  ;;  %v1272_v48 = vunpack.c.h.bf16 %v1249_v26 }
 0x10e   :  { %v841_v40 = vadd.f32 %v840_v21, %v812_v0  ;;  %v3952_v4 = vpop.eup %3951  ;;  %v5083_v9 = vadd.f32 %v4877_v7, %v730_v37  ;;  %v1171_v43 = vpack.c.bf16 %v1148_v53, %v1147_v52  ;;  %v1547_v58 = vsel %vm1531_vm3, %v4925_v33, %v1515_v62  ;;  %v3676_v33 = vld [vmem:[%s6410_s4 + $0x170] sm:$0xf] }
 0x10f   :  { %v1437_v63 = vpack.c.bf16 %v3463_v61, %v3462_v44  ;;  %v1315_v8 = vmul.f32 1.442695, %v1271_v27  ;;  %v1317_v2 = vmul.f32 1.442695, %v1272_v48  ;;  %v3677_v52 = vor.u32 %v3917_v5, %v3676_v33  ;;  %v3933_v44 = vld [vmem:[%s6410_s4 + $0x1f4] sm:$0xf0] }
 0x110   :  { %v870_v51 = vadd.f32 %v869_v46, %v841_v40  ;;  %v5091_v13 = vpop.f32.mrf.mxu2  ;;  %v1195_v49 = vunpack.c.l.bf16 %v1171_v43  ;;  %v1196_v18 = vunpack.c.h.bf16 %v1171_v43  ;;  %v1649_v53 = vunpack.c.l.b16 %v1547_v58 }
 0x111   :  { %v1455_v7 = vunpack.c.l.bf16 %v1437_v63  ;;  %v1456_v35 = vunpack.c.h.bf16 %v1437_v63  ;;  %v5103_v0 = vpop.f32.mrf.mxu3  ;;  %v843_v37 = vpop.f32.mrf.mxu0  ;;  %3955 = vpow2.f32 %v1315_v8  ;;  %2091 = vmatpush.bf16.msrb.mxu2 %v3677_v52  ;;  %v1650_v8 = vunpack.c.h.b16 %v1547_v58 }
 0x112   :  { %v3954_v16 = vpop.eup %3953  ;;  %v5106_v38 = vpack.c.bf16 %v870_v51, %v783_v54  ;;  %v872_v21 = vpop.f32.mrf.mxu1  ;;  %v844_v41 = vadd.f32 %v843_v37, %v4875_v6  ;;  %v1227_v46 = vmul.f32 10.0, %v1195_v49  ;;  %v1228_v56 = vmul.f32 10.0, %v1196_v18  ;;  %v3740_v6 = vld [vmem:[%s6410_s4 + $0x1f0] sm:$0xf] }
 0x113   :  { %v1487_v60 = vmul.f32 0.100097656, %v1455_v7  ;;  %v1488_v32 = vmul.f32 0.100097656, %v1456_v35  ;;  %3957 = vpow2.f32 %v1317_v2  ;;  %v3741_v62 = vor.u32 %v3933_v44, %v3740_v6 }
 0x114   :  { %v1087_v39 = vunpack.c.l.bf16 %v5106_v38  ;;  %v1088_v26 = vunpack.c.h.bf16 %v5106_v38  ;;  %v873_v57 = vadd.f32 %v872_v21, %v844_v41  ;;  %v1251_v61 = vpack.c.bf16 %v1228_v56, %v1227_v46 }
 0x115   :  { %v1517_v55 = vpack.c.bf16 %v1488_v32, %v1487_v60  ;;  %v1359_v63 = vpack.c.bf16 %v3954_v16, %v3952_v4  ;;  %2120 = vmatpush.bf16.msrb.mxu3 %v3741_v62  ;;  %v788_v33 = vadd.f32 %v4905_v17, %v5083_v9  ;;  %v5155_v17 = vperm.slane %v4802_v25, 3 }
 0x116   :  { %v1151_v27 = vmin.f32 %v1087_v39, 0.0  ;;  %v1152_v48 = vmin.f32 %v1088_v26, 0.0  ;;  %v5133_v54 = vpack.c.bf16 %v873_v57, %v4870_v3  ;;  %v1275_v51 = vunpack.c.l.bf16 %v1251_v61 }
 0x117   :  { %v1549_v40 = vsel %vm1533_vm5, %v4964_v20, %v1517_v55  ;;  %v3956_v7 = vpop.eup %3955  ;;  %v817_v3 = vadd.f32 %v4907_v19, %v4868_v29  ;;  %v1276_v58 = vunpack.c.h.bf16 %v1251_v61  ;;  %v1379_v56 = vunpack.c.l.bf16 %v1359_v63 }
 0x118   :  { %v1653_v11 = vunpack.c.l.b16 %v1549_v40  ;;  %v1654_v43 = vunpack.c.h.b16 %v1549_v40  ;;  %v901_v59 = vpop.f32.mrf.mxu2  ;;  %v1173_v35 = vpack.c.bf16 %v1152_v48, %v1151_v27  ;;  %v1091_v2 = vunpack.c.l.bf16 %v5133_v54 }
 0x119   :  { %v1092_v37 = vunpack.c.h.bf16 %v5133_v54  ;;  %v902_v49 = vadd.f32 %v901_v59, %v4912_v30  ;;  %v930_v20 = vpop.f32.mrf.mxu3  ;;  %v845_v18 = vpop.f32.mrf.mxu0  ;;  %v1323_v32 = vmul.f32 1.442695, %v1275_v51  ;;  %v1380_v6 = vunpack.c.h.bf16 %v1359_v63 }
 0x11a   :  { %v5140_v4 = vpack.c.b16 %v1653_v11, %v1649_v53  ;;  %v5142_v16 = vpack.c.b16 %v1654_v43, %v1650_v8  ;;  %v874_v21 = vpop.f32.mrf.mxu1  ;;  %v3958_v60 = vpop.eup %3957  ;;  %v1199_v41 = vunpack.c.l.bf16 %v1173_v35  ;;  %v1200_v46 = vunpack.c.h.bf16 %v1173_v35 }
 0x11b   :  { %v1155_v5 = vmin.f32 %v1091_v2, 0.0  ;;  %v1156_v29 = vmin.f32 %v1092_v37, 0.0  ;;  %v5150_v19 = vadd.f32 %v930_v20, %v902_v49  ;;  %v846_v52 = vadd.f32 %v845_v18, %v817_v3 }
 0x11c   :  { %2041 = vmatmul.bf16.vlgmr.msrb.gmra.mxu0 %v5140_v4  ;;  %2070 = vmatmul.bf16.vlgmr.msrb.gmra.mxu1 %v5142_v16  ;;  %v1231_v55 = vmul.f32 10.0, %v1199_v41  ;;  %v1232_v57 = vmul.f32 10.0, %v1200_v46  ;;  %v1325_v44 = vmul.f32 1.442695, %v1276_v58  ;;  %v1361_v9 = vpack.c.bf16 %v3958_v60, %v3956_v7 }
 0x11d   :  { %v1175_v61 = vpack.c.bf16 %v1156_v29, %v1155_v5  ;;  %3959 = vpow2.f32 %v1323_v32  ;;  %v875_v48 = vadd.f32 %v874_v21, %v846_v52  ;;  %v3466_v62 = vadd.f32 -1.0, %v1379_v56 }
 0x11e   :  { %v1253_v27 = vpack.c.bf16 %v1232_v57, %v1231_v55  ;;  %v1383_v11 = vunpack.c.l.bf16 %v1361_v9  ;;  %v1384_v43 = vunpack.c.h.bf16 %v1361_v9  ;;  %v3467_v49 = vadd.f32 -1.0, %v1380_v6 }
 0x11f   :  { %v1203_v53 = vunpack.c.l.bf16 %v1175_v61  ;;  %v1204_v40 = vunpack.c.h.bf16 %v1175_v61  ;;  %v5159_v35 = vpack.c.bf16 %v875_v48, %v788_v33  ;;  %3961 = vpow2.f32 %v1325_v44 }
 0x120   :  { %v5157_v8 = vpop.f32.mrf.mxu2  ;;  %v1279_v51 = vunpack.c.l.bf16 %v1253_v27  ;;  %v1280_v59 = vunpack.c.h.bf16 %v1253_v27  ;;  %v3470_v18 = vadd.f32 -1.0, %v1383_v11  ;;  %v889_v41 = vadd.f32 %v4971_v31, %v4912_v30 }
 0x121   :  { %v5161_v63 = vpop.f32.mrf.mxu3  ;;  %v1235_v25 = vmul.f32 10.0, %v1203_v53  ;;  %v1236_v7 = vmul.f32 10.0, %v1204_v40  ;;  %v6417_v21 = vunpack.c.l.bf16 %v5159_v35  ;;  %v6416_v60 = vunpack.c.h.bf16 %v5159_v35  ;;  %v944_v32 = vpop.f32.mrf.mxu0 }
 0x122   :  { %v973_v20 = vpop.f32.mrf.mxu1  ;;  %v1331_v3 = vmul.f32 1.442695, %v1279_v51  ;;  %v1333_v58 = vmul.f32 1.442695, %v1280_v59  ;;  %v3471_v33 = vadd.f32 -1.0, %v1384_v43  ;;  %v1439_v57 = vpack.c.bf16 %v3467_v49, %v3466_v62 }
 0x123   :  { %v974_v56 = vadd.f32 %v973_v20, %v5155_v17  ;;  %v3960_v5 = vpop.eup %3959  ;;  %v1159_v29 = vmin.f32 %v6417_v21, 0.0  ;;  %v1160_v55 = vmin.f32 %v6416_v60, 0.0  ;;  %v1255_v47 = vpack.c.bf16 %v1236_v7, %v1235_v25  ;;  %v3668_v62 = vld [vmem:[%s6410_s4 + $0x160] sm:$0xf]  ;;  %v3915_v49 = vld [vmem:[%s6410_s4 + $0x164] sm:$0xf0] }
 0x124   :  { %3963 = vpow2.f32 %v1331_v3  ;;  %v1441_v52 = vpack.c.bf16 %v3471_v33, %v3470_v18  ;;  %v894_v6 = vadd.f32 %v5040_v50, %v4912_v30  ;;  %v1459_v61 = vunpack.c.l.bf16 %v1439_v57 }
 0x125   :  { %3965 = vpow2.f32 %v1333_v58  ;;  %v1177_v44 = vpack.c.bf16 %v1160_v55, %v1159_v29  ;;  %v1460_v9 = vunpack.c.h.bf16 %v1439_v57  ;;  %v3962_v27 = vpop.eup %3961  ;;  %v1283_v25 = vunpack.c.l.bf16 %v1255_v47 }
 0x126   :  { %v1463_v50 = vunpack.c.l.bf16 %v1441_v52  ;;  %v1464_v40 = vunpack.c.h.bf16 %v1441_v52  ;;  %v1491_v22 = vmul.f32 0.100097656, %v1459_v61  ;;  %v945_v7 = vadd.f32 %v944_v32, %v4952_v1 }
 0x127   :  { %v1207_v11 = vunpack.c.l.bf16 %v1177_v44  ;;  %v1208_v43 = vunpack.c.h.bf16 %v1177_v44  ;;  %v3669_v20 = vor.u32 %v3915_v49, %v3668_v62  ;;  %v1492_v23 = vmul.f32 0.100097656, %v1460_v9 }
 0x128   :  { %v1002_v48 = vpop.f32.mrf.mxu2  ;;  %v1284_v58 = vunpack.c.h.bf16 %v1255_v47  ;;  %v1496_v52 = vmul.f32 0.100097656, %v1464_v40  ;;  %v918_v60 = vadd.f32 %v4975_v34, %v889_v41  ;;  %v5213_v32 = vadd.f32 %v5046_v24, %v894_v6 }
 0x129   :  { %v1003_v51 = vadd.f32 %v1002_v48, %v974_v56  ;;  %v1031_v59 = vpop.f32.mrf.mxu3  ;;  %v1239_v33 = vmul.f32 10.0, %v1207_v11  ;;  %v1240_v29 = vmul.f32 10.0, %v1208_v43  ;;  %2092 = vmatpush.bf16.msrb.mxu2 %v3669_v20  ;;  %v1495_v56 = vmul.f32 0.100097656, %v1463_v50  ;;  %v946_v21 = vpop.f32.mrf.mxu0  ;;  %v3884_v20 = vld [vmem:[%s6410_s4 + $0x74] sm:$0xf] }
 0x12a   :  { %v975_v18 = vpop.f32.mrf.mxu1  ;;  %v3964_v3 = vpop.eup %3963  ;;  %v1519_v44 = vpack.c.bf16 %v1492_v23, %v1491_v22  ;;  %v1363_v48 = vpack.c.bf16 %v3962_v27, %v3960_v5  ;;  %v5217_v47 = vadd.f32 %v5091_v13, %v4912_v30  ;;  %v5220_v34 = vmul.f32 1.442695, %v1283_v25  ;;  %v3900_v23 = vld [vmem:[%s6410_s4 + $0xf4] sm:$0xf] }
 0x12b   :  { %v1032_v55 = vadd.f32 %v1031_v59, %v1003_v51  ;;  %v3966_v57 = vpop.eup %3965  ;;  %v1521_v9 = vpack.c.bf16 %v1496_v52, %v1495_v56  ;;  %v5222_v41 = vpack.c.bf16 %v1240_v29, %v1239_v33  ;;  %v5230_v24 = vmul.f32 1.442695, %v1284_v58  ;;  %v3882_v52 = vld [vmem:[%s6410_s4 + $0x64] sm:$0xf] }
 0x12c   :  { %v1365_v1 = vpack.c.bf16 %v3966_v57, %v3964_v3  ;;  %v1551_v5 = vsel %vm1535_vm10, %v4997_v12, %v1519_v44  ;;  %v976_v13 = vadd.f32 %v975_v18, %v5155_v17  ;;  %v1387_v27 = vunpack.c.l.bf16 %v1363_v48  ;;  %v3550_v18 = vld [vmem:[%s6410_s4 + $0x78] sm:$0xf0]  ;;  %v3542_v44 = vld [vmem:[%s6410_s4 + $0x68] sm:$0xf0] }
 0x12d   :  { %v5206_v61 = vpack.c.bf16 %v1032_v55, %v945_v7  ;;  %v1553_v6 = vsel %vm1537_vm11, %v5036_v14, %v1521_v9  ;;  %v1657_v62 = vunpack.c.l.b16 %v1551_v5  ;;  %v1658_v50 = vunpack.c.h.b16 %v1551_v5 }
 0x12e   :  { %v1388_v11 = vunpack.c.h.bf16 %v1363_v48  ;;  %v1391_v43 = vunpack.c.l.bf16 %v1365_v1  ;;  %v1661_v53 = vunpack.c.l.b16 %v1553_v6  ;;  %v1662_v59 = vunpack.c.h.b16 %v1553_v6 }
 0x12f   :  { %v1069_v46 = vunpack.c.l.bf16 %v5206_v61  ;;  %v1070_v31 = vunpack.c.h.bf16 %v5206_v61  ;;  %v1287_v22 = vunpack.c.l.bf16 %v5222_v41  ;;  %v5241_v14 = vadd.f32 %v5157_v8, %v4912_v30  ;;  %v3732_v30 = vld [vmem:[%s6410_s4 + $0x1e0] sm:$0xf]  ;;  %v3931_v8 = vld [vmem:[%s6410_s4 + $0x1e4] sm:$0xf0] }
 0x130   :  { %v1004_v12 = vpop.f32.mrf.mxu2  ;;  %v947_v25 = vadd.f32 %v946_v21, %v918_v60  ;;  %v5252_v58 = vpack.c.b16 %v1661_v53, %v1657_v62  ;;  %v5254_v33 = vpack.c.b16 %v1662_v59, %v1658_v50  ;;  %v3614_v60 = vld [vmem:[%s6410_s4 + $0xf8] sm:$0xf0]  ;;  %v3733_v29 = vor.u32 %v3931_v8, %v3732_v30 }
 0x131   :  { %v1033_v40 = vpop.f32.mrf.mxu3  ;;  %v1133_v51 = vmin.f32 %v1069_v46, 0.0  ;;  %v1134_v15 = vmin.f32 %v1070_v31, 0.0  ;;  %v1005_v7 = vadd.f32 %v1004_v12, %v976_v13  ;;  %v1392_v57 = vunpack.c.h.bf16 %v1365_v1  ;;  %v949_v1 = vpop.f32.mrf.mxu0 }
 0x132   :  { %v978_v49 = vpop.f32.mrf.mxu1  ;;  %v3474_v56 = vadd.f32 -1.0, %v1387_v27  ;;  %2046 = vmatmul.bf16.gmra.mxu0 %v5252_v58  ;;  %2075 = vmatmul.bf16.gmra.mxu1 %v5254_v33  ;;  %v3475_v5 = vadd.f32 -1.0, %v1388_v11  ;;  %v3478_v13 = vadd.f32 -1.0, %v1391_v43  ;;  %v3553_v27 = vor.u32 %v3884_v20, %v3550_v18  ;;  %v3724_v18 = vld [vmem:[%s6410_s4 + $0x1d0] sm:$0xf] }
 0x133   :  { %v1164_v3 = vpack.c.bf16 %v1134_v15, %v1133_v51  ;;  %v979_v21 = vadd.f32 %v978_v49, %v5155_v17  ;;  %v1034_v55 = vadd.f32 %v1033_v40, %v1005_v7  ;;  %2121 = vmatpush.bf16.msrb.mxu3 %v3733_v29  ;;  %v3479_v12 = vadd.f32 -1.0, %v1392_v57  ;;  %v3660_v51 = vld [vmem:[%s6410_s4 + $0x150] sm:$0xf]  ;;  %v3913_v15 = vld [vmem:[%s6410_s4 + $0x154] sm:$0xf0] }
 0x134   :  { %v3617_v62 = vor.u32 %v3900_v23, %v3614_v60  ;;  %v1443_v11 = vpack.c.bf16 %v3475_v5, %v3474_v56  ;;  %v3545_v43 = vor.u32 %v3882_v52, %v3542_v44  ;;  %vm5284_vm12 = vcmp.gt.f32.partialorder %v1083_v42, 0.0  ;;  %v3929_v42 = vld [vmem:[%s6410_s4 + $0x1d4] sm:$0xf0]  ;;  %2149 = vmatpush.bf16.msra.mxu0 %v3553_v27 }
 0x135   :  { %v1181_v48 = vunpack.c.l.bf16 %v1164_v3  ;;  %v1182_v9 = vunpack.c.h.bf16 %v1164_v3  ;;  %v5274_v6 = vpack.c.bf16 %v1034_v55, %v947_v25  ;;  %vm5290_vm13 = vcmp.gt.f32.partialorder %v1084_v45, 0.0 }
 0x136   :  { %v3661_v20 = vor.u32 %v3913_v15, %v3660_v51  ;;  %2178 = vmatpush.bf16.msra.mxu1 %v3617_v62  ;;  %v1288_v45 = vunpack.c.h.bf16 %v5222_v41  ;;  %v3725_v30 = vor.u32 %v3929_v42, %v3724_v18  ;;  %v1445_v60 = vpack.c.bf16 %v3479_v12, %v3478_v13  ;;  %vm1539_vm0 = vmpackc.low %vm5290_vm13, %vm5284_vm12 }
 0x137   :  { %v1213_v50 = vmul.f32 10.0, %v1181_v48  ;;  %v1214_v40 = vmul.f32 10.0, %v1182_v9  ;;  %v1073_v25 = vunpack.c.l.bf16 %v5274_v6  ;;  %v1074_v7 = vunpack.c.h.bf16 %v5274_v6 }
 0x138   :  { %v1007_v53 = vpop.f32.mrf.mxu2  ;;  %v5303_v29 = vmul.f32 1.442695, %v1287_v22  ;;  %2093 = vmatpush.bf16.msrb.mxu2 %v3661_v20  ;;  %v950_v56 = vadd.f32 %v949_v1, %v5024_v36  ;;  %vm5312_vm14 = vcmp.gt.f32.partialorder %v1087_v39, 0.0  ;;  %vm5318_vm15 = vcmp.gt.f32.partialorder %v1088_v26, 0.0  ;;  %2122 = vmatpush.bf16.msrb.mxu3 %v3725_v30  ;;  %v3652_v36 = vld [vmem:[%s6410_s4 + $0x140] sm:$0xf] }
 0x139   :  { %v1008_v23 = vadd.f32 %v1007_v53, %v979_v21  ;;  %v1244_v3 = vpack.c.bf16 %v1214_v40, %v1213_v50  ;;  %v1137_v55 = vmin.f32 %v1073_v25, 0.0  ;;  %v1138_v57 = vmin.f32 %v1074_v7, 0.0  ;;  %v1036_v21 = vpop.f32.mrf.mxu3  ;;  %v3911_v39 = vld [vmem:[%s6410_s4 + $0x144] sm:$0xf0]  ;;  %2150 = vmatpush.bf16.msra.mxu0 %v3545_v43  ;;  %v951_v30 = vpop.f32.mrf.mxu0  ;;  %vm1541_vm1 = vmpackc.low %vm5318_vm15, %vm5312_vm14 }
 0x13a   :  { %v980_v8 = vpop.f32.mrf.mxu1  ;;  %v3653_v13 = vor.u32 %v3911_v39, %v3652_v36  ;;  %v1467_v26 = vunpack.c.l.bf16 %v1443_v11  ;;  %v1468_v1 = vunpack.c.h.bf16 %v1443_v11  ;;  %v1471_v50 = vunpack.c.l.bf16 %v1445_v60  ;;  %v3898_v11 = vld [vmem:[%s6410_s4 + $0xe4] sm:$0xf]  ;;  %v3927_v36 = vld [vmem:[%s6410_s4 + $0x1c4] sm:$0xf0] }
 0x13b   :  { %v1261_v52 = vunpack.c.l.bf16 %v1244_v3  ;;  %v1262_v44 = vunpack.c.h.bf16 %v1244_v3  ;;  %v1037_v48 = vadd.f32 %v1036_v21, %v1008_v23  ;;  %v981_v9 = vadd.f32 %v980_v8, %v5155_v17  ;;  %v3716_v21 = vld [vmem:[%s6410_s4 + $0x1c0] sm:$0xf] }
 0x13c   :  { %v1166_v5 = vpack.c.bf16 %v1138_v57, %v1137_v55  ;;  %2094 = vmatpush.bf16.msrb.mxu2 %v3653_v13  ;;  %v1472_v15 = vunpack.c.h.bf16 %v1445_v60  ;;  %v1499_v53 = vmul.f32 0.100097656, %v1467_v26  ;;  %v1500_v42 = vmul.f32 0.100097656, %v1468_v1  ;;  %v3606_v60 = vld [vmem:[%s6410_s4 + $0xe8] sm:$0xf0] }
 0x13d   :  { %v1295_v12 = vmul.f32 1.442695, %v1261_v52  ;;  %v1297_v27 = vmul.f32 1.442695, %v1262_v44  ;;  %v5329_v62 = vpack.c.bf16 %v1037_v48, %v950_v56  ;;  %v1503_v8 = vmul.f32 0.100097656, %v1471_v50 }
 0x13e   :  { %v1185_v40 = vunpack.c.l.bf16 %v1166_v5  ;;  %v1186_v51 = vunpack.c.h.bf16 %v1166_v5  ;;  %v5340_v55 = vmul.f32 1.442695, %v1288_v45  ;;  %v1504_v44 = vmul.f32 0.100097656, %v1472_v15 }
 0x13f   :  { %3967 = vpow2.f32 %v1295_v12  ;;  %v1077_v20 = vunpack.c.l.bf16 %v5329_v62  ;;  %v1078_v18 = vunpack.c.h.bf16 %v5329_v62  ;;  %v1523_v48 = vpack.c.bf16 %v1500_v42, %v1499_v53 }
 0x140   :  { %v1009_v23 = vpop.f32.mrf.mxu2  ;;  %3969 = vpow2.f32 %v1297_v27  ;;  %v1217_v43 = vmul.f32 10.0, %v1185_v40  ;;  %v1218_v3 = vmul.f32 10.0, %v1186_v51  ;;  %v952_v39 = vadd.f32 %v951_v30, %v5213_v32 }
 0x141   :  { %3971 = vpow2.f32 %v5220_v34  ;;  %v1141_v57 = vmin.f32 %v1077_v20, 0.0  ;;  %v1142_v56 = vmin.f32 %v1078_v18, 0.0  ;;  %v1010_v34 = vadd.f32 %v1009_v23, %v981_v9  ;;  %v1038_v49 = vpop.f32.mrf.mxu3  ;;  %v3644_v9 = vld [vmem:[%s6410_s4 + $0x130] sm:$0xf] }
 0x142   :  { %v1246_v52 = vpack.c.bf16 %v1218_v3, %v1217_v43  ;;  %v3717_v5 = vor.u32 %v3927_v36, %v3716_v21  ;;  %v3609_v13 = vor.u32 %v3898_v11, %v3606_v60  ;;  %v1525_v12 = vpack.c.bf16 %v1504_v44, %v1503_v8  ;;  %v3510_v44 = vld [vmem:[%s6410_s4 + $0x28] sm:$0xf0] }
 0x143   :  { %v1168_v45 = vpack.c.bf16 %v1142_v56, %v1141_v57  ;;  %v1555_v27 = vsel %vm1539_vm0, %v5056_v10, %v1523_v48  ;;  %v3909_v10 = vld [vmem:[%s6410_s4 + $0x134] sm:$0xf0]  ;;  %v1039_v22 = vadd.f32 %v1038_v49, %v1010_v34  ;;  %vm5378_vm2 = vcmp.gt.f32.partialorder %v1069_v46, 0.0  ;;  %v3534_v46 = vld [vmem:[%s6410_s4 + $0x58] sm:$0xf0] }
 0x144   :  { %v1265_v26 = vunpack.c.l.bf16 %v1246_v52  ;;  %v1266_v1 = vunpack.c.h.bf16 %v1246_v52  ;;  %v1665_v32 = vunpack.c.l.b16 %v1555_v27  ;;  %v1666_v59 = vunpack.c.h.b16 %v1555_v27  ;;  %2123 = vmatpush.bf16.msrb.mxu3 %v3717_v5  ;;  %2179 = vmatpush.bf16.msra.mxu1 %v3609_v13  ;;  %v954_v5 = vpop.f32.mrf.mxu0  ;;  %v3598_v13 = vld [vmem:[%s6410_s4 + $0xd8] sm:$0xf0]  ;;  %v3708_v27 = vld [vmem:[%s6410_s4 + $0x1b0] sm:$0xf] }
 0x145   :  { %v3968_v50 = vpop.eup %3967  ;;  %v1189_v40 = vunpack.c.l.bf16 %v1168_v45  ;;  %v1190_v51 = vunpack.c.h.bf16 %v1168_v45  ;;  %v1557_v41 = vsel %vm1541_vm1, %v5106_v38, %v1525_v12  ;;  %v5371_v60 = vpack.c.bf16 %v1039_v22, %v952_v39  ;;  %v3880_v38 = vld [vmem:[%s6410_s4 + $0x54] sm:$0xf]  ;;  %v3878_v22 = vld [vmem:[%s6410_s4 + $0x44] sm:$0xf] }
 0x146   :  { %v3970_v15 = vpop.eup %3969  ;;  %v1303_v53 = vmul.f32 1.442695, %v1265_v26  ;;  %v1305_v42 = vmul.f32 1.442695, %v1266_v1  ;;  %v1669_v30 = vunpack.c.l.b16 %v1557_v41  ;;  %v1670_v8 = vunpack.c.h.b16 %v1557_v41 }
 0x147   :  { %v5369_v23 = vpop.eup %3971  ;;  %v1356_v11 = vpack.c.bf16 %v3970_v15, %v3968_v50  ;;  %v1221_v43 = vmul.f32 10.0, %v1189_v40  ;;  %v1222_v3 = vmul.f32 10.0, %v1190_v51  ;;  %v3645_v57 = vor.u32 %v3909_v10, %v3644_v9  ;;  %v3925_v50 = vld [vmem:[%s6410_s4 + $0x1b4] sm:$0xf0] }
 0x148   :  { %3973 = vpow2.f32 %v1303_v53  ;;  %vm5384_vm3 = vcmp.gt.f32.partialorder %v1070_v31, 0.0  ;;  %v5388_v36 = vpack.c.b16 %v1669_v30, %v1665_v32  ;;  %v5390_v34 = vpack.c.b16 %v1670_v8, %v1666_v59  ;;  %v3896_v31 = vld [vmem:[%s6410_s4 + $0xd4] sm:$0xf]  ;;  %v983_v32 = vpop.f32.mrf.mxu1  ;;  %v1012_v59 = vpop.f32.mrf.mxu2  ;;  %v3894_v8 = vld [vmem:[%s6410_s4 + $0xc4] sm:$0xf] }
 0x149   :  { %v1373_v56 = vunpack.c.l.bf16 %v1356_v11  ;;  %v1374_v21 = vunpack.c.h.bf16 %v1356_v11  ;;  %3975 = vpow2.f32 %v1305_v42  ;;  %v1248_v52 = vpack.c.bf16 %v1222_v3, %v1221_v43  ;;  %2095 = vmatpush.bf16.msrb.mxu2 %v3645_v57  ;;  %v3526_v11 = vld [vmem:[%s6410_s4 + $0x48] sm:$0xf0]  ;;  %vm1532_vm4 = vmpackc.low %vm5384_vm3, %vm5378_vm2 }
 0x14a   :  { %v1081_v45 = vunpack.c.l.bf16 %v5371_v60  ;;  %v1082_v39 = vunpack.c.h.bf16 %v5371_v60  ;;  %3977 = vpow2.f32 %v5230_v24  ;;  %2051 = vmatmul.bf16.gmra.mxu0 %v5388_v36  ;;  %2080 = vmatmul.bf16.gmra.mxu1 %v5390_v34  ;;  %v955_v9 = vadd.f32 %v954_v5, %v5079_v28  ;;  %v3590_v57 = vld [vmem:[%s6410_s4 + $0xc8] sm:$0xf0]  ;;  %v1041_v5 = vpop.f32.mrf.mxu3 }
 0x14b   :  { %v3460_v26 = vadd.f32 -1.0, %v1373_v56  ;;  %v3461_v1 = vadd.f32 -1.0, %v1374_v21  ;;  %v1269_v12 = vunpack.c.l.bf16 %v1248_v52  ;;  %3979 = vpow2.f32 %v5303_v29 }
 0x14c   :  { %v1270_v40 = vunpack.c.h.bf16 %v1248_v52  ;;  %v1145_v24 = vmin.f32 %v1081_v45, 0.0  ;;  %v1146_v51 = vmin.f32 %v1082_v39, 0.0  ;;  %3981 = vpow2.f32 %v5340_v55 }
 0x14d   :  { %v1436_v49 = vpack.c.bf16 %v3461_v1, %v3460_v26  ;;  %v984_v29 = vadd.f32 %v983_v32, %v5155_v17  ;;  %v3709_v53 = vor.u32 %v3925_v50, %v3708_v27  ;;  %v3537_v42 = vor.u32 %v3880_v38, %v3534_v46  ;;  %v3636_v46 = vld [vmem:[%s6410_s4 + $0x120] sm:$0xf] }
 0x14e   :  { %v3974_v10 = vpop.eup %3973  ;;  %v1170_v15 = vpack.c.bf16 %v1146_v51, %v1145_v24  ;;  %v3601_v41 = vor.u32 %v3896_v31, %v3598_v13  ;;  %v1311_v30 = vmul.f32 1.442695, %v1269_v12  ;;  %v1313_v21 = vmul.f32 1.442695, %v1270_v40  ;;  %v3907_v31 = vld [vmem:[%s6410_s4 + $0x124] sm:$0xf0] }
 0x14f   :  { %v3976_v43 = vpop.eup %3975  ;;  %v1453_v55 = vunpack.c.l.bf16 %v1436_v49  ;;  %v1454_v3 = vunpack.c.h.bf16 %v1436_v49  ;;  %v1013_v28 = vadd.f32 %v1012_v59, %v984_v29  ;;  %2124 = vmatpush.bf16.msrb.mxu3 %v3709_v53  ;;  %2151 = vmatpush.bf16.msra.mxu0 %v3537_v42  ;;  %v3529_v27 = vor.u32 %v3878_v22, %v3526_v11  ;;  %v956_v11 = vpop.f32.mrf.mxu0 }
 0x150   :  { %v1358_v56 = vpack.c.bf16 %v3976_v43, %v3974_v10  ;;  %v1193_v52 = vunpack.c.l.bf16 %v1170_v15  ;;  %v1194_v38 = vunpack.c.h.bf16 %v1170_v15  ;;  %v3978_v13 = vpop.eup %3977  ;;  %2180 = vmatpush.bf16.msra.mxu1 %v3601_v41  ;;  %v3593_v10 = vor.u32 %v3894_v8, %v3590_v57 }
 0x151   :  { %v1485_v26 = vmul.f32 0.100097656, %v1453_v55  ;;  %v1486_v1 = vmul.f32 0.100097656, %v1454_v3  ;;  %v1042_v12 = vadd.f32 %v1041_v5, %v1013_v28  ;;  %v3980_v50 = vpop.eup %3979  ;;  %v3637_v15 = vor.u32 %v3907_v31, %v3636_v46 }
 0x152   :  { %v1377_v40 = vunpack.c.l.bf16 %v1358_v56  ;;  %v1378_v24 = vunpack.c.h.bf16 %v1358_v56  ;;  %v1225_v51 = vmul.f32 10.0, %v1193_v52  ;;  %v1226_v32 = vmul.f32 10.0, %v1194_v38  ;;  %v3982_v59 = vpop.eup %3981 }
 0x153   :  { %v1516_v49 = vpack.c.bf16 %v1486_v1, %v1485_v26  ;;  %v5438_v29 = vpack.c.bf16 %v1042_v12, %v955_v9  ;;  %2152 = vmatpush.bf16.msra.mxu0 %v3529_v27  ;;  %v928_v43 = vadd.f32 %v5103_v0, %v5217_v47  ;;  %v5444_v41 = vadd.f32 %v5161_v63, %v5241_v14  ;;  %v985_v63 = vpop.f32.mrf.mxu1  ;;  %v3874_v14 = vld [vmem:[%s6410_s4 + $0x24] sm:$0xf] }
 0x154   :  { %v3464_v53 = vadd.f32 -1.0, %v1377_v40  ;;  %v3465_v42 = vadd.f32 -1.0, %v1378_v24  ;;  %2181 = vmatpush.bf16.msra.mxu1 %v3593_v10  ;;  %2096 = vmatpush.bf16.msrb.mxu2 %v3637_v15  ;;  %3983 = vpow2.f32 %v1311_v30  ;;  %v1250_v47 = vpack.c.bf16 %v1226_v32, %v1225_v51  ;;  %v3892_v10 = vld [vmem:[%s6410_s4 + $0xb4] sm:$0xf]  ;;  %v1043_v15 = vpop.f32.mrf.mxu3 }
 0x155   :  { %v1085_v9 = vunpack.c.l.bf16 %v5438_v29  ;;  %v1086_v22 = vunpack.c.h.bf16 %v5438_v29  ;;  %v5453_v55 = vsel %vm1532_vm4, %v5206_v61, %v1516_v49  ;;  %vm5457_vm5 = vcmp.gt.f32.partialorder %v1073_v25, 0.0  ;;  %v1014_v25 = vpop.f32.mrf.mxu2  ;;  %v3518_v49 = vld [vmem:[%s6410_s4 + $0x38] sm:$0xf0] }
 0x156   :  { %v1438_v0 = vpack.c.bf16 %v3465_v42, %v3464_v53  ;;  %vm5463_vm6 = vcmp.gt.f32.partialorder %v1074_v7, 0.0  ;;  %3985 = vpow2.f32 %v1313_v21  ;;  %v5471_v28 = vadd.f32 %v956_v11, %v928_v43 }
 0x157   :  { %v1149_v61 = vmin.f32 %v1085_v9, 0.0  ;;  %v1150_v30 = vmin.f32 %v1086_v22, 0.0  ;;  %v1651_v8 = vunpack.c.l.b16 %v5453_v55  ;;  %v986_v57 = vadd.f32 %v985_v63, %v5155_v17  ;;  %vm1534_vm10 = vmpackc.low %vm5463_vm6, %vm5457_vm5 }
 0x158   :  { %v1457_v48 = vunpack.c.l.bf16 %v1438_v0  ;;  %v1458_v3 = vunpack.c.h.bf16 %v1438_v0  ;;  %v1367_v7 = vpack.c.bf16 %v3978_v13, %v5369_v23  ;;  %v1369_v56 = vpack.c.bf16 %v3982_v59, %v3980_v50  ;;  %v3700_v23 = vld [vmem:[%s6410_s4 + $0x1a0] sm:$0xf]  ;;  %v3876_v59 = vld [vmem:[%s6410_s4 + $0x34] sm:$0xf] }
 0x159   :  { %vm5478_vm7 = vcmp.gt.f32.partialorder %v1091_v2, 0.0  ;;  %vm5484_vm8 = vcmp.gt.f32.partialorder %v1092_v37, 0.0  ;;  %v1273_v46 = vunpack.c.l.bf16 %v1250_v47  ;;  %v1172_v31 = vpack.c.bf16 %v1150_v30, %v1149_v61  ;;  %v3923_v2 = vld [vmem:[%s6410_s4 + $0x1a4] sm:$0xf0] }
 0x15a   :  { %v1489_v38 = vmul.f32 0.100097656, %v1457_v48  ;;  %v1490_v5 = vmul.f32 0.100097656, %v1458_v3  ;;  %v1274_v13 = vunpack.c.h.bf16 %v1250_v47  ;;  %v6454_v26 = vunpack.c.l.bf16 %v5159_v35  ;;  %v5500_v50 = vpop.eup %3983  ;;  %v3582_v47 = vld [vmem:[%s6410_s4 + $0xb8] sm:$0xf0]  ;;  %vm1543_vm12 = vmpackc.low %vm5484_vm8, %vm5478_vm7 }
 0x15b   :  { %v1395_v1 = vunpack.c.l.bf16 %v1367_v7  ;;  %v1396_v12 = vunpack.c.h.bf16 %v1367_v7  ;;  %v1399_v27 = vunpack.c.l.bf16 %v1369_v56  ;;  %v1197_v24 = vunpack.c.l.bf16 %v1172_v31 }
 0x15c   :  { %vm5496_vm9 = vcmp.gt.f32.partialorder %v6454_v26, 0.0  ;;  %v1518_v40 = vpack.c.bf16 %v1490_v5, %v1489_v38  ;;  %v1198_v51 = vunpack.c.h.bf16 %v1172_v31  ;;  %v1400_v32 = vunpack.c.h.bf16 %v1369_v56  ;;  %v5511_v53 = vpop.eup %3985  ;;  %v988_v26 = vpop.f32.mrf.mxu1 }
 0x15d   :  { %v3482_v42 = vadd.f32 -1.0, %v1395_v1  ;;  %v3483_v43 = vadd.f32 -1.0, %v1396_v12  ;;  %v3486_v11 = vadd.f32 -1.0, %v1399_v27  ;;  %v3701_v0 = vor.u32 %v3923_v2, %v3700_v23 }
 0x15e   :  { %v1652_v63 = vunpack.c.h.b16 %v5453_v55  ;;  %v1229_v61 = vmul.f32 10.0, %v1197_v24  ;;  %v1230_v48 = vmul.f32 10.0, %v1198_v51  ;;  %v3487_v3 = vadd.f32 -1.0, %v1400_v32  ;;  %v3628_v32 = vld [vmem:[%s6410_s4 + $0x110] sm:$0xf]  ;;  %v1046_v55 = vpop.f32.mrf.mxu3 }
 0x15f   :  { %v1550_v30 = vsel %vm1534_vm10, %v5274_v6, %v1518_v40  ;;  %v1319_v7 = vmul.f32 1.442695, %v1273_v46  ;;  %v1447_v56 = vpack.c.bf16 %v3483_v43, %v3482_v42  ;;  %2125 = vmatpush.bf16.msrb.mxu3 %v3701_v0  ;;  %v3521_v38 = vor.u32 %v3876_v59, %v3518_v49  ;;  %v3905_v59 = vld [vmem:[%s6410_s4 + $0x114] sm:$0xf0]  ;;  %v5548_v49 = vpop.f32.mrf.mxu0 }
 0x160   :  { %v5522_v5 = vpack.c.bf16 %v1230_v48, %v1229_v61  ;;  %v1449_v31 = vpack.c.bf16 %v3487_v3, %v3486_v11  ;;  %v3585_v23 = vor.u32 %v3892_v10, %v3582_v47  ;;  %v1015_v2 = vadd.f32 %v1014_v25, %v986_v57  ;;  %v3890_v25 = vld [vmem:[%s6410_s4 + $0xa4] sm:$0xf]  ;;  %v1017_v10 = vpop.f32.mrf.mxu2 }
 0x161   :  { %v1321_v1 = vmul.f32 1.442695, %v1274_v13  ;;  %v6457_v6 = vunpack.c.h.bf16 %v5159_v35  ;;  %v1475_v12 = vunpack.c.l.bf16 %v1447_v56  ;;  %v1476_v27 = vunpack.c.h.bf16 %v1447_v56  ;;  %2153 = vmatpush.bf16.msra.mxu0 %v3521_v38  ;;  %v3574_v13 = vld [vmem:[%s6410_s4 + $0xa8] sm:$0xf0] }
 0x162   :  { %v1655_v57 = vunpack.c.l.b16 %v1550_v30  ;;  %v1656_v40 = vunpack.c.h.b16 %v1550_v30  ;;  %v1479_v24 = vunpack.c.l.bf16 %v1449_v31  ;;  %v1480_v51 = vunpack.c.h.bf16 %v1449_v31  ;;  %2182 = vmatpush.bf16.msra.mxu1 %v3585_v23  ;;  %v3872_v31 = vld [vmem:[%s6410_s4 + $0x14] sm:$0xf]  ;;  %v3502_v23 = vld [vmem:[%s6410_s4 + $0x18] sm:$0xf0] }
 0x163   :  { %vm5532_vm11 = vcmp.gt.f32.partialorder %v6457_v6, 0.0  ;;  %v1507_v42 = vmul.f32 0.100097656, %v1475_v12  ;;  %v1508_v43 = vmul.f32 0.100097656, %v1476_v27  ;;  %v1044_v11 = vadd.f32 %v1043_v15, %v1015_v2  ;;  %v3692_v15 = vld [vmem:[%s6410_s4 + $0x190] sm:$0xf] }
 0x164   :  { %v3513_v0 = vor.u32 %v3874_v14, %v3510_v44  ;;  %3987 = vpow2.f32 %v1319_v7  ;;  %v1277_v47 = vunpack.c.l.bf16 %v5522_v5  ;;  %v1511_v61 = vmul.f32 0.100097656, %v1479_v24  ;;  %v3921_v7 = vld [vmem:[%s6410_s4 + $0x194] sm:$0xf0]  ;;  %vm1545_vm13 = vmpackc.low %vm5532_vm11, %vm5496_vm9  ;;  %v3888_v14 = vld [vmem:[%s6410_s4 + $0x94] sm:$0xf] }
 0x165   :  { %v1512_v48 = vmul.f32 0.100097656, %v1480_v51  ;;  %v1527_v3 = vpack.c.bf16 %v1508_v43, %v1507_v42  ;;  %v5556_v30 = vpack.c.bf16 %v1044_v11, %v5471_v28  ;;  %v3577_v56 = vor.u32 %v3890_v25, %v3574_v13  ;;  %v3566_v44 = vld [vmem:[%s6410_s4 + $0x98] sm:$0xf0]  ;;  %v3886_v27 = vld [vmem:[%s6410_s4 + $0x84] sm:$0xf]  ;;  %v990_v11 = vpop.f32.mrf.mxu1 }
 0x166   :  { %2154 = vmatpush.bf16.msra.mxu0 %v3513_v0  ;;  %v3629_v38 = vor.u32 %v3905_v59, %v3628_v32  ;;  %v5566_v21 = vpack.c.b16 %v1655_v57, %v1651_v8  ;;  %v5568_v52 = vpack.c.b16 %v1656_v40, %v1652_v63  ;;  %3989 = vpow2.f32 %v1321_v1  ;;  %v3903_v51 = vld [vmem:[%s6410_s4 + $0x104] sm:$0xf0]  ;;  %v3684_v0 = vld [vmem:[%s6410_s4 + $0x180] sm:$0xf] }
 0x167   :  { %v1529_v28 = vpack.c.bf16 %v1512_v48, %v1511_v61  ;;  %v1559_v8 = vsel %vm1543_vm12, %v5133_v54, %v1527_v3  ;;  %v1089_v63 = vunpack.c.l.bf16 %v5556_v30  ;;  %v1090_v2 = vunpack.c.h.bf16 %v5556_v30  ;;  %2183 = vmatpush.bf16.msra.mxu1 %v3577_v56  ;;  %v3870_v54 = vld [vmem:[%s6410_s4 + $0x4] sm:$0xf]  ;;  %v3919_v56 = vld [vmem:[%s6410_s4 + $0x184] sm:$0xf0] }
 0x168   :  { %2097 = vmatpush.bf16.msrb.mxu2 %v3629_v38  ;;  %v989_v37 = vadd.f32 %v988_v26, %v5155_v17  ;;  %v1278_v1 = vunpack.c.h.bf16 %v5522_v5  ;;  %v1327_v6 = vmul.f32 1.442695, %v1277_v47  ;;  %v3693_v12 = vor.u32 %v3921_v7, %v3692_v15  ;;  %v3494_v26 = vld [vmem:[%s6410_s4 + $0x8] sm:$0xf0]  ;;  %v3916_v38 = vld [vmem:[%s6410_s4 + $0x174] sm:$0xf] }
 0x169   :  { %v1561_v46 = vsel %vm1545_vm13, %v5159_v35, %v1529_v28  ;;  %v1673_v25 = vunpack.c.l.b16 %v1559_v8  ;;  %v1674_v40 = vunpack.c.h.b16 %v1559_v8  ;;  %v3558_v5 = vld [vmem:[%s6410_s4 + $0x88] sm:$0xf0]  ;;  %v3620_v35 = vld [vmem:[%s6410_s4 + $0x100] sm:$0xf]  ;;  %v1153_v32 = vmin.f32 %v1089_v63, 0.0  ;;  %v961_v8 = vpop.f32.mrf.mxu0 }
 0x16a   :  { %v1677_v57 = vunpack.c.l.b16 %v1561_v46  ;;  %v1678_v24 = vunpack.c.h.b16 %v1561_v46  ;;  %v3988_v13 = vpop.eup %3987  ;;  %v1154_v59 = vmin.f32 %v1090_v2, 0.0  ;;  %2126 = vmatpush.bf16.msrb.mxu3 %v3693_v12  ;;  %v3505_v42 = vor.u32 %v3872_v31, %v3502_v23  ;;  %v3678_v15 = vld [vmem:[%s6410_s4 + $0x178] sm:$0xf0]  ;;  %v3914_v12 = vld [vmem:[%s6410_s4 + $0x164] sm:$0xf] }
 0x16b   :  { %v3569_v43 = vor.u32 %v3888_v14, %v3566_v44  ;;  %v1018_v48 = vadd.f32 %v1017_v10, %v989_v37  ;;  %v3497_v3 = vor.u32 %v3870_v54, %v3494_v26  ;;  %v1329_v28 = vmul.f32 1.442695, %v1278_v1  ;;  %v1019_v37 = vpop.f32.mrf.mxu2  ;;  %v3932_v14 = vld [vmem:[%s6410_s4 + $0x1f4] sm:$0xf]  ;;  %v3742_v44 = vld [vmem:[%s6410_s4 + $0x1f8] sm:$0xf0] }
 0x16c   :  { %v5617_v47 = vpack.c.b16 %v1677_v57, %v1673_v25  ;;  %v5619_v61 = vpack.c.b16 %v1678_v24, %v1674_v40  ;;  %v3990_v7 = vpop.eup %3989  ;;  %v1174_v31 = vpack.c.bf16 %v1154_v59, %v1153_v32  ;;  %2155 = vmatpush.bf16.msra.mxu0 %v3505_v42  ;;  %v3561_v23 = vor.u32 %v3886_v27, %v3558_v5  ;;  %v3670_v26 = vld [vmem:[%s6410_s4 + $0x168] sm:$0xf0]  ;;  %v3662_v42 = vld [vmem:[%s6410_s4 + $0x158] sm:$0xf0] }
 0x16d   :  { %2184 = vmatpush.bf16.msra.mxu1 %v3569_v43  ;;  %v3621_v10 = vor.u32 %v3903_v51, %v3620_v35  ;;  %3991 = vpow2.f32 %v1327_v6  ;;  %v960_v54 = vadd.f32 %v5548_v49, %v5150_v19  ;;  %v1047_v1 = vadd.f32 %v1046_v55, %v1018_v48  ;;  %v3734_v24 = vld [vmem:[%s6410_s4 + $0x1e8] sm:$0xf0]  ;;  %v1048_v51 = vpop.f32.mrf.mxu3 }
 0x16e   :  { %2056 = vmatmul.bf16.gmra.mxu0 %v5617_v47  ;;  %2085 = vmatmul.bf16.gmra.mxu1 %v5619_v61  ;;  %v991_v46 = vadd.f32 %v990_v11, %v5155_v17  ;;  %v1201_v27 = vunpack.c.l.bf16 %v1174_v31  ;;  %v1202_v6 = vunpack.c.h.bf16 %v1174_v31  ;;  %v3685_v25 = vor.u32 %v3919_v56, %v3684_v0  ;;  %v3930_v17 = vld [vmem:[%s6410_s4 + $0x1e4] sm:$0xf] }
 0x16f   :  { %2098 = vmatpush.bf16.msrb.mxu2 %v3621_v10  ;;  %v3681_v57 = vor.u32 %v3916_v38, %v3678_v15  ;;  %v5647_v40 = vpack.c.bf16 %v1047_v1, %v960_v54  ;;  %v962_v19 = vadd.f32 %v961_v8, %v5444_v41  ;;  %v3745_v55 = vor.u32 %v3932_v14, %v3742_v44  ;;  %v3912_v41 = vld [vmem:[%s6410_s4 + $0x154] sm:$0xf] }
 0x170   :  { %v1020_v49 = vadd.f32 %v1019_v37, %v991_v46  ;;  %v1233_v5 = vmul.f32 10.0, %v1201_v27  ;;  %v1234_v35 = vmul.f32 10.0, %v1202_v6  ;;  %2156 = vmatpush.bf16.msra.mxu0 %v3497_v3  ;;  %v3673_v32 = vor.u32 %v3914_v12, %v3670_v26  ;;  %2127 = vmatpush.bf16.msrb.mxu3 %v3685_v25  ;;  %v3726_v27 = vld [vmem:[%s6410_s4 + $0x1d8] sm:$0xf0] }
 0x171   :  { %2185 = vmatpush.bf16.msra.mxu1 %v3561_v23  ;;  %v1360_v59 = vpack.c.bf16 %v5511_v53, %v5500_v50  ;;  %v1093_v43 = vunpack.c.l.bf16 %v5647_v40  ;;  %v1094_v11 = vunpack.c.h.bf16 %v5647_v40  ;;  %v1362_v48 = vpack.c.bf16 %v3990_v7, %v3988_v13 }
 0x172   :  { %v1049_v0 = vadd.f32 %v1048_v51, %v1020_v49  ;;  %2099 = vmatmul.bf16.vlgmr.msrb.gmra.mxu2 %v5566_v21  ;;  %v1254_v3 = vpack.c.bf16 %v1234_v35, %v1233_v5  ;;  %v3737_v50 = vor.u32 %v3930_v17, %v3734_v24  ;;  %3993 = vpow2.f32 %v1329_v28  ;;  %v3928_v28 = vld [vmem:[%s6410_s4 + $0x1d4] sm:$0xf]  ;;  %v3910_v49 = vld [vmem:[%s6410_s4 + $0x144] sm:$0xf] }
 0x173   :  { %2207 = vmatpush.bf16.msra.mxu2 %v3681_v57  ;;  %v1381_v53 = vunpack.c.l.bf16 %v1360_v59  ;;  %v1382_v56 = vunpack.c.h.bf16 %v1360_v59  ;;  %v5667_v38 = vpop.eup %3991  ;;  %v1157_v15 = vmin.f32 %v1093_v43, 0.0  ;;  %v1158_v31 = vmin.f32 %v1094_v11, 0.0  ;;  %2128 = vmatmul.bf16.vlgmr.msrb.gmra.mxu3 %v5568_v52 }
 0x174   :  { %2236 = vmatpush.bf16.msra.mxu3 %v3745_v55  ;;  %v3665_v23 = vor.u32 %v3912_v41, %v3662_v42  ;;  %v1281_v10 = vunpack.c.l.bf16 %v1254_v3  ;;  %v1282_v8 = vunpack.c.h.bf16 %v1254_v3  ;;  %v5673_v37 = vpack.c.bf16 %v1049_v0, %v962_v19  ;;  %v3654_v55 = vld [vmem:[%s6410_s4 + $0x148] sm:$0xf0] }
 0x175   :  { %v1385_v13 = vunpack.c.l.bf16 %v1362_v48  ;;  %v1176_v7 = vpack.c.bf16 %v1158_v31, %v1157_v15  ;;  %v1386_v14 = vunpack.c.h.bf16 %v1362_v48  ;;  %v3468_v44 = vadd.f32 -1.0, %v1381_v53 }
 0x176   :  { %v3469_v54 = vadd.f32 -1.0, %v1382_v56  ;;  %v1335_v1 = vmul.f32 1.442695, %v1281_v10  ;;  %v1337_v46 = vmul.f32 1.442695, %v1282_v8  ;;  %v1097_v12 = vunpack.c.l.bf16 %v5673_v37 }
 0x177   :  { %v1098_v26 = vunpack.c.h.bf16 %v5673_v37  ;;  %2208 = vmatpush.bf16.msra.mxu2 %v3673_v32  ;;  %v1205_v6 = vunpack.c.l.bf16 %v1176_v7  ;;  %v1206_v25 = vunpack.c.h.bf16 %v1176_v7  ;;  %v3472_v57 = vadd.f32 -1.0, %v1385_v13  ;;  %v3718_v13 = vld [vmem:[%s6410_s4 + $0x1c8] sm:$0xf0]  ;;  %v3908_v7 = vld [vmem:[%s6410_s4 + $0x134] sm:$0xf] }
 0x178   :  { %2237 = vmatpush.bf16.msra.mxu3 %v3737_v50  ;;  %v3473_v19 = vadd.f32 -1.0, %v1386_v14  ;;  %vm5692_vm14 = vcmp.gt.f32.partialorder %v1077_v20, 0.0  ;;  %vm5698_vm15 = vcmp.gt.f32.partialorder %v1078_v18, 0.0  ;;  %3995 = vpow2.f32 %v1335_v1  ;;  %v3994_v35 = vpop.eup %3993 }
 0x179   :  { %v1161_v5 = vmin.f32 %v1097_v12, 0.0  ;;  %3997 = vpow2.f32 %v1337_v46  ;;  %v1237_v51 = vmul.f32 10.0, %v1205_v6  ;;  %v1238_v32 = vmul.f32 10.0, %v1206_v25  ;;  %vm1536_vm2 = vmpackc.low %vm5698_vm15, %vm5692_vm14 }
 0x17a   :  { %v1162_v20 = vmin.f32 %v1098_v26, 0.0  ;;  %v1440_v59 = vpack.c.bf16 %v3469_v54, %v3468_v44  ;;  %v1442_v41 = vpack.c.bf16 %v3473_v19, %v3472_v57  ;;  %v3729_v42 = vor.u32 %v3928_v28, %v3726_v27 }
 0x17b   :  { %2209 = vmatpush.bf16.msra.mxu2 %v3665_v23  ;;  %v3657_v0 = vor.u32 %v3910_v49, %v3654_v55  ;;  %vm5708_vm0 = vcmp.gt.f32.partialorder %v1081_v45, 0.0  ;;  %vm5714_vm1 = vcmp.gt.f32.partialorder %v1082_v39, 0.0  ;;  %v1256_v3 = vpack.c.bf16 %v1238_v32, %v1237_v51  ;;  %v3926_v39 = vld [vmem:[%s6410_s4 + $0x1c4] sm:$0xf] }
 0x17c   :  { %v1178_v50 = vpack.c.bf16 %v1162_v20, %v1161_v5  ;;  %v1461_v53 = vunpack.c.l.bf16 %v1440_v59  ;;  %v1462_v56 = vunpack.c.h.bf16 %v1440_v59  ;;  %v1465_v15 = vunpack.c.l.bf16 %v1442_v41  ;;  %2238 = vmatpush.bf16.msra.mxu3 %v3729_v42  ;;  %vm1538_vm3 = vmpackc.low %vm5714_vm1, %vm5708_vm0 }
 0x17d   :  { %v1466_v31 = vunpack.c.h.bf16 %v1442_v41  ;;  %v1285_v23 = vunpack.c.l.bf16 %v1256_v3  ;;  %v1286_v10 = vunpack.c.h.bf16 %v1256_v3  ;;  %v3721_v49 = vor.u32 %v3926_v39, %v3718_v13 }
 0x17e   :  { %2157 = vmatmul.bf16.vlgmr.msra.gmra.mxu0 %v5140_v4  ;;  %2186 = vmatmul.bf16.vlgmr.msra.gmra.mxu1 %v5142_v16  ;;  %v1209_v45 = vunpack.c.l.bf16 %v1178_v50  ;;  %v1210_v8 = vunpack.c.h.bf16 %v1178_v50  ;;  %v3996_v14 = vpop.eup %3995  ;;  %v1493_v44 = vmul.f32 0.100097656, %v1461_v53  ;;  %v1494_v54 = vmul.f32 0.100097656, %v1462_v56  ;;  %v3646_v16 = vld [vmem:[%s6410_s4 + $0x138] sm:$0xf0]  ;;  %v3638_v50 = vld [vmem:[%s6410_s4 + $0x128] sm:$0xf0] }
 0x17f   :  { %v1497_v4 = vmul.f32 0.100097656, %v1465_v15  ;;  %v1498_v28 = vmul.f32 0.100097656, %v1466_v31  ;;  %2210 = vmatpush.bf16.msra.mxu2 %v3657_v0  ;;  %v3998_v1 = vpop.eup %3997  ;;  %v1343_v46 = vmul.f32 1.442695, %v1285_v23  ;;  %v1345_v27 = vmul.f32 1.442695, %v1286_v10 }
 0x180   :  { %v1241_v6 = vmul.f32 10.0, %v1209_v45  ;;  %v1242_v25 = vmul.f32 10.0, %v1210_v8  ;;  %v1520_v57 = vpack.c.bf16 %v1494_v54, %v1493_v44  ;;  %v1364_v55 = vpack.c.bf16 %v3994_v35, %v5667_v38  ;;  %2239 = vmatpush.bf16.msra.mxu3 %v3721_v49  ;;  %v3924_v35 = vld [vmem:[%s6410_s4 + $0x1b4] sm:$0xf] }
 0x181   :  { %v1522_v19 = vpack.c.bf16 %v1498_v28, %v1497_v4  ;;  %3999 = vpow2.f32 %v1343_v46  ;;  %v1366_v51 = vpack.c.bf16 %v3998_v1, %v3996_v14  ;;  %v3649_v32 = vor.u32 %v3908_v7, %v3646_v16 }
 0x182   :  { %v1258_v5 = vpack.c.bf16 %v1242_v25, %v1241_v6  ;;  %4001 = vpow2.f32 %v1345_v27  ;;  %v1552_v20 = vsel %vm1536_vm2, %v5329_v62, %v1520_v57  ;;  %v1389_v24 = vunpack.c.l.bf16 %v1364_v55  ;;  %v3710_v62 = vld [vmem:[%s6410_s4 + $0x1b8] sm:$0xf0] }
 0x183   :  { %v1554_v17 = vsel %vm1538_vm3, %v5371_v60, %v1522_v19  ;;  %v1659_v42 = vunpack.c.l.b16 %v1552_v20  ;;  %2211 = vmatpush.bf16.msra.mxu2 %v3649_v32  ;;  %v1660_v0 = vunpack.c.h.b16 %v1552_v20  ;;  %v1390_v48 = vunpack.c.h.bf16 %v1364_v55  ;;  %v3906_v60 = vld [vmem:[%s6410_s4 + $0x124] sm:$0xf] }
 0x184   :  { %v1289_v59 = vunpack.c.l.bf16 %v1258_v5  ;;  %v1290_v41 = vunpack.c.h.bf16 %v1258_v5  ;;  %v1663_v38 = vunpack.c.l.b16 %v1554_v17  ;;  %v1664_v18 = vunpack.c.h.b16 %v1554_v17  ;;  %v3922_v5 = vld [vmem:[%s6410_s4 + $0x1a4] sm:$0xf] }
 0x185   :  { %v1393_v3 = vunpack.c.l.bf16 %v1366_v51  ;;  %v1394_v31 = vunpack.c.h.bf16 %v1366_v51  ;;  %v3476_v10 = vadd.f32 -1.0, %v1389_v24  ;;  %v3477_v45 = vadd.f32 -1.0, %v1390_v48 }
 0x186   :  { %v1351_v53 = vmul.f32 1.442695, %v1289_v59  ;;  %v1353_v56 = vmul.f32 1.442695, %v1290_v41  ;;  %v5755_v15 = vpack.c.b16 %v1663_v38, %v1659_v42  ;;  %v5757_v23 = vpack.c.b16 %v1664_v18, %v1660_v0  ;;  %v3920_v59 = vld [vmem:[%s6410_s4 + $0x194] sm:$0xf] }
 0x187   :  { %v3480_v8 = vadd.f32 -1.0, %v1393_v3  ;;  %v4000_v39 = vpop.eup %3999  ;;  %v3481_v13 = vadd.f32 -1.0, %v1394_v31  ;;  %v3713_v7 = vor.u32 %v3924_v35, %v3710_v62  ;;  %v3641_v14 = vor.u32 %v3906_v60, %v3638_v50  ;;  %v3694_v35 = vld [vmem:[%s6410_s4 + $0x198] sm:$0xf0]  ;;  %v3902_v62 = vld [vmem:[%s6410_s4 + $0x104] sm:$0xf] }
 0x188   :  { %4003 = vpow2.f32 %v1351_v53  ;;  %2104 = vmatmul.bf16.gmra.mxu2 %v5755_v15  ;;  %v4002_v44 = vpop.eup %4001  ;;  %2133 = vmatmul.bf16.gmra.mxu3 %v5757_v23  ;;  %v1444_v54 = vpack.c.bf16 %v3477_v45, %v3476_v10  ;;  %vm5763_vm4 = vcmp.gt.f32.partialorder %v1085_v9, 0.0  ;;  %vm5769_vm5 = vcmp.gt.f32.partialorder %v1086_v22, 0.0  ;;  %v3622_v60 = vld [vmem:[%s6410_s4 + $0x108] sm:$0xf0] }
 0x189   :  { %4005 = vpow2.f32 %v1353_v56  ;;  %v1446_v4 = vpack.c.bf16 %v3481_v13, %v3480_v8  ;;  %2240 = vmatpush.bf16.msra.mxu3 %v3713_v7  ;;  %2212 = vmatpush.bf16.msra.mxu2 %v3641_v14  ;;  %vm5775_vm6 = vcmp.gt.f32.partialorder %v1089_v63, 0.0  ;;  %vm5781_vm7 = vcmp.gt.f32.partialorder %v1090_v2, 0.0  ;;  %v3702_v2 = vld [vmem:[%s6410_s4 + $0x1a8] sm:$0xf0]  ;;  %vm1540_vm8 = vmpackc.low %vm5769_vm5, %vm5763_vm4  ;;  %v3918_v13 = vld [vmem:[%s6410_s4 + $0x184] sm:$0xf] }
 0x18a   :  { %v1469_v16 = vunpack.c.l.bf16 %v1444_v54  ;;  %v1470_v1 = vunpack.c.h.bf16 %v1444_v54  ;;  %v1368_v22 = vpack.c.bf16 %v4002_v44, %v4000_v39  ;;  %v3705_v20 = vor.u32 %v3922_v5, %v3702_v2  ;;  %vm1542_vm9 = vmpackc.low %vm5781_vm7, %vm5775_vm6  ;;  %v5824_v39 = vld [vmem:[%s6411_s5] sm:$0x3] }
 0x18b   :  { %v1473_v6 = vunpack.c.l.bf16 %v1446_v4  ;;  %v1474_v25 = vunpack.c.h.bf16 %v1446_v4  ;;  %v3697_v3 = vor.u32 %v3920_v59, %v3694_v35  ;;  %v3625_v14 = vor.u32 %v3902_v62, %v3622_v60 }
 0x18c   :  { %v1501_v57 = vmul.f32 0.100097656, %v1469_v16  ;;  %v1502_v19 = vmul.f32 0.100097656, %v1470_v1  ;;  %v1397_v17 = vunpack.c.l.bf16 %v1368_v22  ;;  %v1398_v24 = vunpack.c.h.bf16 %v1368_v22 }
 0x18d   :  { %v1505_v63 = vmul.f32 0.100097656, %v1473_v6  ;;  %v1506_v55 = vmul.f32 0.100097656, %v1474_v25  ;;  %2241 = vmatpush.bf16.msra.mxu3 %v3705_v20  ;;  %v5837_v1 = vperm.slane %v5824_v39, 0  ;;  %vm5843_vm10 = vcmp.gt.f32.partialorder %v1093_v43, 0.0 }
 0x18e   :  { %v4004_v49 = vpop.eup %4003  ;;  %2162 = vmatmul.bf16.gmra.mxu0 %v5252_v58  ;;  %2191 = vmatmul.bf16.gmra.mxu1 %v5254_v33  ;;  %v1524_v32 = vpack.c.bf16 %v1502_v19, %v1501_v57  ;;  %v3904_v58 = vld [vmem:[%s6410_s4 + $0x114] sm:$0xf]  ;;  %v3630_v33 = vld [vmem:[%s6410_s4 + $0x118] sm:$0xf0]  ;;  %v3484_v18 = vadd.f32 -1.0, %v1397_v17  ;;  %v3485_v48 = vadd.f32 -1.0, %v1398_v24 }
 0x18f   :  { %v4006_v51 = vpop.eup %4005  ;;  %v1526_v41 = vpack.c.bf16 %v1506_v55, %v1505_v63  ;;  %v3633_v38 = vor.u32 %v3904_v58, %v3630_v33  ;;  %vm1126_vm11 = vcmp.gt.f32.partialorder %v1094_v11, 0.0  ;;  %vm1129_vm12 = vcmp.gt.f32.partialorder %v1097_v12, 0.0 }
 0x190   :  { %v1370_v42 = vpack.c.bf16 %v4006_v51, %v4004_v49  ;;  %v1556_v0 = vsel %vm1540_vm8, %v5438_v29, %v1524_v32  ;;  %v1448_v8 = vpack.c.bf16 %v3485_v48, %v3484_v18  ;;  %vm1130_vm13 = vcmp.gt.f32.partialorder %v1098_v26, 0.0  ;;  %vm1544_vm14 = vmpackc.low %vm1126_vm11, %vm5843_vm10 }
 0x191   :  { %v1558_v50 = vsel %vm1542_vm9, %v5556_v30, %v1526_v41  ;;  %v1667_v53 = vunpack.c.l.b16 %v1556_v0  ;;  %v1668_v56 = vunpack.c.h.b16 %v1556_v0  ;;  %2213 = vmatpush.bf16.msra.mxu2 %v3633_v38  ;;  %v3686_v30 = vld [vmem:[%s6410_s4 + $0x188] sm:$0xf0]  ;;  %2242 = vmatpush.bf16.msra.mxu3 %v3697_v3  ;;  %vm1546_vm15 = vmpackc.low %vm1130_vm13, %vm1129_vm12  ;;  %vm2571_vm0 = vcmask 31744  }
 0x192   :  { %v1401_v31 = vunpack.c.l.bf16 %v1370_v42  ;;  %v1671_v10 = vunpack.c.l.b16 %v1558_v50  ;;  %v1672_v29 = vunpack.c.h.b16 %v1558_v50  ;;  %v1402_v45 = vunpack.c.h.bf16 %v1370_v42 }
 0x193   :  { %v1477_v28 = vunpack.c.l.bf16 %v1448_v8  ;;  %v1478_v16 = vunpack.c.h.bf16 %v1448_v8  ;;  %v3689_v46 = vor.u32 %v3918_v13, %v3686_v30  ;;  %vm2596_vm4 = vcmask 523264  }
 0x194   :  { %v3488_v7 = vadd.f32 -1.0, %v1401_v31  ;;  %v5832_v44 = vpack.c.b16 %v1671_v10, %v1667_v53  ;;  %v5834_v54 = vpack.c.b16 %v1672_v29, %v1668_v56  ;;  %v3489_v4 = vadd.f32 -1.0, %v1402_v45 }
 0x195   :  { %2214 = vmatpush.bf16.msra.mxu2 %v3625_v14  ;;  %v1509_v6 = vmul.f32 0.100097656, %v1477_v28  ;;  %v1510_v25 = vmul.f32 0.100097656, %v1478_v16  ;;  %2243 = vmatpush.bf16.msra.mxu3 %v3689_v46 }
 0x196   :  { %v1450_v27 = vpack.c.bf16 %v3489_v4, %v3488_v7 }
 0x197   :  { %v1528_v2 = vpack.c.bf16 %v1510_v25, %v1509_v6 }
 0x198   :  { %2109 = vmatmul.bf16.gmra.mxu2 %v5832_v44  ;;  %2138 = vmatmul.bf16.gmra.mxu3 %v5834_v54  ;;  %v1481_v9 = vunpack.c.l.bf16 %v1450_v27  ;;  %v1482_v57 = vunpack.c.h.bf16 %v1450_v27 }
 0x199   :  { %v2042_v19 = vpop.f32.mrf.mxu0  ;;  %v2071_v22 = vpop.f32.mrf.mxu1  ;;  %v1560_v11 = vsel %vm1544_vm14, %v5647_v40, %v1528_v2 }
 0x19a   :  { %v2043_v63 = vadd.f32 %v2042_v19, %v5837_v1  ;;  %v1513_v55 = vmul.f32 0.100097656, %v1481_v9  ;;  %v1514_v5 = vmul.f32 0.100097656, %v1482_v57  ;;  %v1675_v17 = vunpack.c.l.b16 %v1560_v11 }
 0x19b   :  { %v1676_v58 = vunpack.c.h.b16 %v1560_v11 }
 0x19c   :  { %v2072_v51 = vadd.f32 %v2071_v22, %v2043_v63  ;;  %v1530_v43 = vpack.c.bf16 %v1514_v5, %v1513_v55 }
 0x19e   :  { %2167 = vmatmul.bf16.gmra.mxu0 %v5388_v36  ;;  %2196 = vmatmul.bf16.gmra.mxu1 %v5390_v34  ;;  %v1562_v12 = vsel %vm1546_vm15, %v5673_v37, %v1530_v43 }
 0x19f   :  { %v1679_v32 = vunpack.c.l.b16 %v1562_v12  ;;  %v1680_v20 = vunpack.c.h.b16 %v1562_v12 }
 0x1a1   :  { %v2044_v26 = vpop.f32.mrf.mxu0  ;;  %v2073_v33 = vpop.f32.mrf.mxu1  ;;  %v1695_v59 = vpack.c.b16 %v1679_v32, %v1675_v17  ;;  %v1696_v42 = vpack.c.b16 %v1680_v20, %v1676_v58 }
 0x1a2   :  { %v2045_v24 = vadd.f32 %v2044_v26, %v5837_v1 }
 0x1a4   :  { %v2074_v41 = vadd.f32 %v2073_v33, %v2045_v24  ;;  %v5888_v24 = vperm.slane %v5824_v39, 1 }
 0x1a8   :  { %2114 = vmatmul.bf16.gmra.mxu2 %v1695_v59  ;;  %2143 = vmatmul.bf16.gmra.mxu3 %v1696_v42 }
 0x1ae   :  { %2172 = vmatmul.bf16.gmra.mxu0 %v5617_v47  ;;  %2201 = vmatmul.bf16.gmra.mxu1 %v5619_v61 }
 0x1af   :  { %v2047_v36 = vpop.f32.mrf.mxu0  ;;  %v2076_v34 = vpop.f32.mrf.mxu1 }
 0x1b0   :  { %v2048_v40 = vadd.f32 %v2047_v36, %v5837_v1 }
 0x1b2   :  { %v2077_v37 = vadd.f32 %v2076_v34, %v2048_v40 }
 0x1b7   :  { %v2049_v38 = vpop.f32.mrf.mxu0  ;;  %v2078_v0 = vpop.f32.mrf.mxu1 }
 0x1b8   :  { %2215 = vmatmul.bf16.vlgmr.msra.gmra.mxu2 %v5566_v21  ;;  %2244 = vmatmul.bf16.vlgmr.msra.gmra.mxu3 %v5568_v52  ;;  %v2050_v35 = vadd.f32 %v2049_v38, %v5837_v1 }
 0x1ba   :  { %v2079_v18 = vadd.f32 %v2078_v0, %v2050_v35 }
 0x1c7   :  { %v2052_v47 = vpop.f32.mrf.mxu0  ;;  %v2081_v61 = vpop.f32.mrf.mxu1 }
 0x1c8   :  { %2220 = vmatmul.bf16.gmra.mxu2 %v5755_v15  ;;  %2249 = vmatmul.bf16.gmra.mxu3 %v5757_v23  ;;  %v2053_v48 = vadd.f32 %v2052_v47, %v5837_v1 }
 0x1ca   :  { %v2082_v3 = vadd.f32 %v2081_v61, %v2053_v48  ;;  %v5909_v61 = vld [vmem:[%s6413_s1 + $0x18] sm:$0xff] }
 0x1cf   :  { %v2054_v62 = vpop.f32.mrf.mxu0  ;;  %v2083_v21 = vpop.f32.mrf.mxu1 }
 0x1d0   :  { %v2055_v60 = vadd.f32 %v2054_v62, %v5837_v1 }
 0x1d2   :  { %v2084_v50 = vadd.f32 %v2083_v21, %v2055_v60 }
 0x1d8   :  { %2225 = vmatmul.bf16.gmra.mxu2 %v5832_v44  ;;  %2254 = vmatmul.bf16.gmra.mxu3 %v5834_v54 }
 0x1e8   :  { %2230 = vmatmul.bf16.gmra.mxu2 %v1695_v59  ;;  %2259 = vmatmul.bf16.gmra.mxu3 %v1696_v42  ;;  %v5893_v59 = vld [vmem:[%s6413_s1 + $0x10] sm:$0xff] }
 0x1eb   :  { %v2057_v52 = vpop.f32.mrf.mxu0  ;;  %v2086_v15 = vpop.f32.mrf.mxu1 }
 0x1ec   :  { %v2058_v23 = vadd.f32 %v2057_v52, %v5837_v1 }
 0x1ee   :  { %v2087_v53 = vadd.f32 %v2086_v15, %v2058_v23 }
 0x1f3   :  { %v2059_v56 = vpop.f32.mrf.mxu0  ;;  %v2088_v10 = vpop.f32.mrf.mxu1 }
 0x1f4   :  { %v2060_v31 = vadd.f32 %v2059_v56, %v5837_v1 }
 0x1f5   :  { %v2100_v29 = vpop.f32.mrf.mxu2 }
 0x1f6   :  { %v2089_v45 = vadd.f32 %v2088_v10, %v2060_v31  ;;  %v2101_v8 = vadd.f32 %v2100_v29, %v2072_v51  ;;  %v2129_v13 = vpop.f32.mrf.mxu3  ;;  %v52_v10 = vld [vmem:[%s6413_s1 + $0x38] sm:$0xff] }
 0x1f8   :  { %v2130_v30 = vadd.f32 %v2129_v13, %v2101_v8 }
 0x1fb   :  { %v2158_v9 = vpop.f32.mrf.mxu0  ;;  %v2187_v63 = vpop.f32.mrf.mxu1 }
 0x1fc   :  { %v2159_v39 = vadd.f32 %v2158_v9, %v5888_v24 }
 0x1fd   :  { %v2102_v7 = vpop.f32.mrf.mxu2 }
 0x1fe   :  { %v2103_v14 = vadd.f32 %v2102_v7, %v2074_v41  ;;  %v2131_v44 = vpop.f32.mrf.mxu3  ;;  %v5898_v41 = vld [vmem:[%s6412_s7] ss:$0 sm:$0xff]  ;;  %v2188_v35 = vadd.f32 %v2187_v63, %v2159_v39 }
 0x1ff   :  { %v2565_v34 = vmul.f32 %v5898_v41, %v5893_v59  ;;  %v2566_v48 = vmul.f32 %v5898_v41, %v5909_v61  ;;  %v2570_v13 = vmul.f32 %v5898_v41, %v52_v10 }
 0x200   :  { %v5875_v54 = vadd.f32 %v2131_v44, %v2103_v14 }
 0x201   :  { %v2578_v38 = vsel %vm2571_vm0, %v2565_v34, 0.0  ;;  %v2581_v21 = vsel %vm2571_vm0, %v2566_v48, 0.0  ;;  %v2593_v44 = vsel %vm2571_vm0, %v2570_v13, 0.0 }
 0x202   :  { %2579 = vadd.xlane.f32.xlu1 %v2578_v38 }
 0x203   :  { %v2160_v55 = vpop.f32.mrf.mxu0  ;;  %v2189_v11 = vpop.f32.mrf.mxu1 }
 0x204   :  { %v2161_v60 = vadd.f32 %v2160_v55, %v5888_v24 }
 0x20a   :  { %2582 = vadd.xlane.f32.xlu1 %v2581_v21 }
 0x20b   :  { %v2105_v4 = vpop.f32.mrf.mxu2  ;;  %v2134_v28 = vpop.f32.mrf.mxu3 }
 0x20c   :  { %v2106_v16 = vadd.f32 %v2105_v4, %v2077_v37  ;;  %v2163_v20 = vpop.f32.mrf.mxu0  ;;  %v2192_v42 = vpop.f32.mrf.mxu1 }
 0x20e   :  { %v5877_v46 = vadd.f32 %v2134_v28, %v2106_v16 }
 0x212   :  { %2594 = vadd.xlane.f32.xlu1 %v2593_v44 }
 0x213   :  { %v2107_v27 = vpop.f32.mrf.mxu2  ;;  %v2136_v6 = vpop.f32.mrf.mxu3 }
 0x214   :  { %v2108_v25 = vadd.f32 %v2107_v27, %v2079_v18  ;;  %v2165_v40 = vpop.f32.mrf.mxu0 }
 0x216   :  { %v5879_v1 = vadd.f32 %v2136_v6, %v2108_v25 }
 0x21b   :  { %v2110_v57 = vpop.f32.mrf.mxu2  ;;  %v2139_v19 = vpop.f32.mrf.mxu3 }
 0x21c   :  { %v2111_v22 = vadd.f32 %v2110_v57, %v2082_v3  ;;  %v2194_v3 = vpop.f32.mrf.mxu1 }
 0x21e   :  { %v5881_v49 = vadd.f32 %v2139_v19, %v2111_v22 }
 0x223   :  { %v2112_v5 = vpop.f32.mrf.mxu2  ;;  %v2141_v2 = vpop.f32.mrf.mxu3 }
 0x224   :  { %v2113_v51 = vadd.f32 %v2112_v5, %v2084_v50  ;;  %v5915_v50 = vpop.f32.mrf.mxu0  ;;  %v5931_v4 = vpop.f32.mrf.mxu1 }
 0x226   :  { %v5883_v43 = vadd.f32 %v2141_v2, %v2113_v51 }
 0x22b   :  { %v2115_v12 = vpop.f32.mrf.mxu2  ;;  %v2144_v32 = vpop.f32.mrf.mxu3 }
 0x22c   :  { %v2116_v26 = vadd.f32 %v2115_v12, %v2087_v53  ;;  %v2190_v53 = vadd.f32 %v2189_v11, %v2161_v60  ;;  %v2170_v25 = vpop.f32.mrf.mxu0  ;;  %v2199_v39 = vpop.f32.mrf.mxu1 }
 0x22e   :  { %v5885_v17 = vadd.f32 %v2144_v32, %v2116_v26 }
 0x233   :  { %v2117_v58 = vpop.f32.mrf.mxu2  ;;  %v2146_v33 = vpop.f32.mrf.mxu3 }
 0x234   :  { %v2118_v36 = vadd.f32 %v2117_v58, %v2089_v45  ;;  %v2173_v21 = vpop.f32.mrf.mxu0 }
 0x236   :  { %v5903_v37 = vadd.f32 %v2146_v33, %v2118_v36 }
 0x23b   :  { %v2216_v0 = vpop.f32.mrf.mxu2  ;;  %v2245_v18 = vpop.f32.mrf.mxu3 }
 0x23c   :  { %v2217_v47 = vadd.f32 %v2216_v0, %v2188_v35 }
 0x23e   :  { %v2246_v62 = vadd.f32 %v2245_v18, %v2217_v47 }
 0x240   :  { %v5917_v52 = vpack.c.bf16 %v2246_v62, %v2130_v30  ;;  %v2164_v30 = vadd.f32 %v2163_v20, %v5888_v24  ;;  %v2166_v20 = vadd.f32 %v2165_v40, %v5888_v24  ;;  %v5951_v62 = vld [vmem:[%s6413_s1 + $0x20] sm:$0xff] }
 0x242   :  { %v2273_v15 = vunpack.c.l.bf16 %v5917_v52  ;;  %v2274_v23 = vunpack.c.h.bf16 %v5917_v52  ;;  %v2193_v6 = vadd.f32 %v2192_v42, %v2164_v30  ;;  %v2195_v0 = vadd.f32 %v2194_v3, %v2166_v20 }
 0x243   :  { %v2218_v56 = vpop.f32.mrf.mxu2  ;;  %v2247_v31 = vpop.f32.mrf.mxu3 }
 0x244   :  { %v2305_v29 = vmin.f32 %v2273_v15, 0.0  ;;  %v2306_v45 = vmin.f32 %v2274_v23, 0.0  ;;  %v2219_v8 = vadd.f32 %v2218_v56, %v2190_v53  ;;  %vm6008_vm1 = vcmp.gt.f32.partialorder %v2273_v15, 0.0 }
 0x245   :  { %vm6016_vm2 = vcmp.gt.f32.partialorder %v2274_v23, 0.0 }
 0x246   :  { %v2321_v7 = vpack.c.bf16 %v2306_v45, %v2305_v29  ;;  %v2248_v14 = vadd.f32 %v2247_v31, %v2219_v8  ;;  %v2567_v31 = vmul.f32 %v5898_v41, %v5951_v62  ;;  %v2169_v29 = vadd.f32 %v5915_v50, %v5888_v24  ;;  %vm2505_vm3 = vmpackc.low %vm6016_vm2, %vm6008_vm1 }
 0x247   :  { %v2171_v45 = vadd.f32 %v2170_v25, %v5888_v24 }
 0x248   :  { %v2329_v28 = vunpack.c.l.bf16 %v2321_v7  ;;  %v2330_v16 = vunpack.c.h.bf16 %v2321_v7  ;;  %v5934_v27 = vpack.c.bf16 %v2248_v14, %v5875_v54  ;;  %v2584_v14 = vsel %vm2571_vm0, %v2567_v31, 0.0 }
 0x249   :  { %2585 = vadd.xlane.f32.xlu2 %v2584_v14  ;;  %v2198_v25 = vadd.f32 %v5931_v4, %v2169_v29  ;;  %v5986_v4 = vld [vmem:[%s6413_s1 + $0x8] sm:$0xff] }
 0x24a   :  { %v2345_v9 = vmul.f32 10.0, %v2329_v28  ;;  %v2346_v57 = vmul.f32 10.0, %v2330_v16  ;;  %v2275_v19 = vunpack.c.l.bf16 %v5934_v27  ;;  %v2276_v22 = vunpack.c.h.bf16 %v5934_v27 }
 0x24b   :  { %v2221_v63 = vpop.f32.mrf.mxu2  ;;  %v2250_v55 = vpop.f32.mrf.mxu3 }
 0x24c   :  { %v2361_v5 = vpack.c.bf16 %v2346_v57, %v2345_v9  ;;  %v2222_v2 = vadd.f32 %v2221_v63, %v2193_v6  ;;  %v2307_v51 = vmin.f32 %v2275_v19, 0.0  ;;  %v2308_v11 = vmin.f32 %v2276_v22, 0.0 }
 0x24d   :  { %v2174_v57 = vadd.f32 %v2173_v21, %v5888_v24  ;;  %v2564_v21 = vmul.f32 %v5898_v41, %v5986_v4  ;;  %vm6058_vm5 = vcmp.gt.f32.partialorder %v2275_v19, 0.0  ;;  %vm6070_vm6 = vcmp.gt.f32.partialorder %v2276_v22, 0.0 }
 0x24e   :  { %v2369_v54 = vunpack.c.l.bf16 %v2361_v5  ;;  %v2370_v12 = vunpack.c.h.bf16 %v2361_v5  ;;  %v2251_v32 = vadd.f32 %v2250_v55, %v2222_v2  ;;  %v2322_v26 = vpack.c.bf16 %v2308_v11, %v2307_v51  ;;  %vm2506_vm9 = vmpackc.low %vm6070_vm6, %vm6058_vm5 }
 0x24f   :  { %v2200_v11 = vadd.f32 %v2199_v39, %v2171_v45 }
 0x250   :  { %v2385_v58 = vmul.f32 1.442695, %v2369_v54  ;;  %v2387_v33 = vmul.f32 1.442695, %v2370_v12  ;;  %v5944_v42 = vpack.c.bf16 %v2251_v32, %v5877_v46  ;;  %v2331_v36 = vunpack.c.l.bf16 %v2322_v26  ;;  %v5956_v46 = vld [vmem:[%s6413_s1] sm:$0xff] }
 0x251   :  { %v2332_v34 = vunpack.c.h.bf16 %v2322_v26  ;;  %v2563_v10 = vmul.f32 %v5898_v41, %v5956_v46  ;;  %v2202_v26 = vpop.f32.mrf.mxu1 }
 0x252   :  { %4007 = vpow2.f32 %v2385_v58  ;;  %v2277_v38 = vunpack.c.l.bf16 %v5944_v42  ;;  %v2278_v35 = vunpack.c.h.bf16 %v5944_v42  ;;  %v2347_v18 = vmul.f32 10.0, %v2331_v36 }
 0x253   :  { %4009 = vpow2.f32 %v2387_v33  ;;  %v2348_v47 = vmul.f32 10.0, %v2332_v34  ;;  %v2223_v48 = vpop.f32.mrf.mxu2  ;;  %v2252_v40 = vpop.f32.mrf.mxu3  ;;  %v2572_v6 = vsel %vm2571_vm0, %v2563_v10, 0.0  ;;  %v5988_v34 = vadd.f32 %v2202_v26, %v2174_v57 }
 0x254   :  { %v2309_v60 = vmin.f32 %v2277_v38, 0.0  ;;  %v2310_v3 = vmin.f32 %v2278_v35, 0.0  ;;  %v2224_v56 = vadd.f32 %v2223_v48, %v2195_v0  ;;  %2573 = vadd.xlane.f32.xlu0 %v2572_v6  ;;  %vm6083_vm7 = vcmp.gt.f32.partialorder %v2277_v38, 0.0 }
 0x255   :  { %v2362_v53 = vpack.c.bf16 %v2348_v47, %v2347_v18  ;;  %vm6089_vm8 = vcmp.gt.f32.partialorder %v2278_v35, 0.0 }
 0x256   :  { %v2323_v8 = vpack.c.bf16 %v2310_v3, %v2309_v60  ;;  %v2253_v7 = vadd.f32 %v2252_v40, %v2224_v56  ;;  %v2175_v60 = vpop.f32.mrf.mxu0  ;;  %vm2507_vm11 = vmpackc.low %vm6089_vm8, %vm6083_vm7 }
 0x257   :  { %v2371_v13 = vunpack.c.l.bf16 %v2362_v53  ;;  %v2372_v30 = vunpack.c.h.bf16 %v2362_v53 }
 0x258   :  { %v4008_v44 = vpop.eup %4007  ;;  %v2333_v28 = vunpack.c.l.bf16 %v2323_v8  ;;  %v2334_v16 = vunpack.c.h.bf16 %v2323_v8  ;;  %v5973_v50 = vpack.c.bf16 %v2253_v7, %v5879_v1  ;;  %v5981_v1 = vld [vmem:[%s6413_s1 + $0x28] sm:$0xff] }
 0x259   :  { %v4010_v9 = vpop.eup %4009  ;;  %v2389_v63 = vmul.f32 1.442695, %v2371_v13  ;;  %v2391_v55 = vmul.f32 1.442695, %v2372_v30  ;;  %v2568_v40 = vmul.f32 %v5898_v41, %v5981_v1  ;;  %v2575_v30 = vsel %vm2571_vm0, %v2564_v21, 0.0 }
 0x25a   :  { %v2349_v5 = vmul.f32 10.0, %v2333_v28  ;;  %v2350_v2 = vmul.f32 10.0, %v2334_v16  ;;  %v2417_v51 = vpack.c.bf16 %v4010_v9, %v4008_v44  ;;  %v2279_v54 = vunpack.c.l.bf16 %v5973_v50 }
 0x25b   :  { %v2280_v12 = vunpack.c.h.bf16 %v5973_v50  ;;  %v2226_v32 = vpop.f32.mrf.mxu2  ;;  %v2255_v20 = vpop.f32.mrf.mxu3  ;;  %4011 = vpow2.f32 %v2389_v63  ;;  %v2587_v45 = vsel %vm2571_vm0, %v2568_v40, 0.0  ;;  %v6004_v44 = vadd.f32 %v2175_v60, %v5888_v24 }
 0x25c   :  { %v2363_v58 = vpack.c.bf16 %v2350_v2, %v2349_v5  ;;  %v2227_v33 = vadd.f32 %v2226_v32, %v2198_v25  ;;  %v2425_v36 = vunpack.c.l.bf16 %v2417_v51  ;;  %4013 = vpow2.f32 %v2391_v55  ;;  %2588 = vadd.xlane.f32.xlu2 %v2587_v45  ;;  %2576 = vadd.xlane.f32.xlu0 %v2575_v30 }
 0x25d   :  { %v2311_v39 = vmin.f32 %v2279_v54, 0.0  ;;  %v2312_v0 = vmin.f32 %v2280_v12, 0.0  ;;  %v2426_v53 = vunpack.c.h.bf16 %v2417_v51  ;;  %vm6117_vm10 = vcmp.gt.f32.partialorder %v2279_v54, 0.0 }
 0x25e   :  { %v2373_v18 = vunpack.c.l.bf16 %v2363_v58  ;;  %v2374_v47 = vunpack.c.h.bf16 %v2363_v58  ;;  %v2256_v48 = vadd.f32 %v2255_v20, %v2227_v33  ;;  %v3746_v56 = vadd.f32 -1.0, %v2425_v36  ;;  %v6027_v20 = vld [vmem:[%s6413_s1 + $0x30] sm:$0xff]  ;;  %v2537_v33 = vld [vmem:[%s6414_s6] sm:$0x3]  ;;  %s4045_s6 = smov 64  }
 0x25f   :  { %v2324_v3 = vpack.c.bf16 %v2312_v0, %v2311_v39  ;;  %v3747_v7 = vadd.f32 -1.0, %v2426_v53  ;;  %v2569_v36 = vmul.f32 %v5898_v41, %v6027_v20  ;;  %vm6130_vm12 = vcmp.gt.f32.partialorder %v2280_v12, 0.0 }
 0x260   :  { %v2393_v31 = vmul.f32 1.442695, %v2373_v18  ;;  %v2395_v10 = vmul.f32 1.442695, %v2374_v47  ;;  %v5999_v29 = vpack.c.bf16 %v2256_v48, %v5881_v49  ;;  %vm2508_vm13 = vmpackc.low %vm6130_vm12, %vm6117_vm10  ;;  %vm3008_vm12 = vcmask 1042434  }
 0x261   :  { %v2335_v8 = vunpack.c.l.bf16 %v2324_v3  ;;  %v2336_v13 = vunpack.c.h.bf16 %v2324_v3  ;;  %v4012_v14 = vpop.eup %4011  ;;  %v2457_v15 = vpack.c.bf16 %v3747_v7, %v3746_v56  ;;  %v2590_v3 = vsel %vm2571_vm0, %v2569_v36, 0.0 }
 0x262   :  { %v2281_v49 = vunpack.c.l.bf16 %v5999_v29  ;;  %v2282_v16 = vunpack.c.h.bf16 %v5999_v29  ;;  %v4014_v6 = vpop.eup %4013  ;;  %4015 = vpow2.f32 %v2393_v31  ;;  %v6038_v31 = vperm.slane %v2537_v33, 0 }
 0x263   :  { %v2351_v24 = vmul.f32 10.0, %v2335_v8  ;;  %v2352_v57 = vmul.f32 10.0, %v2336_v13  ;;  %v2228_v63 = vpop.f32.mrf.mxu2  ;;  %v2257_v55 = vpop.f32.mrf.mxu3  ;;  %4017 = vpow2.f32 %v2395_v10  ;;  %v2465_v32 = vunpack.c.l.bf16 %v2457_v15 }
 0x264   :  { %v2313_v25 = vmin.f32 %v2281_v49, 0.0  ;;  %v2314_v5 = vmin.f32 %v2282_v16, 0.0  ;;  %v2229_v2 = vadd.f32 %v2228_v63, %v2200_v11  ;;  %v2466_v23 = vunpack.c.h.bf16 %v2457_v15  ;;  %2591 = vadd.xlane.f32.xlu0 %v2590_v3 }
 0x265   :  { %v2364_v51 = vpack.c.bf16 %v2352_v57, %v2351_v24  ;;  %v2418_v39 = vpack.c.bf16 %v4014_v6, %v4012_v14  ;;  %v2481_v18 = vmul.f32 0.100097656, %v2465_v32  ;;  %v6047_v63 = vperm.slane %v2537_v33, 1 }
 0x266   :  { %v2325_v26 = vpack.c.bf16 %v2314_v5, %v2313_v25  ;;  %v2258_v58 = vadd.f32 %v2257_v55, %v2229_v2  ;;  %v2482_v47 = vmul.f32 0.100097656, %v2466_v23  ;;  %vm6151_vm14 = vcmp.gt.f32.partialorder %v2281_v49, 0.0 }
 0x267   :  { %v2375_v11 = vunpack.c.l.bf16 %v2364_v51  ;;  %v2376_v0 = vunpack.c.h.bf16 %v2364_v51  ;;  %v2427_v6 = vunpack.c.l.bf16 %v2418_v39  ;;  %v2428_v24 = vunpack.c.h.bf16 %v2418_v39  ;;  %v2204_v51 = vpop.f32.mrf.mxu1 }
 0x268   :  { %v2337_v48 = vunpack.c.l.bf16 %v2325_v26  ;;  %v2338_v40 = vunpack.c.h.bf16 %v2325_v26  ;;  %v6035_v60 = vpack.c.bf16 %v2258_v58, %v5883_v43  ;;  %v2497_v56 = vpack.c.bf16 %v2482_v47, %v2481_v18  ;;  %v4016_v10 = vpop.eup %4015 }
 0x269   :  { %v2397_v21 = vmul.f32 1.442695, %v2375_v11  ;;  %v2399_v53 = vmul.f32 1.442695, %v2376_v0  ;;  %v4018_v43 = vpop.eup %4017  ;;  %v3749_v58 = vadd.f32 -1.0, %v2428_v24  ;;  %v2205_v33 = vadd.f32 %v2204_v51, %v6004_v44 }
 0x26a   :  { %v2353_v45 = vmul.f32 10.0, %v2337_v48  ;;  %v2354_v41 = vmul.f32 10.0, %v2338_v40  ;;  %v2283_v8 = vunpack.c.l.bf16 %v6035_v60  ;;  %v2284_v13 = vunpack.c.h.bf16 %v6035_v60 }
 0x26b   :  { %4019 = vpow2.f32 %v2397_v21  ;;  %v2231_v30 = vpop.f32.mrf.mxu2  ;;  %v2260_v7 = vpop.f32.mrf.mxu3  ;;  %v2513_v14 = vsel %vm2505_vm3, %v5917_v52, %v2497_v56  ;;  %v3748_v52 = vadd.f32 -1.0, %v2427_v6  ;;  %vm6157_vm15 = vcmp.gt.f32.partialorder %v2282_v16, 0.0 }
 0x26c   :  { %4021 = vpow2.f32 %v2399_v53  ;;  %v2365_v57 = vpack.c.bf16 %v2354_v41, %v2353_v45  ;;  %v2315_v28 = vmin.f32 %v2283_v8, 0.0  ;;  %v2316_v9 = vmin.f32 %v2284_v13, 0.0  ;;  %vm2509_vm1 = vmpackc.low %vm6157_vm15, %vm6151_vm14 }
 0x26d   :  { %v2232_v55 = vadd.f32 %v2231_v30, %v5988_v34  ;;  %v2521_v15 = vunpack.c.l.bf16 %v2513_v14  ;;  %v2522_v2 = vunpack.c.h.bf16 %v2513_v14  ;;  %v2419_v34 = vpack.c.bf16 %v4018_v43, %v4016_v10 }
 0x26e   :  { %v2377_v25 = vunpack.c.l.bf16 %v2365_v57  ;;  %v2378_v5 = vunpack.c.h.bf16 %v2365_v57  ;;  %v2326_v32 = vpack.c.bf16 %v2316_v9, %v2315_v28  ;;  %v2458_v21 = vpack.c.bf16 %v3749_v58, %v3748_v52 }
 0x26f   :  { %v2261_v23 = vadd.f32 %v2260_v7, %v2232_v55  ;;  %v2543_v26 = vmul.f32 %v6038_v31, %v2521_v15  ;;  %v2544_v19 = vmul.f32 %v6047_v63, %v2522_v2  ;;  %v2429_v45 = vunpack.c.l.bf16 %v2419_v34 }
 0x270   :  { %v2401_v36 = vmul.f32 1.442695, %v2377_v25  ;;  %v2339_v0 = vunpack.c.l.bf16 %v2326_v32  ;;  %v2340_v18 = vunpack.c.h.bf16 %v2326_v32  ;;  %v2403_v40 = vmul.f32 1.442695, %v2378_v5 }
 0x271   :  { %v4020_v11 = vpop.eup %4019  ;;  %v6063_v47 = vpack.c.bf16 %v2261_v23, %v5885_v17  ;;  %2645 = vrot.lane.b32.xlu1 %v2543_v26, %s4045_s6  ;;  %v2597_v48 = vsel %vm2596_vm4, %v2543_v26, 0.0  ;;  %v2467_v30 = vunpack.c.l.bf16 %v2458_v21  ;;  %v2468_v7 = vunpack.c.h.bf16 %v2458_v21 }
 0x272   :  { %v4022_v44 = vpop.eup %4021  ;;  %2598 = vadd.xlane.f32.xlu2 %v2597_v48  ;;  %v2355_v53 = vmul.f32 10.0, %v2339_v0  ;;  %v2356_v17 = vmul.f32 10.0, %v2340_v18  ;;  %4023 = vpow2.f32 %v2401_v36  ;;  %v2430_v24 = vunpack.c.h.bf16 %v2419_v34 }
 0x273   :  { %v2285_v56 = vunpack.c.l.bf16 %v6063_v47  ;;  %v2233_v10 = vpop.f32.mrf.mxu2  ;;  %v2286_v41 = vunpack.c.h.bf16 %v6063_v47  ;;  %v2262_v6 = vpop.f32.mrf.mxu3  ;;  %v2483_v9 = vmul.f32 0.100097656, %v2467_v30  ;;  %v2741_v55 = vsel %vm2596_vm4, %v2544_v19, 0.0 }
 0x274   :  { %v2234_v43 = vadd.f32 %v2233_v10, %v2205_v33  ;;  %v2366_v14 = vpack.c.bf16 %v2356_v17, %v2355_v53  ;;  %v2484_v5 = vmul.f32 0.100097656, %v2468_v7  ;;  %v3750_v2 = vadd.f32 -1.0, %v2429_v45 }
 0x275   :  { %v2317_v22 = vmin.f32 %v2285_v56, 0.0  ;;  %v2318_v57 = vmin.f32 %v2286_v41, 0.0  ;;  %v3751_v26 = vadd.f32 -1.0, %v2430_v24  ;;  %v2420_v58 = vpack.c.bf16 %v4022_v44, %v4020_v11 }
 0x276   :  { %v2263_v28 = vadd.f32 %v2262_v6, %v2234_v43  ;;  %v2379_v15 = vunpack.c.l.bf16 %v2366_v14  ;;  %v2380_v25 = vunpack.c.h.bf16 %v2366_v14  ;;  %4025 = vpow2.f32 %v2403_v40 }
 0x277   :  { %v2327_v32 = vpack.c.bf16 %v2318_v57, %v2317_v22  ;;  %v2498_v38 = vpack.c.bf16 %v2484_v5, %v2483_v9  ;;  %v2459_v48 = vpack.c.bf16 %v3751_v26, %v3750_v2  ;;  %v2431_v44 = vunpack.c.l.bf16 %v2420_v58 }
 0x278   :  { %v6094_v23 = vpack.c.bf16 %v2263_v28, %v5903_v37  ;;  %v2405_v33 = vmul.f32 1.442695, %v2379_v15  ;;  %v2407_v36 = vmul.f32 1.442695, %v2380_v25  ;;  %v4024_v37 = vpop.eup %4023  ;;  %v2432_v43 = vunpack.c.h.bf16 %v2420_v58 }
 0x279   :  { %2821 = vrot.lane.b32.xlu1 %v2544_v19, %s4045_s6  ;;  %v2341_v34 = vunpack.c.l.bf16 %v2327_v32  ;;  %v2342_v0 = vunpack.c.h.bf16 %v2327_v32  ;;  %v2514_v11 = vsel %vm2506_vm9, %v5934_v27, %v2498_v38  ;;  %v2469_v3 = vunpack.c.l.bf16 %v2459_v48 }
 0x27a   :  { %v2287_v18 = vunpack.c.l.bf16 %v6094_v23  ;;  %v2288_v35 = vunpack.c.h.bf16 %v6094_v23  ;;  %2742 = vadd.xlane.f32.xlu2 %v2741_v55  ;;  %4027 = vpow2.f32 %v2405_v33  ;;  %v2523_v39 = vunpack.c.l.bf16 %v2514_v11 }
 0x27b   :  { %4029 = vpow2.f32 %v2407_v36  ;;  %v2357_v40 = vmul.f32 10.0, %v2341_v34  ;;  %v2358_v19 = vmul.f32 10.0, %v2342_v0  ;;  %v2524_v17 = vunpack.c.h.bf16 %v2514_v11 }
 0x27c   :  { %v2319_v21 = vmin.f32 %v2287_v18, 0.0  ;;  %v2320_v53 = vmin.f32 %v2288_v35, 0.0  ;;  %v2470_v45 = vunpack.c.h.bf16 %v2459_v48  ;;  %v3752_v30 = vadd.f32 -1.0, %v2431_v44  ;;  %v4026_v7 = vpop.eup %4025 }
 0x27d   :  { %v2367_v10 = vpack.c.bf16 %v2358_v19, %v2357_v40  ;;  %v6109_v14 = vmul.f32 %v6038_v31, %v2523_v39  ;;  %v2546_v22 = vmul.f32 %v6047_v63, %v2524_v17  ;;  %v2485_v6 = vmul.f32 0.100097656, %v2469_v3 }
 0x27e   :  { %v2328_v27 = vpack.c.bf16 %v2320_v53, %v2319_v21  ;;  %v2486_v28 = vmul.f32 0.100097656, %v2470_v45  ;;  %v3753_v9 = vadd.f32 -1.0, %v2432_v43  ;;  %v2421_v0 = vpack.c.bf16 %v4026_v7, %v4024_v37 }
 0x27f   :  { %v2381_v24 = vunpack.c.l.bf16 %v2367_v10  ;;  %v2382_v57 = vunpack.c.h.bf16 %v2367_v10  ;;  %v2600_v5 = vsel %vm2596_vm4, %v6109_v14, 0.0  ;;  %vm6163_vm0 = vcmp.gt.f32.partialorder %v2283_v8, 0.0 }
 0x280   :  { %v4028_v55 = vpop.eup %4027  ;;  %v2343_v15 = vunpack.c.l.bf16 %v2328_v27  ;;  %v2344_v25 = vunpack.c.h.bf16 %v2328_v27  ;;  %2601 = vadd.xlane.f32.xlu0 %v2600_v5  ;;  %v2499_v58 = vpack.c.bf16 %v2486_v28, %v2485_v6  ;;  %v2460_v33 = vpack.c.bf16 %v3753_v9, %v3752_v30 }
 0x281   :  { %2823 = vrot.lane.b32.xlu1 %v2546_v22, %s4045_s6  ;;  %v4030_v2 = vpop.eup %4029  ;;  %v2409_v32 = vmul.f32 1.442695, %v2381_v24  ;;  %v2411_v26 = vmul.f32 1.442695, %v2382_v57  ;;  %v2433_v21 = vunpack.c.l.bf16 %v2421_v0  ;;  %v2434_v37 = vunpack.c.h.bf16 %v2421_v0 }
 0x282   :  { %v2359_v38 = vmul.f32 10.0, %v2343_v15  ;;  %v2360_v34 = vmul.f32 10.0, %v2344_v25  ;;  %v6126_v11 = vsel %vm2507_vm11, %v5944_v42, %v2499_v58  ;;  %v2471_v48 = vunpack.c.l.bf16 %v2460_v33 }
 0x283   :  { %4031 = vpow2.f32 %v2409_v32  ;;  %v2472_v44 = vunpack.c.h.bf16 %v2460_v33  ;;  %v2526_v52 = vunpack.c.h.bf16 %v6126_v11  ;;  %v3754_v3 = vadd.f32 -1.0, %v2433_v21 }
 0x284   :  { %4033 = vpow2.f32 %v2411_v26  ;;  %v2368_v40 = vpack.c.bf16 %v2360_v34, %v2359_v38  ;;  %v2487_v19 = vmul.f32 0.100097656, %v2471_v48  ;;  %v3755_v10 = vadd.f32 -1.0, %v2434_v37 }
 0x285   :  { %v2488_v51 = vmul.f32 0.100097656, %v2472_v44  ;;  %v6136_v42 = vmul.f32 %v6047_v63, %v2526_v52  ;;  %v2422_v12 = vpack.c.bf16 %v4030_v2, %v4028_v55  ;;  %v2744_v30 = vsel %vm2596_vm4, %v2546_v22, 0.0 }
 0x286   :  { %v2383_v53 = vunpack.c.l.bf16 %v2368_v40  ;;  %v2384_v39 = vunpack.c.h.bf16 %v2368_v40  ;;  %v2461_v6 = vpack.c.bf16 %v3755_v10, %v3754_v3  ;;  %vm6173_vm2 = vcmp.gt.f32.partialorder %v2284_v13, 0.0 }
 0x287   :  { %v2500_v17 = vpack.c.bf16 %v2488_v51, %v2487_v19  ;;  %v2435_v24 = vunpack.c.l.bf16 %v2422_v12  ;;  %v2436_v57 = vunpack.c.h.bf16 %v2422_v12  ;;  %vm6182_vm3 = vcmp.gt.f32.partialorder %v2285_v56, 0.0  ;;  %vm2510_vm5 = vmpackc.low %vm6173_vm2, %vm6163_vm0 }
 0x288   :  { %v2413_v45 = vmul.f32 1.442695, %v2383_v53  ;;  %v2415_v43 = vmul.f32 1.442695, %v2384_v39  ;;  %2745 = vadd.xlane.f32.xlu0 %v2744_v30  ;;  %v2473_v22 = vunpack.c.l.bf16 %v2461_v6  ;;  %v2474_v55 = vunpack.c.h.bf16 %v2461_v6 }
 0x289   :  { %2825 = vrot.lane.b32.xlu1 %v6136_v42, %s4045_s6  ;;  %v4032_v7 = vpop.eup %4031  ;;  %v2516_v27 = vsel %vm2508_vm13, %v5973_v50, %v2500_v17  ;;  %v3756_v15 = vadd.f32 -1.0, %v2435_v24  ;;  %v3757_v5 = vadd.f32 -1.0, %v2436_v57  ;;  %vm6196_vm6 = vcmp.gt.f32.partialorder %v2286_v41, 0.0 }
 0x28a   :  { %v4034_v28 = vpop.eup %4033  ;;  %4035 = vpow2.f32 %v2413_v45  ;;  %v2528_v9 = vunpack.c.h.bf16 %v2516_v27  ;;  %v2489_v26 = vmul.f32 0.100097656, %v2473_v22  ;;  %v2490_v58 = vmul.f32 0.100097656, %v2474_v55  ;;  %vm2511_vm7 = vmpackc.low %vm6196_vm6, %vm6182_vm3 }
 0x28b   :  { %4037 = vpow2.f32 %v2415_v43  ;;  %v2423_v2 = vpack.c.bf16 %v4034_v28, %v4032_v7  ;;  %v2462_v33 = vpack.c.bf16 %v3757_v5, %v3756_v15  ;;  %v2527_v8 = vunpack.c.l.bf16 %v2516_v27 }
 0x28c   :  { %v6147_v25 = vmul.f32 %v6047_v63, %v2528_v9  ;;  %v2501_v38 = vpack.c.bf16 %v2490_v58, %v2489_v26  ;;  %v2525_v30 = vunpack.c.l.bf16 %v6126_v11  ;;  %vm2303_vm8 = vcmp.gt.f32.partialorder %v2287_v18, 0.0 }
 0x28d   :  { %v2437_v36 = vunpack.c.l.bf16 %v2423_v2  ;;  %v2438_v34 = vunpack.c.h.bf16 %v2423_v2  ;;  %v2475_v16 = vunpack.c.l.bf16 %v2462_v33  ;;  %v2476_v48 = vunpack.c.h.bf16 %v2462_v33 }
 0x28e   :  { %v2517_v52 = vsel %vm2509_vm1, %v5999_v29, %v2501_v38  ;;  %v2549_v7 = vmul.f32 %v6038_v31, %v2527_v8  ;;  %vm2304_vm9 = vcmp.gt.f32.partialorder %v2288_v35, 0.0  ;;  %v2747_v35 = vsel %vm2596_vm4, %v6136_v42, 0.0 }
 0x28f   :  { %v3758_v44 = vadd.f32 -1.0, %v2437_v36  ;;  %v3759_v19 = vadd.f32 -1.0, %v2438_v34  ;;  %v2529_v51 = vunpack.c.l.bf16 %v2517_v52  ;;  %v2491_v21 = vmul.f32 0.100097656, %v2475_v16  ;;  %vm2512_vm10 = vmpackc.low %vm2304_vm9, %vm2303_vm8 }
 0x290   :  { %v4036_v0 = vpop.eup %4035  ;;  %v2492_v37 = vmul.f32 0.100097656, %v2476_v48  ;;  %v2530_v53 = vunpack.c.h.bf16 %v2517_v52  ;;  %vm3006_vm11 = vcmask 1041409   ;;  %vm3010_vm13 = vcmask 1043459  }
 0x291   :  { %v4038_v54 = vpop.eup %4037  ;;  %v2463_v39 = vpack.c.bf16 %v3759_v19, %v3758_v44  ;;  %v2551_v3 = vmul.f32 %v6038_v31, %v2529_v51  ;;  %v2606_v44 = vsel %vm2596_vm4, %v2549_v7, 0.0  ;;  %vm3012_vm14 = vcmask 1044484  }
 0x292   :  { %2647 = vrot.lane.b32.xlu2 %v6109_v14, %s4045_s6  ;;  %v2424_v17 = vpack.c.bf16 %v4038_v54, %v4036_v0  ;;  %v2502_v10 = vpack.c.bf16 %v2492_v37, %v2491_v21  ;;  %v6188_v14 = vmul.f32 %v6047_v63, %v2530_v53  ;;  %v2750_v54 = vsel %vm2596_vm4, %v6147_v25, 0.0 }
 0x293   :  { %v2477_v29 = vunpack.c.l.bf16 %v2463_v39  ;;  %v2478_v12 = vunpack.c.h.bf16 %v2463_v39  ;;  %v6250_v39 = vpop.xlane.xlu1 %2579  ;;  %vm3014_vm15 = vcmask 1045509   ;;  %vm3016_vm0 = vcmask 1046534  }
 0x294   :  { %v2439_v45 = vunpack.c.l.bf16 %v2424_v17  ;;  %v2440_v43 = vunpack.c.h.bf16 %v2424_v17  ;;  %v2518_v27 = vsel %vm2510_vm5, %v6035_v60, %v2502_v10  ;;  %v2547_v60 = vmul.f32 %v6038_v31, %v2525_v30 }
 0x295   :  { %v2532_v6 = vunpack.c.h.bf16 %v2518_v27  ;;  %v2531_v24 = vunpack.c.l.bf16 %v2518_v27  ;;  %v2493_v57 = vmul.f32 0.100097656, %v2477_v29  ;;  %v2494_v28 = vmul.f32 0.100097656, %v2478_v12 }
 0x296   :  { %v3760_v9 = vadd.f32 -1.0, %v2439_v45  ;;  %v3761_v22 = vadd.f32 -1.0, %v2440_v43  ;;  %v2603_v18 = vsel %vm2596_vm4, %v2547_v60, 0.0  ;;  %v2753_v17 = vsel %vm2596_vm4, %v6188_v14, 0.0 }
 0x297   :  { %v2554_v55 = vmul.f32 %v6047_v63, %v2532_v6  ;;  %v2553_v41 = vmul.f32 %v6038_v31, %v2531_v24  ;;  %v2503_v15 = vpack.c.bf16 %v2494_v28, %v2493_v57  ;;  %vm3018_vm1 = vcmask 1047559  }
 0x298   :  { %v2464_v11 = vpack.c.bf16 %v3761_v22, %v3760_v9 }
 0x299   :  { %v2519_v5 = vsel %vm2511_vm7, %v6063_v47, %v2503_v15  ;;  %v2756_v53 = vsel %vm2596_vm4, %v2554_v55, 0.0  ;;  %v2612_v10 = vsel %vm2596_vm4, %v2553_v41, 0.0 }
 0x29a   :  { %2651 = vrot.lane.b32.xlu2 %v2549_v7, %s4045_s6  ;;  %v2534_v2 = vunpack.c.h.bf16 %v2519_v5  ;;  %v2479_v32 = vunpack.c.l.bf16 %v2464_v11  ;;  %v2480_v50 = vunpack.c.h.bf16 %v2464_v11  ;;  %v2533_v26 = vunpack.c.l.bf16 %v2519_v5 }
 0x29b   :  { %v6254_v13 = vpop.xlane.xlu1 %2582 }
 0x29c   :  { %2649 = vrot.lane.b32.xlu0 %v2547_v60, %s4045_s6  ;;  %v2556_v58 = vmul.f32 %v6047_v63, %v2534_v2  ;;  %v2495_v33 = vmul.f32 0.100097656, %v2479_v32  ;;  %v2496_v36 = vmul.f32 0.100097656, %v2480_v50  ;;  %v2555_v38 = vmul.f32 %v6038_v31, %v2533_v26 }
 0x29e   :  { %v2504_v34 = vpack.c.bf16 %v2496_v36, %v2495_v33  ;;  %v2615_v30 = vsel %vm2596_vm4, %v2555_v38, 0.0 }
 0x2a0   :  { %v2520_v47 = vsel %vm2512_vm10, %v6094_v23, %v2504_v34  ;;  %v2609_v23 = vsel %vm2596_vm4, %v2551_v3, 0.0 }
 0x2a1   :  { %v2535_v0 = vunpack.c.l.bf16 %v2520_v47  ;;  %v2536_v49 = vunpack.c.h.bf16 %v2520_v47 }
 0x2a3   :  { %v2557_v16 = vmul.f32 %v6038_v31, %v2535_v0  ;;  %v2558_v48 = vmul.f32 %v6047_v63, %v2536_v49  ;;  %v6258_v29 = vpop.xlane.xlu1 %2594 }
 0x2a5   :  { %v2618_v12 = vsel %vm2596_vm4, %v2557_v16, 0.0  ;;  %v2762_v9 = vsel %vm2596_vm4, %v2558_v48, 0.0 }
 0x2b3   :  { %2604 = vadd.xlane.f32.xlu1 %v2603_v18 }
 0x2bb   :  { %2748 = vadd.xlane.f32.xlu1 %v2747_v35 }
 0x2bc   :  { %v6229_v31 = vpop.xlane.xlu2 %2585 }
 0x2c3   :  { %2607 = vadd.xlane.f32.xlu2 %v2606_v44 }
 0x2c6   :  { %2751 = vadd.xlane.f32.xlu0 %v2750_v54 }
 0x2c7   :  { %v2574_v63 = vpop.xlane.xlu0 %2573 }
 0x2ce   :  { %2610 = vadd.xlane.f32.xlu0 %v2609_v23 }
 0x2cf   :  { %v6234_v42 = vpop.xlane.xlu2 %2588  ;;  %v2577_v40 = vpop.xlane.xlu0 %2576 }
 0x2d4   :  { %2827 = vrot.lane.b32.xlu1 %v6147_v25, %s4045_s6 }
 0x2d7   :  { %v6243_v51 = vpop.xlane.xlu0 %2591 }
 0x2db   :  { %2831 = vrot.lane.b32.xlu2 %v2554_v55, %s4045_s6 }
 0x2dc   :  { %2653 = vrot.lane.b32.xlu1 %v2551_v3, %s4045_s6  ;;  %v2759_v3 = vsel %vm2596_vm4, %v2556_v58, 0.0 }
 0x2e2   :  { %2655 = vrot.lane.b32.xlu0 %v2553_v41, %s4045_s6 }
 0x2e3   :  { %v2646_v45 = vpop.permute.xlu1 %2645 }
 0x2e4   :  { %2829 = vrot.lane.b32.xlu1 %v6188_v14, %s4045_s6  ;;  %v2669_v43 = vsel %vm2596_vm4, %v2646_v45, 0.0 }
 0x2e5   :  { %v2599_v8 = vpop.xlane.xlu2 %2598 }
 0x2e6   :  { %v2621_v52 = vmul.f32 %v2599_v8, %v5956_v46 }
 0x2e8   :  { %v6241_v19 = vadd.f32 %v2621_v52, %v2574_v63 }
 0x2ea   :  { %2833 = vrot.lane.b32.xlu0 %v2556_v58, %s4045_s6 }
 0x2eb   :  { %v2822_v7 = vpop.permute.xlu1 %2821 }
 0x2ec   :  { %v2845_v27 = vsel %vm2596_vm4, %v2822_v7, 0.0 }
 0x2ed   :  { %v2743_v14 = vpop.xlane.xlu2 %2742 }
 0x2ee   :  { %v2765_v56 = vmul.f32 %v2743_v14, %v5956_v46 }
 0x2f3   :  { %v2602_v25 = vpop.xlane.xlu0 %2601  ;;  %v2824_v57 = vpop.permute.xlu1 %2823 }
 0x2f4   :  { %v2622_v21 = vmul.f32 %v2602_v25, %v5986_v4  ;;  %v2848_v15 = vsel %vm2596_vm4, %v2824_v57, 0.0 }
 0x2f5   :  { %v2648_v6 = vpop.permute.xlu2 %2647 }
 0x2f6   :  { %v6247_v37 = vadd.f32 %v2622_v21, %v2577_v40  ;;  %v2672_v24 = vsel %vm2596_vm4, %v2648_v6, 0.0 }
 0x2fb   :  { %v2826_v28 = vpop.permute.xlu1 %2825  ;;  %v2746_v55 = vpop.xlane.xlu0 %2745 }
 0x2fc   :  { %v2851_v22 = vsel %vm2596_vm4, %v2826_v28, 0.0  ;;  %v2766_v11 = vmul.f32 %v2746_v55, %v5986_v4 }
 0x2fd   :  { %v2652_v41 = vpop.permute.xlu2 %2651 }
 0x2fe   :  { %v2678_v60 = vsel %vm2596_vm4, %v2652_v41, 0.0 }
 0x304   :  { %2757 = vadd.xlane.f32.xlu2 %v2756_v53 }
 0x30e   :  { %2754 = vadd.xlane.f32.xlu1 %v2753_v17  ;;  %v2650_v5 = vpop.permute.xlu0 %2649 }
 0x30f   :  { %v2675_v2 = vsel %vm2596_vm4, %v2650_v5, 0.0 }
 0x314   :  { %2760 = vadd.xlane.f32.xlu0 %v2759_v3 }
 0x316   :  { %2613 = vadd.xlane.f32.xlu1 %v2612_v10 }
 0x31c   :  { %2657 = vrot.lane.b32.xlu2 %v2555_v38, %s4045_s6  ;;  %2619 = vadd.xlane.f32.xlu0 %v2618_v12 }
 0x324   :  { %2670 = vadd.xlane.f32.xlu0 %v2669_v43 }
 0x326   :  { %v6277_v32 = vpop.xlane.xlu1 %2604 }
 0x32e   :  { %v2749_v26 = vpop.xlane.xlu1 %2748 }
 0x32f   :  { %2659 = vrot.lane.b32.xlu1 %v2557_v16, %s4045_s6  ;;  %v2767_v36 = vmul.f32 %v2749_v26, %v5893_v59 }
 0x336   :  { %v6286_v16 = vpop.xlane.xlu2 %2607 }
 0x337   :  { %2835 = vrot.lane.b32.xlu1 %v2558_v48, %s4045_s6 }
 0x338   :  { %2781 = vrot.lane.b32.xlu0 %v2765_v56, %s4046_s3 }
 0x339   :  { %v2752_v50 = vpop.xlane.xlu0 %2751 }
 0x33a   :  { %v2768_v58 = vmul.f32 %v2752_v50, %v5909_v61 }
 0x33e   :  { %v2832_v35 = vpop.permute.xlu2 %2831 }
 0x33f   :  { %v2860_v59 = vsel %vm2596_vm4, %v2832_v35, 0.0 }
 0x341   :  { %v6283_v38 = vpop.xlane.xlu0 %2610 }
 0x345   :  { %2616 = vadd.xlane.f32.xlu2 %v2615_v30 }
 0x346   :  { %v2828_v33 = vpop.permute.xlu1 %2827 }
 0x347   :  { %v2854_v44 = vsel %vm2596_vm4, %v2828_v33, 0.0  ;;  %v6335_v33 = vld [vmem:[%s6413_s1 + $0x38] sm:$0xff] }
 0x34d   :  { %2846 = vadd.xlane.f32.xlu2 %v2845_v27 }
 0x34e   :  { %v2654_v34 = vpop.permute.xlu1 %2653 }
 0x34f   :  { %v2681_v47 = vsel %vm2596_vm4, %v2654_v34, 0.0 }
 0x354   :  { %v2656_v0 = vpop.permute.xlu0 %2655 }
 0x355   :  { %2673 = vadd.xlane.f32.xlu2 %v2672_v24  ;;  %v2684_v7 = vsel %vm2596_vm4, %v2656_v0, 0.0 }
 0x356   :  { %v2830_v49 = vpop.permute.xlu1 %2829 }
 0x357   :  { %v2857_v48 = vsel %vm2596_vm4, %v2830_v49, 0.0 }
 0x35c   :  { %v2834_v61 = vpop.permute.xlu0 %2833 }
 0x35d   :  { %v2863_v18 = vsel %vm2596_vm4, %v2834_v61, 0.0 }
 0x361   :  { %2763 = vadd.xlane.f32.xlu1 %v2762_v9 }
 0x362   :  { %2852 = vadd.xlane.f32.xlu0 %v2851_v22 }
 0x369   :  { %2849 = vadd.xlane.f32.xlu1 %v2848_v15  ;;  %v4039_v15 = vld [vmem:[%s6413_s1 + $0x10] sm:$0xff] }
 0x36a   :  { %2679 = vadd.xlane.f32.xlu0 %v2678_v60 }
 0x36d   :  { %2783 = vrot.lane.b32.xlu2 %v2766_v11, %s4046_s3 }
 0x371   :  { %2676 = vadd.xlane.f32.xlu1 %v2675_v2  ;;  %v6325_v2 = vld [vmem:[%s6413_s1 + $0x18] sm:$0xff] }
 0x377   :  { %v2758_v54 = vpop.xlane.xlu2 %2757 }
 0x378   :  { %v2770_v63 = vmul.f32 %v2758_v54, %v5981_v1 }
 0x37e   :  { %2787 = vrot.lane.b32.xlu0 %v2768_v58, %s4046_s3 }
 0x37f   :  { %v2658_v21 = vpop.permute.xlu2 %2657 }
 0x380   :  { %v2687_v45 = vsel %vm2596_vm4, %v2658_v21, 0.0  ;;  %v2623_v21 = vmul.f32 %v4039_v15, %v6277_v32 }
 0x381   :  { %v2755_v8 = vpop.xlane.xlu1 %2754 }
 0x382   :  { %v2769_v52 = vmul.f32 %v2755_v8, %v5951_v62 }
 0x387   :  { %v2761_v23 = vpop.xlane.xlu0 %2760 }
 0x388   :  { %v2771_v40 = vmul.f32 %v2761_v23, %v6027_v20 }
 0x389   :  { %v6298_v25 = vpop.xlane.xlu1 %2613 }
 0x38a   :  { %2785 = vrot.lane.b32.xlu1 %v2767_v36, %s4046_s3 }
 0x38f   :  { %v6300_v17 = vpop.xlane.xlu0 %2619 }
 0x396   :  { %2682 = vadd.xlane.f32.xlu2 %v2681_v47 }
 0x397   :  { %v2671_v43 = vpop.xlane.xlu0 %2670 }
 0x398   :  { %v2693_v34 = vmul.f32 %v2671_v43, %v5956_v46 }
 0x39e   :  { %2858 = vadd.xlane.f32.xlu2 %v2857_v48 }
 0x3a1   :  { %v2660_v53 = vpop.permute.xlu1 %2659 }
 0x3a2   :  { %v2690_v12 = vsel %vm2596_vm4, %v2660_v53, 0.0 }
 0x3a6   :  { %2864 = vadd.xlane.f32.xlu2 %v2863_v18 }
 0x3a8   :  { %2861 = vadd.xlane.f32.xlu0 %v2860_v59 }
 0x3a9   :  { %v2836_v10 = vpop.permute.xlu1 %2835 }
 0x3aa   :  { %v6306_v30 = vpop.permute.xlu0 %2781  ;;  %v2866_v9 = vsel %vm2596_vm4, %v2836_v10, 0.0  ;;  %vm2917_vm4 = vcmask 7168  }
 0x3b4   :  { %2855 = vadd.xlane.f32.xlu1 %v2854_v44 }
 0x3b8   :  { %v6302_v3 = vpop.xlane.xlu2 %2616 }
 0x3bc   :  { %2791 = vrot.lane.b32.xlu0 %v2770_v63, %s4046_s3 }
 0x3be   :  { %2793 = vrot.lane.b32.xlu2 %v2771_v40, %s4046_s3 }
 0x3c0   :  { %v2847_v14 = vpop.xlane.xlu2 %2846 }
 0x3c1   :  { %v2869_v57 = vmul.f32 %v2847_v14, %v5956_v46 }
 0x3c8   :  { %v2674_v27 = vpop.xlane.xlu2 %2673 }
 0x3c9   :  { %v2694_v24 = vmul.f32 %v2674_v27, %v5986_v4 }
 0x3cd   :  { %2789 = vrot.lane.b32.xlu1 %v2769_v52, %s4046_s3 }
 0x3d0   :  { %v6314_v22 = vpop.permute.xlu2 %2783 }
 0x3d4   :  { %v2764_v56 = vpop.xlane.xlu1 %2763 }
 0x3d5   :  { %v2853_v28 = vpop.xlane.xlu0 %2852  ;;  %v2772_v36 = vmul.f32 %v6335_v33, %v2764_v56 }
 0x3dc   :  { %v2850_v6 = vpop.xlane.xlu1 %2849 }
 0x3dd   :  { %v2870_v55 = vmul.f32 %v2850_v6, %v5986_v4  ;;  %v2680_v60 = vpop.xlane.xlu0 %2679  ;;  %v2871_v4 = vmul.f32 %v4039_v15, %v2853_v28 }
 0x3de   :  { %v2696_v50 = vmul.f32 %v6325_v2, %v2680_v60 }
 0x3e4   :  { %v2677_v41 = vpop.xlane.xlu1 %2676 }
 0x3e5   :  { %v2695_v11 = vmul.f32 %v4039_v15, %v2677_v41 }
 0x3e6   :  { %2688 = vadd.xlane.f32.xlu0 %v2687_v45  ;;  %v2631_v45 = vadd.f32 %v2623_v21, %v6250_v39 }
 0x3e7   :  { %2691 = vadd.xlane.f32.xlu2 %v2690_v12 }
 0x3f0   :  { %v6345_v61 = vpop.permute.xlu0 %2787 }
 0x3f7   :  { %2685 = vadd.xlane.f32.xlu1 %v2684_v7 }
 0x3fa   :  { %2711 = vrot.lane.b32.xlu0 %v2694_v24, %s4047_s15 }
 0x3fc   :  { %v2786_v47 = vpop.permute.xlu1 %2785 }
 0x3ff   :  { %2867 = vadd.xlane.f32.xlu1 %v2866_v9  ;;  %2885 = vrot.lane.b32.xlu2 %v2869_v57, %s4048_s16 }
 0x402   :  { %2887 = vrot.lane.b32.xlu0 %v2870_v55, %s4048_s16 }
 0x407   :  { %2713 = vrot.lane.b32.xlu2 %v2695_v11, %s4047_s15 }
 0x409   :  { %v2683_v5 = vpop.xlane.xlu2 %2682 }
 0x40a   :  { %2715 = vrot.lane.b32.xlu0 %v2696_v50, %s4047_s15  ;;  %v2697_v48 = vmul.f32 %v2683_v5, %v5951_v62 }
 0x40f   :  { %2889 = vrot.lane.b32.xlu2 %v2871_v4, %s4048_s16 }
 0x411   :  { %v2859_v26 = vpop.xlane.xlu2 %2858 }
 0x412   :  { %v2873_v58 = vmul.f32 %v2859_v26, %v5951_v62  ;;  %v4049_v62 = vmov 0  }
 0x413   :  { %3940 = vset.pattern.permute.xlu0 %v4049_v62  ;;  %3941 = vset.pattern.permute.xlu1 %v4049_v62 }
 0x414   :  { %2893 = vrot.lane.b32.xlu0 %v2873_v58, %s4048_s16  ;;  %3939 = vset.pattern.permute.xlu2 %v4049_v62 }
 0x418   :  { %2795 = vrot.lane.b32.xlu1 %v2772_v36, %s4046_s3 }
 0x419   :  { %v2865_v18 = vpop.xlane.xlu2 %2864 }
 0x41a   :  { %v2875_v52 = vmul.f32 %v2865_v18, %v6027_v20 }
 0x41b   :  { %v2862_v35 = vpop.xlane.xlu0 %2861 }
 0x420   :  { %2709 = vrot.lane.b32.xlu1 %v2693_v34, %s4047_s15  ;;  %v2624_v34 = vmul.f32 %v6325_v2, %v6286_v16 }
 0x421   :  { %v6347_v59 = vpop.permute.xlu2 %2793 }
 0x427   :  { %v2856_v0 = vpop.xlane.xlu1 %2855 }
 0x428   :  { %v2872_v49 = vmul.f32 %v6325_v2, %v2856_v0 }
 0x42a   :  { %2891 = vrot.lane.b32.xlu1 %v2872_v49, %s4048_s16 }
 0x42e   :  { %v6349_v44 = vpop.permute.xlu0 %2791 }
 0x432   :  { %2717 = vrot.lane.b32.xlu1 %v2697_v48, %s4047_s15  ;;  %v2632_v48 = vadd.f32 %v2624_v34, %v6254_v13 }
 0x43f   :  { %v6355_v40 = vpop.permute.xlu1 %2789 }
 0x459   :  { %v2689_v54 = vpop.xlane.xlu0 %2688 }
 0x45a   :  { %v2692_v46 = vpop.xlane.xlu2 %2691  ;;  %v2699_v63 = vmul.f32 %v2689_v54, %v6027_v20  ;;  %v2874_v20 = vmul.f32 %v2862_v35, %v5981_v1 }
 0x45b   :  { %v2700_v23 = vmul.f32 %v6335_v33, %v2692_v46 }
 0x45c   :  { %2721 = vrot.lane.b32.xlu0 %v2699_v63, %s4047_s15 }
 0x45d   :  { %2723 = vrot.lane.b32.xlu1 %v2700_v23, %s4047_s15 }
 0x462   :  { %v2886_v8 = vpop.permute.xlu2 %2885 }
 0x464   :  { %2897 = vrot.lane.b32.xlu0 %v2875_v52, %s4048_s16 }
 0x46a   :  { %v2686_v53 = vpop.xlane.xlu1 %2685  ;;  %v2714_v10 = vpop.permute.xlu2 %2713 }
 0x46b   :  { %v2698_v12 = vmul.f32 %v2686_v53, %v5981_v1  ;;  %v2735_v43 = vadd.f32 %v2714_v10, %v2631_v45 }
 0x46c   :  { %v2712_v14 = vpop.permute.xlu0 %2711 }
 0x46d   :  { %2719 = vrot.lane.b32.xlu2 %v2698_v12, %s4047_s15  ;;  %v2734_v56 = vadd.f32 %v2712_v14, %v6247_v37  ;;  %v2807_v7 = vadd.f32 %v2786_v47, %v2735_v43 }
 0x46f   :  { %v2806_v57 = vadd.f32 %v6314_v22, %v2734_v56 }
 0x472   :  { %v2868_v27 = vpop.xlane.xlu1 %2867  ;;  %v2890_v6 = vpop.permute.xlu2 %2889 }
 0x473   :  { %v2876_v24 = vmul.f32 %v6335_v33, %v2868_v27  ;;  %v2911_v32 = vadd.f32 %v2890_v6, %v2807_v7 }
 0x474   :  { %v2888_v39 = vpop.permute.xlu0 %2887 }
 0x475   :  { %v2932_v28 = vsel %vm2917_vm4, %v2911_v32, 0.0  ;;  %2895 = vrot.lane.b32.xlu2 %v2874_v20, %s4048_s16  ;;  %2899 = vrot.lane.b32.xlu1 %v2876_v24, %s4048_s16  ;;  %v2910_v37 = vadd.f32 %v2888_v39, %v2806_v57 }
 0x476   :  { %v2933_v9 = vrot.slane %v2932_v28, 4 }
 0x477   :  { %v2925_v41 = vsel %vm2917_vm4, %v2910_v37, 0.0  ;;  %v4043_v37 = vld [vmem:[%s6413_s1 + $0x28] sm:$0xff] }
 0x478   :  { %v2934_v55 = vadd.f32 %v2933_v9, %v2932_v28  ;;  %v2926_v15 = vrot.slane %v2925_v41, 4 }
 0x47a   :  { %v2935_v1 = vrot.slane %v2934_v55, 2  ;;  %v2927_v11 = vadd.f32 %v2926_v15, %v2925_v41  ;;  %v2628_v15 = vmul.f32 %v6335_v33, %v6300_v17 }
 0x47c   :  { %v2936_v60 = vadd.f32 %v2935_v1, %v2934_v55  ;;  %v2928_v5 = vrot.slane %v2927_v11, 2  ;;  %v2716_v49 = vpop.permute.xlu0 %2715 }
 0x47d   :  { %v2736_v35 = vadd.f32 %v2716_v49, %v2632_v48 }
 0x47e   :  { %v2937_v50 = vrot.slane %v2936_v60, 1  ;;  %v2929_v4 = vadd.f32 %v2928_v5, %v2927_v11  ;;  %v4044_v11 = vld [vmem:[%s6413_s1 + $0x30] sm:$0xff]  ;;  %v2636_v5 = vadd.f32 %v2628_v15, %v6258_v29 }
 0x47f   :  { %v2808_v63 = vadd.f32 %v6345_v61, %v2736_v35 }
 0x480   :  { %v2938_v22 = vadd.f32 %v2937_v50, %v2936_v60  ;;  %v2930_v26 = vrot.slane %v2929_v4, 1  ;;  %v2627_v60 = vmul.f32 %v4044_v11, %v6302_v3 }
 0x482   :  { %2984 = vperm.xlu1 %3941, %v2938_v22   ;;  %v2931_v58 = vadd.f32 %v2930_v26, %v2929_v4 }
 0x484   :  { %2980 = vperm.xlu0 %3940, %v2931_v58  }
 0x486   :  { %v2894_v27 = vpop.permute.xlu0 %2893 }
 0x48a   :  { %v2796_v36 = vpop.permute.xlu1 %2795 }
 0x492   :  { %v2710_v47 = vpop.permute.xlu1 %2709 }
 0x493   :  { %v2733_v0 = vadd.f32 %v2710_v47, %v6241_v19  ;;  %v4042_v19 = vld [vmem:[%s6413_s1 + $0x20] sm:$0xff] }
 0x494   :  { %v2625_v16 = vmul.f32 %v4042_v19, %v6283_v38 }
 0x495   :  { %v2805_v18 = vadd.f32 %v6306_v30, %v2733_v0 }
 0x496   :  { %v2633_v12 = vadd.f32 %v2625_v16, %v6229_v31 }
 0x497   :  { %v2909_v46 = vadd.f32 %v2886_v8, %v2805_v18 }
 0x499   :  { %v2918_v54 = vsel %vm2917_vm4, %v2909_v46, 0.0 }
 0x49a   :  { %v2919_v23 = vrot.slane %v2918_v54, 4 }
 0x49c   :  { %v2920_v62 = vadd.f32 %v2919_v23, %v2918_v54  ;;  %v2892_v52 = vpop.permute.xlu1 %2891 }
 0x49d   :  { %v2912_v21 = vadd.f32 %v2892_v52, %v2808_v63 }
 0x49e   :  { %v2921_v53 = vrot.slane %v2920_v62, 2 }
 0x49f   :  { %v2939_v13 = vsel %vm2917_vm4, %v2912_v21, 0.0 }
 0x4a0   :  { %v2940_v30 = vrot.slane %v2939_v13, 4  ;;  %v2922_v2 = vadd.f32 %v2921_v53, %v2920_v62 }
 0x4a2   :  { %v2941_v8 = vadd.f32 %v2940_v30, %v2939_v13  ;;  %v2923_v10 = vrot.slane %v2922_v2, 1 }
 0x4a4   :  { %v2942_v45 = vrot.slane %v2941_v8, 2  ;;  %v2718_v61 = vpop.permute.xlu1 %2717  ;;  %v2924_v43 = vadd.f32 %v2923_v10, %v2922_v2 }
 0x4a5   :  { %v2737_v14 = vadd.f32 %v2718_v61, %v2633_v12 }
 0x4a6   :  { %v2943_v56 = vadd.f32 %v2942_v45, %v2941_v8  ;;  %2976 = vperm.xlu2 %3939, %v2924_v43  }
 0x4a7   :  { %v2809_v7 = vadd.f32 %v6355_v40, %v2737_v14  ;;  %v2626_v40 = vmul.f32 %v4043_v37, %v6298_v25 }
 0x4a8   :  { %v2944_v6 = vrot.slane %v2943_v56, 1 }
 0x4a9   :  { %v2913_v20 = vadd.f32 %v2894_v27, %v2809_v7  ;;  %v2634_v41 = vadd.f32 %v2626_v40, %v6234_v42  ;;  %v2635_v42 = vadd.f32 %v2627_v60, %v6243_v51 }
 0x4aa   :  { %v2945_v32 = vadd.f32 %v2944_v6, %v2943_v56 }
 0x4ab   :  { %v2946_v38 = vsel %vm2917_vm4, %v2913_v20, 0.0 }
 0x4ac   :  { %v2947_v24 = vrot.slane %v2946_v38, 4 }
 0x4ae   :  { %v2948_v57 = vadd.f32 %v2947_v24, %v2946_v38  ;;  %2988 = vperm.xlu2 %3939, %v2945_v32  }
 0x4b0   :  { %v2949_v28 = vrot.slane %v2948_v57, 2 }
 0x4b2   :  { %v2950_v39 = vadd.f32 %v2949_v28, %v2948_v57 }
 0x4b4   :  { %v2951_v31 = vrot.slane %v2950_v39, 1 }
 0x4b6   :  { %v2952_v9 = vadd.f32 %v2951_v31, %v2950_v39 }
 0x4b8   :  { %2992 = vperm.xlu1 %3941, %v2952_v9  }
 0x4c7   :  { %v2720_v55 = vpop.permute.xlu2 %2719 }
 0x4c8   :  { %v2738_v1 = vadd.f32 %v2720_v55, %v2634_v41 }
 0x4ca   :  { %v2810_v50 = vadd.f32 %v6349_v44, %v2738_v1 }
 0x4ce   :  { %v2722_v25 = vpop.permute.xlu0 %2721 }
 0x4cf   :  { %v2724_v4 = vpop.permute.xlu1 %2723  ;;  %v2896_v22 = vpop.permute.xlu2 %2895  ;;  %v2739_v34 = vadd.f32 %v2722_v25, %v2635_v42 }
 0x4d0   :  { %v2740_v26 = vadd.f32 %v2724_v4, %v2636_v5  ;;  %v2914_v58 = vadd.f32 %v2896_v22, %v2810_v50 }
 0x4d1   :  { %v2811_v3 = vadd.f32 %v6347_v59, %v2739_v34 }
 0x4d2   :  { %v2953_v17 = vsel %vm2917_vm4, %v2914_v58, 0.0  ;;  %v2812_v33 = vadd.f32 %v2796_v36, %v2740_v26 }
 0x4d3   :  { %v2954_v47 = vrot.slane %v2953_v17, 4 }
 0x4d5   :  { %v2955_v0 = vadd.f32 %v2954_v47, %v2953_v17 }
 0x4d6   :  { %v2898_v48 = vpop.permute.xlu0 %2897 }
 0x4d7   :  { %v2956_v49 = vrot.slane %v2955_v0, 2  ;;  %v2915_v18 = vadd.f32 %v2898_v48, %v2811_v3 }
 0x4d9   :  { %v2957_v29 = vadd.f32 %v2956_v49, %v2955_v0  ;;  %v2960_v44 = vsel %vm2917_vm4, %v2915_v18, 0.0 }
 0x4da   :  { %v2961_v46 = vrot.slane %v2960_v44, 4 }
 0x4db   :  { %v2958_v35 = vrot.slane %v2957_v29, 1 }
 0x4dc   :  { %v2962_v23 = vadd.f32 %v2961_v46, %v2960_v44 }
 0x4dd   :  { %v2959_v54 = vadd.f32 %v2958_v35, %v2957_v29 }
 0x4de   :  { %v2963_v51 = vrot.slane %v2962_v23, 2 }
 0x4df   :  { %2996 = vperm.xlu2 %3939, %v2959_v54  }
 0x4e0   :  { %v2964_v63 = vadd.f32 %v2963_v51, %v2962_v23 }
 0x4e2   :  { %v2965_v62 = vrot.slane %v2964_v63, 1 }
 0x4e4   :  { %v2966_v36 = vadd.f32 %v2965_v62, %v2964_v63 }
 0x4e6   :  { %3000 = vperm.xlu0 %3940, %v2966_v36  }
 0x4e7   :  { %v2900_v52 = vpop.permute.xlu1 %2899 }
 0x4e8   :  { %v2916_v21 = vadd.f32 %v2900_v52, %v2812_v33 }
 0x4ea   :  { %v2967_v53 = vsel %vm2917_vm4, %v2916_v21, 0.0 }
 0x4eb   :  { %v2968_v59 = vrot.slane %v2967_v53, 4 }
 0x4ed   :  { %v2969_v19 = vadd.f32 %v2968_v59, %v2967_v53 }
 0x4ef   :  { %v2970_v16 = vrot.slane %v2969_v19, 2 }
 0x4f1   :  { %v2971_v13 = vadd.f32 %v2970_v16, %v2969_v19 }
 0x4f3   :  { %v2972_v30 = vrot.slane %v2971_v13, 1 }
 0x4f4   :  { %v2985_v10 = vpop.permute.xlu1 %2984 }
 0x4f5   :  { %v2973_v2 = vadd.f32 %v2972_v30, %v2971_v13 }
 0x4f6   :  { %v2981_v45 = vpop.permute.xlu0 %2980 }
 0x4f7   :  { %3004 = vperm.xlu1 %3941, %v2973_v2  }
 0x500   :  { %v2977_v8 = vpop.permute.xlu2 %2976 }
 0x501   :  { %v3007_v43 = vsel %vm3006_vm11, %v2981_v45, %v2977_v8 }
 0x502   :  { %v3009_v14 = vsel %vm3008_vm12, %v2985_v10, %v3007_v43 }
 0x508   :  { %v2989_v12 = vpop.permute.xlu2 %2988 }
 0x509   :  { %v3011_v7 = vsel %vm3010_vm13, %v2989_v12, %v3009_v14 }
 0x52a   :  { %v2993_v61 = vpop.permute.xlu1 %2992 }
 0x52b   :  { %v3013_v6 = vsel %vm3012_vm14, %v2993_v61, %v3011_v7 }
 0x539   :  { %v2997_v56 = vpop.permute.xlu2 %2996 }
 0x53a   :  { %v3015_v20 = vsel %vm3014_vm15, %v2997_v56, %v3013_v6 }
 0x558   :  { %v3001_v27 = vpop.permute.xlu0 %3000 }
 0x559   :  { %v3017_v38 = vsel %vm3016_vm0, %v3001_v27, %v3015_v20 }
 0x569   :  { %v3005_v24 = vpop.permute.xlu1 %3004 }
 0x56a   :  { %v3019_v32 = vsel %vm3018_vm1, %v3005_v24, %v3017_v38 }
 0x56b   :  { %3021 = vst [vmem:[%s6415_s8] sm:$0xff] %v3019_v32 }

</bundles_post_ra>
